<compile_context>
chip_gen: v6e
topology: v6e:2x2x1
jax: 0.10.0
libtpu: 0.0.40
codegen_flags: <defaults>
</compile_context>

<pallas_src>
import functools
from typing import NamedTuple

import jax
import jax.numpy as jnp
from jax import lax
from jax.experimental import pallas as pl
from jax.experimental.pallas import tpu as pltpu


# ----------------------------------------------------------------------------
# Static layer configuration (NOT passed through jit as a traced argument)
# ----------------------------------------------------------------------------
class LayerCfg(NamedTuple):
    cin: int
    cout: int
    k: int
    stride: int
    pad: int
    use_bn: bool
    act: str  # "lrelu" | "sigmoid"


def make_configs(in_dim, dim):
    return (
        LayerCfg(in_dim,  dim,     5, 2, 2, False, "lrelu"),
        LayerCfg(dim,     dim * 2, 5, 2, 2, True,  "lrelu"),
        LayerCfg(dim * 2, dim * 4, 5, 2, 2, True,  "lrelu"),
        LayerCfg(dim * 4, dim * 8, 5, 2, 2, True,  "lrelu"),
        LayerCfg(dim * 8, 1,       4, 1, 0, False, "sigmoid"),
    )


# ----------------------------------------------------------------------------
# Pallas kernels
# ----------------------------------------------------------------------------
def _conv_bias_act_kernel(x_ref, w_ref, b_ref, o_ref, *, act):
    # x_ref: (TM, K) bf16, w_ref: (K, CB) bf16, b_ref: (1, CB) f32
    y = jnp.dot(x_ref[...], w_ref[...], preferred_element_type=jnp.float32)
    y = y + b_ref[...]
    if act == "lrelu":
        y = jnp.where(y > 0, y, 0.2 * y)            # LeakyReLU(0.2)
    else:                                            # sigmoid (head layer)
        y = 1.0 / (1.0 + jnp.exp(-y))
    o_ref[...] = y.astype(o_ref.dtype)


def _conv_stats_kernel(x_ref, w_ref, o_ref, sum_ref, sq_ref, *,
                       tile_m, rows, need_mask):
    # BN layers: raw conv output (bias dropped: cancels under batch-mean BN)
    # plus per-(tile, channel-block) sums / sums-of-squares from the f32 acc.
    y = jnp.dot(x_ref[...], w_ref[...], preferred_element_type=jnp.float32)
    o_ref[...] = y.astype(o_ref.dtype)               # bf16 raw conv output
    if need_mask:
        # Edge tile: exclude out-of-range rows from the statistics.
        row = pl.program_id(0) * tile_m + lax.broadcasted_iota(
            jnp.int32, y.shape, 0)
        y = jnp.where(row < rows, y, 0.0)
    sum_ref[...] = jnp.sum(y, axis=0, keepdims=True)[None]       # (1,1,CB)
    sq_ref[...] = jnp.sum(y * y, axis=0, keepdims=True)[None]    # (1,1,CB)


# ----------------------------------------------------------------------------
# Helpers / glue
# ----------------------------------------------------------------------------
def _round_up(x, m):
    return (x + m - 1) // m * m


_VMEM_BUDGET = 32 * 1024 * 1024          # conservative per-kernel tile budget
_COMPILER_PARAMS = pltpu.CompilerParams(
    dimension_semantics=("parallel", "parallel"),   # M-tiles x Cout-blocks
    vmem_limit_bytes=40 * 1024 * 1024,              # headroom on v7x (64 MiB)
)


def _choose_tm(m_arr, k, cblk, tm_target):
    """Biggest M-tile (mult. of 8, <= m_arr) whose tiles fit the VMEM budget."""
    tm_target = max(8, _round_up(tm_target, 8))
    tm = min(tm_target, m_arr)

    def est(t):  # double-buffered bf16 X/W tiles + f32-ish output tile + slack
        return 2 * (t * k * 2 + k * cblk * 2 + t * cblk * 4) + (1 << 20)

    while tm > 8 and est(tm) > _VMEM_BUDGET:
        tm = max(8, _round_up(tm // 2, 8))
    return tm


def im2col_nhwc(x, kh, kw, stride, pad):
    """bf16 NHWC input -> patches (N*OH*OW, KH*KW*C)  (K ordered KH,KW,C)."""
    n, h, w, c = x.shape
    if pad:
        x = jnp.pad(x, ((0, 0), (pad, pad), (pad, pad), (0, 0)))
    oh = (h + 2 * pad - kh) // stride + 1
    ow = (w + 2 * pad - kw) // stride + 1
    cols = []
    for i in range(kh):
        for j in range(kw):
            cols.append(x[:, i:i + stride * oh:stride, j:j + stride * ow:stride, :])
    cols = jnp.stack(cols, axis=3)               # (N, OH, OW, KH*KW, C)
    return cols.reshape(n * oh * ow, kh * kw * c), oh, ow


def _run_conv_pallas(cols, m_true, w_p, b_p, cfg, tm_target):
    """cols: (m_arr, K) bf16 with m_arr a multiple of 8; returns (y, ssum, ssq)."""
    m_arr, k = cols.shape
    cp = w_p.shape[1]
    cblk = 256 if cp % 256 == 0 else 128          # wider MXU tiles when possible
    grid_c = cp // cblk
    tm = _choose_tm(m_arr, k, cblk, tm_target)
    grid_m = pl.cdiv(m_arr, tm)
    need_mask = (m_arr % tm) != 0

    if not cfg.use_bn:
        out_dtype = jnp.float32 if cfg.act == "sigmoid" else jnp.bfloat16
        kern = functools.partial(_conv_bias_act_kernel, act=cfg.act)
        y = pl.pallas_call(
            kern,
            out_shape=jax.ShapeDtypeStruct((m_arr, cp), out_dtype),
            grid=(grid_m, grid_c),
            in_specs=[
                pl.BlockSpec((tm, k), lambda i, j: (i, 0)),
                pl.BlockSpec((k, cblk), lambda i, j: (0, j)),
                pl.BlockSpec((1, cblk), lambda i, j: (0, j)),
            ],
            out_specs=pl.BlockSpec((tm, cblk), lambda i, j: (i, j)),
            compiler_params=_COMPILER_PARAMS,
        )(cols, w_p, b_p)
        return y, None, None

    kern = functools.partial(_conv_stats_kernel, tile_m=tm, rows=m_true,
                             need_mask=need_mask)
    y, ssum, ssq = pl.pallas_call(
        kern,
        out_shape=(
            jax.ShapeDtypeStruct((m_arr, cp), jnp.bfloat16),
            jax.ShapeDtypeStruct((grid_m, 1, cp), jnp.float32),
            jax.ShapeDtypeStruct((grid_m, 1, cp), jnp.float32),
        ),
        grid=(grid_m, grid_c),
        in_specs=[
            pl.BlockSpec((tm, k), lambda i, j: (i, 0)),
            pl.BlockSpec((k, cblk), lambda i, j: (0, j)),
        ],
        out_specs=(
            pl.BlockSpec((tm, cblk), lambda i, j: (i, j)),
            pl.BlockSpec((1, 1, cblk), lambda i, j: (i, 0, j)),
            pl.BlockSpec((1, 1, cblk), lambda i, j: (i, 0, j)),
        ),
        compiler_params=_COMPILER_PARAMS,
    )(cols, w_p)
    return y, ssum, ssq


# ----------------------------------------------------------------------------
# One-time parameter packing (kept out of the per-forward path)
# ----------------------------------------------------------------------------
def pack_params(weights, configs):
    packed = []
    for wd, cfg in zip(weights, configs):
        cout, cin, kh, kw = wd["w"].shape
        k = kh * kw * cin
        cp = _round_up(cout, 128)                                 # lane-dense Cout
        w_mat = wd["w"].transpose(2, 3, 1, 0).reshape(k, cout)    # (KH,KW,Cin,Cout)
        w_p = jnp.pad(w_mat, ((0, 0), (0, cp - cout))).astype(jnp.bfloat16)
        b_p = jnp.pad(wd["b"], (0, cp - cout)).reshape(1, cp).astype(jnp.float32)
        gamma_p = jnp.pad(wd["gamma"], (0, cp - cout)).astype(jnp.float32)
        beta_p = jnp.pad(wd["beta"], (0, cp - cout)).astype(jnp.float32)
        packed.append(dict(w=w_p, b=b_p, gamma=gamma_p, beta=beta_p))
    return packed


# ----------------------------------------------------------------------------
# Parameter init (deterministic, mirrors weights_init of the PyTorch module)
# ----------------------------------------------------------------------------
def init_weights(key, configs):
    weights = []
    for cfg in configs:
        key, kw_, kb_, kg_ = jax.random.split(key, 4)
        w = 0.02 * jax.random.normal(kw_, (cfg.cout, cfg.cin, cfg.k, cfg.k), jnp.float32)
        bound = 1.0 / float((cfg.cin * cfg.k * cfg.k) ** 0.5)
        b = jax.random.uniform(kb_, (cfg.cout,), jnp.float32, -bound, bound)
        if cfg.use_bn:
            gamma = 1.0 + 0.02 * jax.random.normal(kg_, (cfg.cout,), jnp.float32)
        else:
            gamma = jnp.ones((cfg.cout,), jnp.float32)
        beta = jnp.zeros((cfg.cout,), jnp.float32)
        weights.append(dict(w=w, b=b, gamma=gamma, beta=beta))
    return weights


# ----------------------------------------------------------------------------
# Discriminator forward
# ----------------------------------------------------------------------------
def discriminator_forward(x_nchw, packed, configs, tm_target=512):
    n = x_nchw.shape[0]
    a = jnp.transpose(x_nchw, (0, 2, 3, 1)).astype(jnp.bfloat16)   # NHWC, once
    kind, scale, shift = "act", None, None

    for pk, cfg in zip(packed, configs):
        x_in = a[..., :cfg.cin]                      # drop carried channel pad
        if kind == "raw":
            # Fold the previous layer's BatchNorm affine + LeakyReLU here; XLA
            # fuses it with the im2col gather (no extra HBM round trip).
            # NOTE: variance below uses E[x^2]-E[x]^2 in f32 (clamped >= 0);
            # adequate at these scales, documented per review.
            xf = x_in.astype(jnp.float32) * scale[:cfg.cin] + shift[:cfg.cin]
            x_in = jnp.where(xf > 0, xf, 0.2 * xf).astype(jnp.bfloat16)

        cols, oh, ow = im2col_nhwc(x_in, cfg.k, cfg.k, cfg.stride, cfg.pad)
        m = cols.shape[0]
        m_arr = _round_up(m, 8)
        if m_arr != m:
            cols = jnp.pad(cols, ((0, m_arr - m), (0, 0)))

        y, ssum, ssq = _run_conv_pallas(cols, m, pk["w"], pk["b"], cfg, tm_target)
        cp = y.shape[1]
        a = y[:m].reshape(n, oh, ow, cp)             # stays channel-padded bf16

        if cfg.use_bn:
            tot = jnp.sum(ssum[:, 0, :], axis=0)
            tot2 = jnp.sum(ssq[:, 0, :], axis=0)
            mean = tot / float(m)
            var = jnp.maximum(tot2 / float(m) - mean * mean, 0.0)  # biased var
            scale = pk["gamma"] * lax.rsqrt(var + 1e-5)
            shift = pk["beta"] - mean * scale
            kind = "raw"
        else:
            kind, scale, shift = "act", None, None

    # Head layer (Conv->Sigmoid, no BN): a is (N, 1, 1, 128) f32-valued output.
    return a[:, 0, 0, 0].astype(jnp.float32)         # matches y.view(-1)


# ----------------------------------------------------------------------------
# Pure-JAX f32 reference (correctness check only)
# ----------------------------------------------------------------------------
def ref_forward(x, weights, configs):
    y = x
    for wd, cfg in zip(weights, configs):
        y = lax.conv_general_dilated(
            y, wd["w"], (cfg.stride, cfg.stride),
            [(cfg.pad, cfg.pad), (cfg.pad, cfg.pad)],
            dimension_numbers=("NCHW", "OIHW", "NCHW"))
        y = y + wd["b"].reshape(1, -1, 1, 1)
        if cfg.use_bn:
            mean = jnp.mean(y, axis=(0, 2, 3), keepdims=True)
            var = jnp.mean((y - mean) ** 2, axis=(0, 2, 3), keepdims=True)
            y = (y - mean) / jnp.sqrt(var + 1e-5)
            y = y * wd["gamma"].reshape(1, -1, 1, 1) + wd["beta"].reshape(1, -1, 1, 1)
        if cfg.act == "lrelu":
            y = jnp.where(y > 0, y, 0.2 * y)
        else:
            y = 1.0 / (1.0 + jnp.exp(-y))
    return y.reshape(-1)


if __name__ == "__main__":
    key = jax.random.PRNGKey(0)
    k_x, k_p = jax.random.split(key)

    in_dim, dim = 3, 16          # small dim; spatial must be 64 for the 4x4 head
    x = jax.random.normal(k_x, (2, in_dim, 64, 64), jnp.float32)
    configs = make_configs(in_dim, dim)
    weights = init_weights(k_p, configs)
    packed = pack_params(weights, configs)   # pack weights once, outside jit

    fwd = jax.jit(functools.partial(discriminator_forward, configs=configs, tm_target=512))
    out = jax.block_until_ready(fwd(x, packed))

    ref = jax.block_until_ready(ref_forward(x, weights, configs))
    assert out.shape == (2,), out.shape
    assert bool(jnp.all(jnp.isfinite(out)))
    # bf16 activations / bf16 MXU inputs (f32 accumulation) vs f32 reference.
    assert jnp.allclose(out, ref, atol=3e-2, rtol=3e-2), (out, ref)

    # Exercise multi-tile grids + partial edge tiles (in-kernel stat masking).
    fwd_tiled = jax.jit(functools.partial(discriminator_forward, configs=configs, tm_target=80))
    out2 = jax.block_until_ready(fwd_tiled(x, packed))
    assert jnp.allclose(out2, ref, atol=3e-2, rtol=3e-2), (out2, ref)

    print("KERNEL_OK")
</pallas_src>

<mosaic_0001>
module attributes {stable_mosaic.version = 11 : i64} {
  func.func @_conv_bias_act_kernel(%arg0: i32, %arg1: i32, %arg2: memref<512x75xbf16, #tpu.memory_space<vmem>>, %arg3: memref<75x128xbf16, #tpu.memory_space<vmem>>, %arg4: memref<1x128xf32, #tpu.memory_space<vmem>>, %arg5: memref<512x128xbf16, #tpu.memory_space<vmem>>) attributes {dimension_semantics = [#tpu.dimension_semantics<parallel>, #tpu.dimension_semantics<parallel>], iteration_bounds = array<i64: 4, 1>, scalar_prefetch = 0 : i64, scratch_operands = 0 : i64, tpu.core_type = #tpu.core_type<tc>, window_params = [{transform_indices = @transform_0, window_bounds = array<i64: 512, 75>}, {transform_indices = @transform_1, window_bounds = array<i64: 75, 128>}, {transform_indices = @transform_2, window_bounds = array<i64: 1, 128>}, {transform_indices = @transform_3, window_bounds = array<i64: 512, 128>}]} {
    %c0 = arith.constant 0 : index
    %c0_0 = arith.constant 0 : index
    %0 = vector.load %arg2[%c0, %c0_0] : memref<512x75xbf16, #tpu.memory_space<vmem>>, vector<512x75xbf16>
    %c0_1 = arith.constant 0 : index
    %c0_2 = arith.constant 0 : index
    %1 = vector.load %arg3[%c0_1, %c0_2] : memref<75x128xbf16, #tpu.memory_space<vmem>>, vector<75x128xbf16>
    %cst = arith.constant dense<0.000000e+00> : vector<512x128xf32>
    %2 = tpu.matmul %0, %1, %cst {dimension_numbers = #tpu.dot_dimension_numbers<[1], [0], [0], [1], [0, 0, 1, 1], [], []>} : vector<512x75xbf16>, vector<75x128xbf16>, vector<512x128xf32> -> vector<512x128xf32>
    %c0_3 = arith.constant 0 : index
    %c0_4 = arith.constant 0 : index
    %3 = vector.load %arg4[%c0_3, %c0_4] : memref<1x128xf32, #tpu.memory_space<vmem>>, vector<1x128xf32>
    %4 = vector.broadcast %3 : vector<1x128xf32> to vector<512x128xf32>
    %5 = arith.addf %2, %4 : vector<512x128xf32>
    %cst_5 = arith.constant 0.000000e+00 : f32
    %6 = vector.broadcast %cst_5 : f32 to vector<512x128xf32>
    %7 = arith.cmpf ogt, %5, %6 : vector<512x128xf32>
    %cst_6 = arith.constant 2.000000e-01 : f32
    %8 = vector.broadcast %cst_6 : f32 to vector<512x128xf32>
    %9 = arith.mulf %8, %5 : vector<512x128xf32>
    %10 = arith.select %7, %5, %9 : vector<512x128xi1>, vector<512x128xf32>
    %11 = arith.truncf %10 : vector<512x128xf32> to vector<512x128xbf16>
    %c0_7 = arith.constant 0 : index
    %c0_8 = arith.constant 0 : index
    %12 = vector.load %arg5[%c0_7, %c0_8] : memref<512x128xbf16, #tpu.memory_space<vmem>>, vector<512x128xbf16>
    tpu.vector_store %arg5[%c0_7, %c0_8], %11 {strides = array<i32>} : memref<512x128xbf16, #tpu.memory_space<vmem>>, vector<512x128xbf16>,
    return
  }
  func.func @transform_0(%arg0: i32, %arg1: i32) -> (i32, i32) {
    %c0_i32 = arith.constant 0 : i32
    %c0_i32_0 = arith.constant 0 : i32
    return %arg0, %c0_i32 : i32, i32
  }
  func.func @transform_1(%arg0: i32, %arg1: i32) -> (i32, i32) {
    %c0_i32 = arith.constant 0 : i32
    %c0_i32_0 = arith.constant 0 : i32
    return %c0_i32, %arg1 : i32, i32
  }
  func.func @transform_2(%arg0: i32, %arg1: i32) -> (i32, i32) {
    %c0_i32 = arith.constant 0 : i32
    %c0_i32_0 = arith.constant 0 : i32
    return %c0_i32, %arg1 : i32, i32
  }
  func.func @transform_3(%arg0: i32, %arg1: i32) -> (i32, i32) {
    %c0_i32 = arith.constant 0 : i32
    return %arg0, %arg1 : i32, i32
  }
}

module attributes {stable_mosaic.version = 11 : i64} {
  func.func @_conv_stats_kernel(%arg0: i32, %arg1: i32, %arg2: memref<512x400xbf16, #tpu.memory_space<vmem>>, %arg3: memref<400x128xbf16, #tpu.memory_space<vmem>>, %arg4: memref<512x128xbf16, #tpu.memory_space<vmem>>, %arg5: memref<1x1x128xf32, #tpu.memory_space<vmem>>, %arg6: memref<1x1x128xf32, #tpu.memory_space<vmem>>) attributes {dimension_semantics = [#tpu.dimension_semantics<parallel>, #tpu.dimension_semantics<parallel>], iteration_bounds = array<i64: 1, 1>, scalar_prefetch = 0 : i64, scratch_operands = 0 : i64, tpu.core_type = #tpu.core_type<tc>, window_params = [{transform_indices = @transform_0, window_bounds = array<i64: 512, 400>}, {transform_indices = @transform_1, window_bounds = array<i64: 400, 128>}, {transform_indices = @transform_2, window_bounds = array<i64: 512, 128>}, {transform_indices = @transform_3, window_bounds = array<i64: 1, 1, 128>}, {transform_indices = @transform_4, window_bounds = array<i64: 1, 1, 128>}]} {
    %c0 = arith.constant 0 : index
    %c0_0 = arith.constant 0 : index
    %0 = vector.load %arg2[%c0, %c0_0] : memref<512x400xbf16, #tpu.memory_space<vmem>>, vector<512x400xbf16>
    %c0_1 = arith.constant 0 : index
    %c0_2 = arith.constant 0 : index
    %1 = vector.load %arg3[%c0_1, %c0_2] : memref<400x128xbf16, #tpu.memory_space<vmem>>, vector<400x128xbf16>
    %cst = arith.constant dense<0.000000e+00> : vector<512x128xf32>
    %2 = tpu.matmul %0, %1, %cst {dimension_numbers = #tpu.dot_dimension_numbers<[1], [0], [0], [1], [0, 0, 1, 1], [], []>} : vector<512x400xbf16>, vector<400x128xbf16>, vector<512x128xf32> -> vector<512x128xf32>
    %3 = arith.truncf %2 : vector<512x128xf32> to vector<512x128xbf16>
    %c0_3 = arith.constant 0 : index
    %c0_4 = arith.constant 0 : index
    %4 = vector.load %arg4[%c0_3, %c0_4] : memref<512x128xbf16, #tpu.memory_space<vmem>>, vector<512x128xbf16>
    tpu.vector_store %arg4[%c0_3, %c0_4], %3 {strides = array<i32>} : memref<512x128xbf16, #tpu.memory_space<vmem>>, vector<512x128xbf16>,
    %cst_5 = arith.constant dense<0.000000e+00> : vector<128xf32>
    %5 = vector.multi_reduction <add>, %2, %cst_5 [0] : vector<512x128xf32> to vector<128xf32>
    %6 = vector.shape_cast %5 : vector<128xf32> to vector<1x128xf32>
    %7 = vector.shape_cast %6 : vector<1x128xf32> to vector<1x1x128xf32>
    %c0_6 = arith.constant 0 : index
    %c0_7 = arith.constant 0 : index
    %c0_8 = arith.constant 0 : index
    %8 = vector.load %arg5[%c0_6, %c0_7, %c0_8] : memref<1x1x128xf32, #tpu.memory_space<vmem>>, vector<1x1x128xf32>
    tpu.vector_store %arg5[%c0_6, %c0_7, %c0_8], %7 {strides = array<i32>} : memref<1x1x128xf32, #tpu.memory_space<vmem>>, vector<1x1x128xf32>,
    %9 = arith.mulf %2, %2 : vector<512x128xf32>
    %cst_9 = arith.constant dense<0.000000e+00> : vector<128xf32>
    %10 = vector.multi_reduction <add>, %9, %cst_9 [0] : vector<512x128xf32> to vector<128xf32>
    %11 = vector.shape_cast %10 : vector<128xf32> to vector<1x128xf32>
    %12 = vector.shape_cast %11 : vector<1x128xf32> to vector<1x1x128xf32>
    %c0_10 = arith.constant 0 : index
    %c0_11 = arith.constant 0 : index
    %c0_12 = arith.constant 0 : index
    %13 = vector.load %arg6[%c0_10, %c0_11, %c0_12] : memref<1x1x128xf32, #tpu.memory_space<vmem>>, vector<1x1x128xf32>
    tpu.vector_store %arg6[%c0_10, %c0_11, %c0_12], %12 {strides = array<i32>} : memref<1x1x128xf32, #tpu.memory_space<vmem>>, vector<1x1x128xf32>,
    return
  }
  func.func @transform_0(%arg0: i32, %arg1: i32) -> (i32, i32) {
    %c0_i32 = arith.constant 0 : i32
    %c0_i32_0 = arith.constant 0 : i32
    return %arg0, %c0_i32 : i32, i32
  }
  func.func @transform_1(%arg0: i32, %arg1: i32) -> (i32, i32) {
    %c0_i32 = arith.constant 0 : i32
    %c0_i32_0 = arith.constant 0 : i32
    return %c0_i32, %arg1 : i32, i32
  }
  func.func @transform_2(%arg0: i32, %arg1: i32) -> (i32, i32) {
    %c0_i32 = arith.constant 0 : i32
    return %arg0, %arg1 : i32, i32
  }
  func.func @transform_3(%arg0: i32, %arg1: i32) -> (i32, i32, i32) {
    %c0_i32 = arith.constant 0 : i32
    %c0_i32_0 = arith.constant 0 : i32
    return %arg0, %c0_i32, %arg1 : i32, i32, i32
  }
  func.func @transform_4(%arg0: i32, %arg1: i32) -> (i32, i32, i32) {
    %c0_i32 = arith.constant 0 : i32
    %c0_i32_0 = arith.constant 0 : i32
    return %arg0, %c0_i32, %arg1 : i32, i32, i32
  }
}

module attributes {stable_mosaic.version = 11 : i64} {
  func.func @_conv_stats_kernel(%arg0: i32, %arg1: i32, %arg2: memref<128x800xbf16, #tpu.memory_space<vmem>>, %arg3: memref<800x128xbf16, #tpu.memory_space<vmem>>, %arg4: memref<128x128xbf16, #tpu.memory_space<vmem>>, %arg5: memref<1x1x128xf32, #tpu.memory_space<vmem>>, %arg6: memref<1x1x128xf32, #tpu.memory_space<vmem>>) attributes {dimension_semantics = [#tpu.dimension_semantics<parallel>, #tpu.dimension_semantics<parallel>], iteration_bounds = array<i64: 1, 1>, scalar_prefetch = 0 : i64, scratch_operands = 0 : i64, tpu.core_type = #tpu.core_type<tc>, window_params = [{transform_indices = @transform_0, window_bounds = array<i64: 128, 800>}, {transform_indices = @transform_1, window_bounds = array<i64: 800, 128>}, {transform_indices = @transform_2, window_bounds = array<i64: 128, 128>}, {transform_indices = @transform_3, window_bounds = array<i64: 1, 1, 128>}, {transform_indices = @transform_4, window_bounds = array<i64: 1, 1, 128>}]} {
    %c0 = arith.constant 0 : index
    %c0_0 = arith.constant 0 : index
    %0 = vector.load %arg2[%c0, %c0_0] : memref<128x800xbf16, #tpu.memory_space<vmem>>, vector<128x800xbf16>
    %c0_1 = arith.constant 0 : index
    %c0_2 = arith.constant 0 : index
    %1 = vector.load %arg3[%c0_1, %c0_2] : memref<800x128xbf16, #tpu.memory_space<vmem>>, vector<800x128xbf16>
    %cst = arith.constant dense<0.000000e+00> : vector<128x128xf32>
    %2 = tpu.matmul %0, %1, %cst {dimension_numbers = #tpu.dot_dimension_numbers<[1], [0], [0], [1], [0, 0, 1, 1], [], []>} : vector<128x800xbf16>, vector<800x128xbf16>, vector<128x128xf32> -> vector<128x128xf32>
    %3 = arith.truncf %2 : vector<128x128xf32> to vector<128x128xbf16>
    %c0_3 = arith.constant 0 : index
    %c0_4 = arith.constant 0 : index
    %4 = vector.load %arg4[%c0_3, %c0_4] : memref<128x128xbf16, #tpu.memory_space<vmem>>, vector<128x128xbf16>
    tpu.vector_store %arg4[%c0_3, %c0_4], %3 {strides = array<i32>} : memref<128x128xbf16, #tpu.memory_space<vmem>>, vector<128x128xbf16>,
    %cst_5 = arith.constant dense<0.000000e+00> : vector<128xf32>
    %5 = vector.multi_reduction <add>, %2, %cst_5 [0] : vector<128x128xf32> to vector<128xf32>
    %6 = vector.shape_cast %5 : vector<128xf32> to vector<1x128xf32>
    %7 = vector.shape_cast %6 : vector<1x128xf32> to vector<1x1x128xf32>
    %c0_6 = arith.constant 0 : index
    %c0_7 = arith.constant 0 : index
    %c0_8 = arith.constant 0 : index
    %8 = vector.load %arg5[%c0_6, %c0_7, %c0_8] : memref<1x1x128xf32, #tpu.memory_space<vmem>>, vector<1x1x128xf32>
    tpu.vector_store %arg5[%c0_6, %c0_7, %c0_8], %7 {strides = array<i32>} : memref<1x1x128xf32, #tpu.memory_space<vmem>>, vector<1x1x128xf32>,
    %9 = arith.mulf %2, %2 : vector<128x128xf32>
    %cst_9 = arith.constant dense<0.000000e+00> : vector<128xf32>
    %10 = vector.multi_reduction <add>, %9, %cst_9 [0] : vector<128x128xf32> to vector<128xf32>
    %11 = vector.shape_cast %10 : vector<128xf32> to vector<1x128xf32>
    %12 = vector.shape_cast %11 : vector<1x128xf32> to vector<1x1x128xf32>
    %c0_10 = arith.constant 0 : index
    %c0_11 = arith.constant 0 : index
    %c0_12 = arith.constant 0 : index
    %13 = vector.load %arg6[%c0_10, %c0_11, %c0_12] : memref<1x1x128xf32, #tpu.memory_space<vmem>>, vector<1x1x128xf32>
    tpu.vector_store %arg6[%c0_10, %c0_11, %c0_12], %12 {strides = array<i32>} : memref<1x1x128xf32, #tpu.memory_space<vmem>>, vector<1x1x128xf32>,
    return
  }
  func.func @transform_0(%arg0: i32, %arg1: i32) -> (i32, i32) {
    %c0_i32 = arith.constant 0 : i32
    %c0_i32_0 = arith.constant 0 : i32
    return %arg0, %c0_i32 : i32, i32
  }
  func.func @transform_1(%arg0: i32, %arg1: i32) -> (i32, i32) {
    %c0_i32 = arith.constant 0 : i32
    %c0_i32_0 = arith.constant 0 : i32
    return %c0_i32, %arg1 : i32, i32
  }
  func.func @transform_2(%arg0: i32, %arg1: i32) -> (i32, i32) {
    %c0_i32 = arith.constant 0 : i32
    return %arg0, %arg1 : i32, i32
  }
  func.func @transform_3(%arg0: i32, %arg1: i32) -> (i32, i32, i32) {
    %c0_i32 = arith.constant 0 : i32
    %c0_i32_0 = arith.constant 0 : i32
    return %arg0, %c0_i32, %arg1 : i32, i32, i32
  }
  func.func @transform_4(%arg0: i32, %arg1: i32) -> (i32, i32, i32) {
    %c0_i32 = arith.constant 0 : i32
    %c0_i32_0 = arith.constant 0 : i32
    return %arg0, %c0_i32, %arg1 : i32, i32, i32
  }
}

module attributes {stable_mosaic.version = 11 : i64} {
  func.func @_conv_stats_kernel(%arg0: i32, %arg1: i32, %arg2: memref<32x1600xbf16, #tpu.memory_space<vmem>>, %arg3: memref<1600x128xbf16, #tpu.memory_space<vmem>>, %arg4: memref<32x128xbf16, #tpu.memory_space<vmem>>, %arg5: memref<1x1x128xf32, #tpu.memory_space<vmem>>, %arg6: memref<1x1x128xf32, #tpu.memory_space<vmem>>) attributes {dimension_semantics = [#tpu.dimension_semantics<parallel>, #tpu.dimension_semantics<parallel>], iteration_bounds = array<i64: 1, 1>, scalar_prefetch = 0 : i64, scratch_operands = 0 : i64, tpu.core_type = #tpu.core_type<tc>, window_params = [{transform_indices = @transform_0, window_bounds = array<i64: 32, 1600>}, {transform_indices = @transform_1, window_bounds = array<i64: 1600, 128>}, {transform_indices = @transform_2, window_bounds = array<i64: 32, 128>}, {transform_indices = @transform_3, window_bounds = array<i64: 1, 1, 128>}, {transform_indices = @transform_4, window_bounds = array<i64: 1, 1, 128>}]} {
    %c0 = arith.constant 0 : index
    %c0_0 = arith.constant 0 : index
    %0 = vector.load %arg2[%c0, %c0_0] : memref<32x1600xbf16, #tpu.memory_space<vmem>>, vector<32x1600xbf16>
    %c0_1 = arith.constant 0 : index
    %c0_2 = arith.constant 0 : index
    %1 = vector.load %arg3[%c0_1, %c0_2] : memref<1600x128xbf16, #tpu.memory_space<vmem>>, vector<1600x128xbf16>
    %cst = arith.constant dense<0.000000e+00> : vector<32x128xf32>
    %2 = tpu.matmul %0, %1, %cst {dimension_numbers = #tpu.dot_dimension_numbers<[1], [0], [0], [1], [0, 0, 1, 1], [], []>} : vector<32x1600xbf16>, vector<1600x128xbf16>, vector<32x128xf32> -> vector<32x128xf32>
    %3 = arith.truncf %2 : vector<32x128xf32> to vector<32x128xbf16>
    %c0_3 = arith.constant 0 : index
    %c0_4 = arith.constant 0 : index
    %4 = vector.load %arg4[%c0_3, %c0_4] : memref<32x128xbf16, #tpu.memory_space<vmem>>, vector<32x128xbf16>
    tpu.vector_store %arg4[%c0_3, %c0_4], %3 {strides = array<i32>} : memref<32x128xbf16, #tpu.memory_space<vmem>>, vector<32x128xbf16>,
    %cst_5 = arith.constant dense<0.000000e+00> : vector<128xf32>
    %5 = vector.multi_reduction <add>, %2, %cst_5 [0] : vector<32x128xf32> to vector<128xf32>
    %6 = vector.shape_cast %5 : vector<128xf32> to vector<1x128xf32>
    %7 = vector.shape_cast %6 : vector<1x128xf32> to vector<1x1x128xf32>
    %c0_6 = arith.constant 0 : index
    %c0_7 = arith.constant 0 : index
    %c0_8 = arith.constant 0 : index
    %8 = vector.load %arg5[%c0_6, %c0_7, %c0_8] : memref<1x1x128xf32, #tpu.memory_space<vmem>>, vector<1x1x128xf32>
    tpu.vector_store %arg5[%c0_6, %c0_7, %c0_8], %7 {strides = array<i32>} : memref<1x1x128xf32, #tpu.memory_space<vmem>>, vector<1x1x128xf32>,
    %9 = arith.mulf %2, %2 : vector<32x128xf32>
    %cst_9 = arith.constant dense<0.000000e+00> : vector<128xf32>
    %10 = vector.multi_reduction <add>, %9, %cst_9 [0] : vector<32x128xf32> to vector<128xf32>
    %11 = vector.shape_cast %10 : vector<128xf32> to vector<1x128xf32>
    %12 = vector.shape_cast %11 : vector<1x128xf32> to vector<1x1x128xf32>
    %c0_10 = arith.constant 0 : index
    %c0_11 = arith.constant 0 : index
    %c0_12 = arith.constant 0 : index
    %13 = vector.load %arg6[%c0_10, %c0_11, %c0_12] : memref<1x1x128xf32, #tpu.memory_space<vmem>>, vector<1x1x128xf32>
    tpu.vector_store %arg6[%c0_10, %c0_11, %c0_12], %12 {strides = array<i32>} : memref<1x1x128xf32, #tpu.memory_space<vmem>>, vector<1x1x128xf32>,
    return
  }
  func.func @transform_0(%arg0: i32, %arg1: i32) -> (i32, i32) {
    %c0_i32 = arith.constant 0 : i32
    %c0_i32_0 = arith.constant 0 : i32
    return %arg0, %c0_i32 : i32, i32
  }
  func.func @transform_1(%arg0: i32, %arg1: i32) -> (i32, i32) {
    %c0_i32 = arith.constant 0 : i32
    %c0_i32_0 = arith.constant 0 : i32
    return %c0_i32, %arg1 : i32, i32
  }
  func.func @transform_2(%arg0: i32, %arg1: i32) -> (i32, i32) {
    %c0_i32 = arith.constant 0 : i32
    return %arg0, %arg1 : i32, i32
  }
  func.func @transform_3(%arg0: i32, %arg1: i32) -> (i32, i32, i32) {
    %c0_i32 = arith.constant 0 : i32
    %c0_i32_0 = arith.constant 0 : i32
    return %arg0, %c0_i32, %arg1 : i32, i32, i32
  }
  func.func @transform_4(%arg0: i32, %arg1: i32) -> (i32, i32, i32) {
    %c0_i32 = arith.constant 0 : i32
    %c0_i32_0 = arith.constant 0 : i32
    return %arg0, %c0_i32, %arg1 : i32, i32, i32
  }
}

module attributes {stable_mosaic.version = 11 : i64} {
  func.func @_conv_bias_act_kernel(%arg0: i32, %arg1: i32, %arg2: memref<8x2048xbf16, #tpu.memory_space<vmem>>, %arg3: memref<2048x128xbf16, #tpu.memory_space<vmem>>, %arg4: memref<1x128xf32, #tpu.memory_space<vmem>>, %arg5: memref<8x128xf32, #tpu.memory_space<vmem>>) attributes {dimension_semantics = [#tpu.dimension_semantics<parallel>, #tpu.dimension_semantics<parallel>], iteration_bounds = array<i64: 1, 1>, scalar_prefetch = 0 : i64, scratch_operands = 0 : i64, tpu.core_type = #tpu.core_type<tc>, window_params = [{transform_indices = @transform_0, window_bounds = array<i64: 8, 2048>}, {transform_indices = @transform_1, window_bounds = array<i64: 2048, 128>}, {transform_indices = @transform_2, window_bounds = array<i64: 1, 128>}, {transform_indices = @transform_3, window_bounds = array<i64: 8, 128>}]} {
    %c0 = arith.constant 0 : index
    %c0_0 = arith.constant 0 : index
    %0 = vector.load %arg2[%c0, %c0_0] : memref<8x2048xbf16, #tpu.memory_space<vmem>>, vector<8x2048xbf16>
    %c0_1 = arith.constant 0 : index
    %c0_2 = arith.constant 0 : index
    %1 = vector.load %arg3[%c0_1, %c0_2] : memref<2048x128xbf16, #tpu.memory_space<vmem>>, vector<2048x128xbf16>
    %cst = arith.constant dense<0.000000e+00> : vector<8x128xf32>
    %2 = tpu.matmul %0, %1, %cst {dimension_numbers = #tpu.dot_dimension_numbers<[1], [0], [0], [1], [0, 0, 1, 1], [], []>} : vector<8x2048xbf16>, vector<2048x128xbf16>, vector<8x128xf32> -> vector<8x128xf32>
    %c0_3 = arith.constant 0 : index
    %c0_4 = arith.constant 0 : index
    %3 = vector.load %arg4[%c0_3, %c0_4] : memref<1x128xf32, #tpu.memory_space<vmem>>, vector<1x128xf32>
    %4 = vector.broadcast %3 : vector<1x128xf32> to vector<8x128xf32>
    %5 = arith.addf %2, %4 : vector<8x128xf32>
    %cst_5 = arith.constant 0.000000e+00 : f32
    %6 = vector.broadcast %cst_5 : f32 to vector<8x128xf32>
    %7 = arith.subf %6, %5 : vector<8x128xf32>
    %8 = math.exp %7 : vector<8x128xf32>
    %cst_6 = arith.constant 1.000000e+00 : f32
    %9 = vector.broadcast %cst_6 : f32 to vector<8x128xf32>
    %10 = arith.addf %9, %8 : vector<8x128xf32>
    %cst_7 = arith.constant 1.000000e+00 : f32
    %11 = vector.broadcast %cst_7 : f32 to vector<8x128xf32>
    %12 = arith.divf %11, %10 : vector<8x128xf32>
    %c0_8 = arith.constant 0 : index
    %c0_9 = arith.constant 0 : index
    %13 = vector.load %arg5[%c0_8, %c0_9] : memref<8x128xf32, #tpu.memory_space<vmem>>, vector<8x128xf32>
    tpu.vector_store %arg5[%c0_8, %c0_9], %12 {strides = array<i32>} : memref<8x128xf32, #tpu.memory_space<vmem>>, vector<8x128xf32>,
    return
  }
  func.func @transform_0(%arg0: i32, %arg1: i32) -> (i32, i32) {
    %c0_i32 = arith.constant 0 : i32
    %c0_i32_0 = arith.constant 0 : i32
    return %arg0, %c0_i32 : i32, i32
  }
  func.func @transform_1(%arg0: i32, %arg1: i32) -> (i32, i32) {
    %c0_i32 = arith.constant 0 : i32
    %c0_i32_0 = arith.constant 0 : i32
    return %c0_i32, %arg1 : i32, i32
  }
  func.func @transform_2(%arg0: i32, %arg1: i32) -> (i32, i32) {
    %c0_i32 = arith.constant 0 : i32
    %c0_i32_0 = arith.constant 0 : i32
    return %c0_i32, %arg1 : i32, i32
  }
  func.func @transform_3(%arg0: i32, %arg1: i32) -> (i32, i32) {
    %c0_i32 = arith.constant 0 : i32
    return %arg0, %arg1 : i32, i32
  }
}

</mosaic_0001>

<bundles_post_ra>
// kernel: discriminator_forward.5
= control target key start
LH: loop header
LB: loop body
LE: loop exit
PB: predicated region body
PF: predicated region fallthrough
CT: control target
= control target key end

     0   :  { %s2133_s12 = smov 0   ;;  %s2135_s13 = smov 0   ;;  %s2360_s0 = inlined_call_operand.vmem [shape: bf16[2048,75], index: 0, kind: input, shape index: {}]   ;;  %s2361_s1 = inlined_call_operand.vmem [shape: bf16[75,128], index: 1, kind: input, shape index: {}]   ;;  %s2362_s2 = inlined_call_operand.vmem [shape: f32[1,128], index: 2, kind: input, shape index: {}]   ;;  %s2363_s3 = inlined_call_operand.vmem [shape: bf16[2048,128], index: 3, kind: output, shape index: {}]  }
   0x1   :  { %s2137_s14 = smov 0  }
   0x2 LB: > { %s25_s15 = sadd.s32 1, %s2106_s13  ;;  %p1509_p0 = scmp.ge.s32.totalorder %s2110_s14, 1  ;;  %s2110_s14 = sphi %s2137_s14, %s13_s14   ;;  %s2106_s13 = sphi %s2135_s13, %s2365_s13   ;;  %s2102_s12 = sphi %s2133_s12, %s2364_s12  }
   0x3   : > { %p27_p1 = scmp.ge.s32.totalorder %s25_s15, 4  ;;  %p169_p2 = scmp.lt.s32.totalorder %s2110_s14, 5 }
   0x5   : > { %s2367_s15 = smov (%p27_p1, %s25_s15), 0  ;;  %p170_p3 = pnand %p1509_p0, %p169_p2 }
   0x6   : > { %s1510_s20 = sshll.u32 (!%p170_p3), %s2102_s12, 6 }
   0x7   : > { %173 = sbr.rel (%p170_p3) target bundleno = 307 (0x133), region = 32  ;;  %p204_p4 = scmp.lt.s32.totalorder (!%p170_p3), %s1510_s20, 255 }
   0xc   : > { %v2051_v0 = vld [vmem:[%s2361_s1 + $0x20] sm:$0x3f]   ;;  %vm593_vm0 = vcmask 1044480   ;;  %vm594_vm1 = vcmask 1045504   ;;  %v2112_v1 = vmov 65535   ;;  %v2052_v4 = vld [vmem:[%s2361_s1 + $0x18] sm:$0xff]  }
   0xd   : > { %v595_v2 = vsel %vm593_vm0, 4294967295, %v2112_v1  ;;  %v2053_v6 = vld [vmem:[%s2361_s1 + $0x10] sm:$0xff]   ;;  %s2369_s20 = smov (!%p204_p4, %s1510_s20), 255  ;;  %v2054_v7 = vld [vmem:[%s2361_s1 + $0x8] sm:$0xff]   ;;  %vm496_vm2 = vcmask 613376   ;;  %v2055_v10 = vld [vmem:[%s2361_s1] sm:$0xff]  }
   0xe   : > { %v596_v3 = vsel %vm594_vm1, %v595_v2, 0  ;;  %s1511_s23 = sshll.u32 %s2369_s20, 2  ;;  %v2243_v41 = vld [vmem:[%s2362_s2] ss:$0 sm:$0xff] }
   0xf   : > { %v598_v5 = vand.u32 %v2051_v0, %v596_v3  ;;  %s2171_s28 = scalar_lea.vmem %s2360_s0, %s1511_s23  ;;  %s2258_s8 = scalar_lea.vmem %s2363_s3, %s1511_s23 }
  0x10   : > { %v2056_v8 = vld [vmem:[%s2171_s28] sm:$0xff]   ;;  %v2058_v11 = vld [vmem:[%s2171_s28 + $0x8] sm:$0xff]   ;;  %v2060_v13 = vld [vmem:[%s2171_s28 + $0x10] sm:$0xff]  }
  0x11   : > { %1942 = vmatprep.subr.bf16.mxu0 %v598_v5  ;;  %2016 = vmatprep.subr.bf16.mxu1 %v598_v5  ;;  %v2057_v9 = vld [vmem:[%s2171_s28 + $0x80] sm:$0xff]   ;;  %v2059_v12 = vld [vmem:[%s2171_s28 + $0x88] sm:$0xff]   ;;  %v2061_v14 = vld [vmem:[%s2171_s28 + $0x90] sm:$0xff]  }
  0x12   : > { %1943 = vmatpush3.bf16.msra.mxu0 %v598_v5  ;;  %2021 = vmatpush3.bf16.msra.mxu1 %v598_v5  ;;  %v2062_v15 = vld [vmem:[%s2171_s28 + $0x18] sm:$0xff]   ;;  %v2064_v17 = vld [vmem:[%s2171_s28 + $0x20] sm:$0xff]   ;;  %v2066_v19 = vld [vmem:[%s2171_s28 + $0x28] sm:$0xff]  }
  0x13   : > { %1944 = vmatprep.subr.bf16.mxu0 %v2052_v4  ;;  %2017 = vmatprep.subr.bf16.mxu1 %v2052_v4  ;;  %v2063_v16 = vld [vmem:[%s2171_s28 + $0x98] sm:$0xff]   ;;  %v2065_v18 = vld [vmem:[%s2171_s28 + $0xa0] sm:$0xff]   ;;  %v2067_v20 = vld [vmem:[%s2171_s28 + $0xa8] sm:$0xff]  }
  0x14   : > { %1952 = vmatprep.mubr.msk.bf16.mxu0 %vm496_vm2, %v2056_v8  ;;  %1984 = vmatprep.mubr.msk.bf16.mxu1 %vm496_vm2, %v2057_v9  ;;  %v2068_v21 = vld [vmem:[%s2171_s28 + $0x30] sm:$0xff]   ;;  %v2070_v23 = vld [vmem:[%s2171_s28 + $0x38] sm:$0xff]   ;;  %v2072_v25 = vld [vmem:[%s2171_s28 + $0x40] sm:$0xff]  }
  0x15   : > { %v2069_v22 = vld [vmem:[%s2171_s28 + $0xb0] sm:$0xff]   ;;  %v2071_v24 = vld [vmem:[%s2171_s28 + $0xb8] sm:$0xff]   ;;  %v2073_v26 = vld [vmem:[%s2171_s28 + $0xc0] sm:$0xff]  }
  0x16   : > { %1945 = vmatpush3.bf16.msra.mxu0 %v2052_v4  ;;  %2022 = vmatpush3.bf16.msra.mxu1 %v2052_v4  ;;  %v2074_v27 = vld [vmem:[%s2171_s28 + $0x48] sm:$0xff]   ;;  %v2076_v29 = vld [vmem:[%s2171_s28 + $0x50] sm:$0xff]   ;;  %v2078_v31 = vld [vmem:[%s2171_s28 + $0x58] sm:$0xff]  }
  0x17   : > { %1946 = vmatprep.subr.bf16.mxu0 %v2053_v6  ;;  %2018 = vmatprep.subr.bf16.mxu1 %v2053_v6  ;;  %v2075_v28 = vld [vmem:[%s2171_s28 + $0xc8] sm:$0xff]   ;;  %v2077_v30 = vld [vmem:[%s2171_s28 + $0xd0] sm:$0xff]   ;;  %v2079_v32 = vld [vmem:[%s2171_s28 + $0xd8] sm:$0xff]  }
  0x18   : > { %v2080_v33 = vld [vmem:[%s2171_s28 + $0x60] sm:$0xff]   ;;  %v2082_v35 = vld [vmem:[%s2171_s28 + $0x68] sm:$0xff]   ;;  %v2084_v37 = vld [vmem:[%s2171_s28 + $0x70] sm:$0xff]  }
  0x19   : > { %v2081_v34 = vld [vmem:[%s2171_s28 + $0xe0] sm:$0xff]   ;;  %v2083_v36 = vld [vmem:[%s2171_s28 + $0xe8] sm:$0xff]   ;;  %v2085_v38 = vld [vmem:[%s2171_s28 + $0xf0] sm:$0xff]  }
  0x1a   : > { %1947 = vmatpush3.bf16.msra.mxu0 %v2053_v6  ;;  %2023 = vmatpush3.bf16.msra.mxu1 %v2053_v6  ;;  %v2086_v39 = vld [vmem:[%s2171_s28 + $0x78] sm:$0xff]  }
  0x1b   : > { %1948 = vmatprep.subr.bf16.mxu0 %v2054_v7  ;;  %2019 = vmatprep.subr.bf16.mxu1 %v2054_v7  ;;  %v2087_v40 = vld [vmem:[%s2171_s28 + $0xf8] sm:$0xff]  }
  0x1e   : > { %1949 = vmatpush3.bf16.msra.mxu0 %v2054_v7  ;;  %2024 = vmatpush3.bf16.msra.mxu1 %v2054_v7 }
  0x1f   : > { %1950 = vmatprep.subr.bf16.mxu0 %v2055_v10  ;;  %2020 = vmatprep.subr.bf16.mxu1 %v2055_v10 }
  0x22   : > { %1951 = vmatpush3.bf16.msra.mxu0 %v2055_v10  ;;  %2025 = vmatpush3.bf16.msra.mxu1 %v2055_v10 }
  0x25   : > { %1953 = vmatmul.mubr.msk.bf16.vlgmr.msra.gmra.mxu0 %vm496_vm2, %v2058_v11  ;;  %1985 = vmatmul.mubr.msk.bf16.vlgmr.msra.gmra.mxu1 %vm496_vm2, %v2059_v12 }
  0x26   : > { %1956 = vmatprep.mubr.msk.bf16.mxu0 %vm496_vm2, %v2060_v13  ;;  %1988 = vmatprep.mubr.msk.bf16.mxu1 %vm496_vm2, %v2061_v14 }
  0x2d   : > { %1957 = vmatmul.mubr.msk.bf16.gmra.mxu0 %vm496_vm2, %v2062_v15  ;;  %1989 = vmatmul.mubr.msk.bf16.gmra.mxu1 %vm496_vm2, %v2063_v16 }
  0x2e   : > { %1960 = vmatprep.mubr.msk.bf16.mxu0 %vm496_vm2, %v2064_v17  ;;  %1992 = vmatprep.mubr.msk.bf16.mxu1 %vm496_vm2, %v2065_v18 }
  0x35   : > { %1961 = vmatmul.mubr.msk.bf16.gmra.mxu0 %vm496_vm2, %v2066_v19  ;;  %1993 = vmatmul.mubr.msk.bf16.gmra.mxu1 %vm496_vm2, %v2067_v20 }
  0x36   : > { %1964 = vmatprep.mubr.msk.bf16.mxu0 %vm496_vm2, %v2068_v21  ;;  %1996 = vmatprep.mubr.msk.bf16.mxu1 %vm496_vm2, %v2069_v22 }
  0x3d   : > { %1965 = vmatmul.mubr.msk.bf16.gmra.mxu0 %vm496_vm2, %v2070_v23  ;;  %1997 = vmatmul.mubr.msk.bf16.gmra.mxu1 %vm496_vm2, %v2071_v24 }
  0x3e   : > { %1968 = vmatprep.mubr.msk.bf16.mxu0 %vm496_vm2, %v2072_v25  ;;  %2000 = vmatprep.mubr.msk.bf16.mxu1 %vm496_vm2, %v2073_v26 }
  0x45   : > { %1969 = vmatmul.mubr.msk.bf16.gmra.mxu0 %vm496_vm2, %v2074_v27  ;;  %2001 = vmatmul.mubr.msk.bf16.gmra.mxu1 %vm496_vm2, %v2075_v28 }
  0x46   : > { %1972 = vmatprep.mubr.msk.bf16.mxu0 %vm496_vm2, %v2076_v29  ;;  %2004 = vmatprep.mubr.msk.bf16.mxu1 %vm496_vm2, %v2077_v30 }
  0x4d   : > { %1973 = vmatmul.mubr.msk.bf16.gmra.mxu0 %vm496_vm2, %v2078_v31  ;;  %2005 = vmatmul.mubr.msk.bf16.gmra.mxu1 %vm496_vm2, %v2079_v32 }
  0x4e   : > { %1976 = vmatprep.mubr.msk.bf16.mxu0 %vm496_vm2, %v2080_v33  ;;  %2008 = vmatprep.mubr.msk.bf16.mxu1 %vm496_vm2, %v2081_v34 }
  0x55   : > { %1977 = vmatmul.mubr.msk.bf16.gmra.mxu0 %vm496_vm2, %v2082_v35  ;;  %2009 = vmatmul.mubr.msk.bf16.gmra.mxu1 %vm496_vm2, %v2083_v36 }
  0x56   : > { %1980 = vmatprep.mubr.msk.bf16.mxu0 %vm496_vm2, %v2084_v37  ;;  %2012 = vmatprep.mubr.msk.bf16.mxu1 %vm496_vm2, %v2085_v38 }
  0x5d   : > { %1981 = vmatmul.mubr.msk.bf16.gmra.mxu0 %vm496_vm2, %v2086_v39  ;;  %2013 = vmatmul.mubr.msk.bf16.gmra.mxu1 %vm496_vm2, %v2087_v40 }
  0xe5   : > { %v1954_v42 = vpop.f32.mrf.mxu0  ;;  %v1986_v43 = vpop.f32.mrf.mxu1 }
  0xe6   : > { %v643_v44 = vadd.f32 %v1954_v42, %v2243_v41  ;;  %v771_v45 = vadd.f32 %v1986_v43, %v2243_v41 }
  0xe7   : > { %v634_v46 = vpop.f32.mrf.mxu0  ;;  %v762_v47 = vpop.f32.mrf.mxu1 }
  0xe8   : > { %vm891_vm3 = vcmp.gt.f32.partialorder %v643_v44, 0.0  ;;  %v955_v48 = vmul.f32 0.2, %v643_v44  ;;  %vm923_vm4 = vcmp.gt.f32.partialorder %v771_v45, 0.0  ;;  %v987_v49 = vmul.f32 0.2, %v771_v45 }
  0xe9   : > { %v635_v50 = vadd.f32 %v2243_v41, %v634_v46  ;;  %v763_v51 = vadd.f32 %v2243_v41, %v762_v47  ;;  %v1955_v52 = vpop.f32.mrf.mxu0  ;;  %v1987_v53 = vpop.f32.mrf.mxu1 }
  0xea   : > { %v1019_v54 = vsel %vm891_vm3, %v643_v44, %v955_v48  ;;  %v646_v55 = vadd.f32 %v1955_v52, %v2243_v41  ;;  %v774_v56 = vadd.f32 %v1987_v53, %v2243_v41  ;;  %v1051_v57 = vsel %vm923_vm4, %v771_v45, %v987_v49 }
  0xeb   : > { %vm889_vm5 = vcmp.gt.f32.partialorder %v635_v50, 0.0  ;;  %v953_v58 = vmul.f32 0.2, %v635_v50  ;;  %vm921_vm6 = vcmp.gt.f32.partialorder %v763_v51, 0.0  ;;  %v637_v59 = vpop.f32.mrf.mxu0  ;;  %v765_v60 = vpop.f32.mrf.mxu1  ;;  %v985_v0 = vmul.f32 0.2, %v763_v51 }
  0xec   : > { %vm892_vm7 = vcmp.gt.f32.partialorder %v646_v55, 0.0  ;;  %v956_v61 = vmul.f32 0.2, %v646_v55  ;;  %vm924_vm8 = vcmp.gt.f32.partialorder %v774_v56, 0.0  ;;  %v988_v62 = vmul.f32 0.2, %v774_v56 }
  0xed   : > { %v1017_v63 = vsel %vm889_vm5, %v635_v50, %v953_v58  ;;  %v638_v1 = vadd.f32 %v2243_v41, %v637_v59  ;;  %v766_v2 = vadd.f32 %v2243_v41, %v765_v60  ;;  %v1958_v3 = vpop.f32.mrf.mxu0  ;;  %v1990_v4 = vpop.f32.mrf.mxu1  ;;  %v1049_v16 = vsel %vm921_vm6, %v763_v51, %v985_v0 }
  0xee   : > { %v1020_v5 = vsel %vm892_vm7, %v646_v55, %v956_v61  ;;  %v1052_v6 = vsel %vm924_vm8, %v774_v56, %v988_v62  ;;  %v659_v7 = vadd.f32 %v1958_v3, %v2243_v41  ;;  %v787_v8 = vadd.f32 %v1990_v4, %v2243_v41 }
  0xef   : > { %v1722_v9 = vpack.c.bf16 %v1020_v5, %v1019_v54  ;;  %v1802_v10 = vpack.c.bf16 %v1052_v6, %v1051_v57  ;;  %vm890_vm9 = vcmp.gt.f32.partialorder %v638_v1, 0.0  ;;  %v954_v11 = vmul.f32 0.2, %v638_v1  ;;  %v650_v12 = vpop.f32.mrf.mxu0  ;;  %v778_v13 = vpop.f32.mrf.mxu1 }
  0xf0   : > { %vm922_vm10 = vcmp.gt.f32.partialorder %v766_v2, 0.0  ;;  %v986_v14 = vmul.f32 0.2, %v766_v2  ;;  %vm895_vm11 = vcmp.gt.f32.partialorder %v659_v7, 0.0  ;;  %v959_v15 = vmul.f32 0.2, %v659_v7 }
  0xf1   : > { %1874 = vst [vmem:[%s2258_s8 + $0x8] sm:$0xff] %v1722_v9   ;;  %1890 = vst [vmem:[%s2258_s8 + $0x88] sm:$0xff] %v1802_v10   ;;  %v1018_v17 = vsel %vm890_vm9, %v638_v1, %v954_v11  ;;  %v991_v18 = vmul.f32 0.2, %v787_v8  ;;  %v651_v19 = vadd.f32 %v2243_v41, %v650_v12  ;;  %v1959_v20 = vpop.f32.mrf.mxu0  ;;  %v1991_v21 = vpop.f32.mrf.mxu1  ;;  %vm927_vm12 = vcmp.gt.f32.partialorder %v787_v8, 0.0 }
  0xf2   : > { %v1717_v22 = vpack.c.bf16 %v1018_v17, %v1017_v63  ;;  %v1050_v23 = vsel %vm922_vm10, %v766_v2, %v986_v14  ;;  %v779_v24 = vadd.f32 %v2243_v41, %v778_v13  ;;  %v1023_v26 = vsel %vm895_vm11, %v659_v7, %v959_v15 }
  0xf3   : > { %v1797_v25 = vpack.c.bf16 %v1050_v23, %v1049_v16  ;;  %vm893_vm13 = vcmp.gt.f32.partialorder %v651_v19, 0.0  ;;  %v957_v27 = vmul.f32 0.2, %v651_v19  ;;  %v653_v28 = vpop.f32.mrf.mxu0  ;;  %v781_v29 = vpop.f32.mrf.mxu1  ;;  %v662_v31 = vadd.f32 %v1959_v20, %v2243_v41 }
  0xf4   : > { %1718 = vst [vmem:[%s2258_s8] sm:$0xff] %v1717_v22   ;;  %vm925_vm14 = vcmp.gt.f32.partialorder %v779_v24, 0.0  ;;  %v989_v30 = vmul.f32 0.2, %v779_v24  ;;  %v790_v32 = vadd.f32 %v1991_v21, %v2243_v41  ;;  %v1055_v33 = vsel %vm927_vm12, %v787_v8, %v991_v18 }
  0xf5   : > { %1889 = vst [vmem:[%s2258_s8 + $0x80] sm:$0xff] %v1797_v25   ;;  %v1021_v34 = vsel %vm893_vm13, %v651_v19, %v957_v27  ;;  %v654_v35 = vadd.f32 %v2243_v41, %v653_v28  ;;  %v782_v36 = vadd.f32 %v2243_v41, %v781_v29  ;;  %v1962_v37 = vpop.f32.mrf.mxu0  ;;  %v1994_v38 = vpop.f32.mrf.mxu1  ;;  %vm896_vm15 = vcmp.gt.f32.partialorder %v662_v31, 0.0 }
  0xf6   : > { %v1053_v39 = vsel %vm925_vm14, %v779_v24, %v989_v30  ;;  %v960_v40 = vmul.f32 0.2, %v662_v31  ;;  %vm928_vm0 = vcmp.gt.f32.partialorder %v790_v32, 0.0  ;;  %v992_v42 = vmul.f32 0.2, %v790_v32 }
  0xf7   : > { %vm894_vm1 = vcmp.gt.f32.partialorder %v654_v35, 0.0  ;;  %v958_v43 = vmul.f32 0.2, %v654_v35  ;;  %vm926_vm2 = vcmp.gt.f32.partialorder %v782_v36, 0.0  ;;  %v666_v44 = vpop.f32.mrf.mxu0  ;;  %v794_v45 = vpop.f32.mrf.mxu1  ;;  %v990_v47 = vmul.f32 0.2, %v782_v36 }
  0xf8   : > { %v1024_v46 = vsel %vm896_vm15, %v662_v31, %v960_v40  ;;  %v675_v48 = vadd.f32 %v1962_v37, %v2243_v41  ;;  %v803_v49 = vadd.f32 %v1994_v38, %v2243_v41  ;;  %v1056_v51 = vsel %vm928_vm0, %v790_v32, %v992_v42 }
  0xf9   : > { %v1732_v50 = vpack.c.bf16 %v1024_v46, %v1023_v26  ;;  %v1022_v52 = vsel %vm894_vm1, %v654_v35, %v958_v43  ;;  %v667_v53 = vadd.f32 %v2243_v41, %v666_v44  ;;  %v1963_v54 = vpop.f32.mrf.mxu0  ;;  %v1995_v55 = vpop.f32.mrf.mxu1  ;;  %v1812_v56 = vpack.c.bf16 %v1056_v51, %v1055_v33 }
  0xfa   : > { %v1727_v57 = vpack.c.bf16 %v1022_v52, %v1021_v34  ;;  %v1054_v58 = vsel %vm926_vm2, %v782_v36, %v990_v47  ;;  %vm899_vm3 = vcmp.gt.f32.partialorder %v675_v48, 0.0  ;;  %v963_v60 = vmul.f32 0.2, %v675_v48 }
  0xfb   : > { %1876 = vst [vmem:[%s2258_s8 + $0x18] sm:$0xff] %v1732_v50   ;;  %v1807_v59 = vpack.c.bf16 %v1054_v58, %v1053_v39  ;;  %vm931_vm4 = vcmp.gt.f32.partialorder %v803_v49, 0.0  ;;  %v995_v61 = vmul.f32 0.2, %v803_v49  ;;  %v669_v62 = vpop.f32.mrf.mxu0  ;;  %v797_v63 = vpop.f32.mrf.mxu1  ;;  %1892 = vst [vmem:[%s2258_s8 + $0x98] sm:$0xff] %v1812_v56   ;;  %vm897_vm5 = vcmp.gt.f32.partialorder %v667_v53, 0.0 }
  0xfc   : > { %1875 = vst [vmem:[%s2258_s8 + $0x10] sm:$0xff] %v1727_v57   ;;  %v961_v0 = vmul.f32 0.2, %v667_v53  ;;  %v795_v1 = vadd.f32 %v2243_v41, %v794_v45  ;;  %v678_v2 = vadd.f32 %v1963_v54, %v2243_v41  ;;  %v1027_v3 = vsel %vm899_vm3, %v675_v48, %v963_v60 }
  0xfd   : > { %1891 = vst [vmem:[%s2258_s8 + $0x90] sm:$0xff] %v1807_v59   ;;  %v1059_v4 = vsel %vm931_vm4, %v803_v49, %v995_v61  ;;  %v806_v5 = vadd.f32 %v1995_v55, %v2243_v41  ;;  %v670_v6 = vadd.f32 %v2243_v41, %v669_v62  ;;  %v1966_v7 = vpop.f32.mrf.mxu0  ;;  %v1998_v8 = vpop.f32.mrf.mxu1  ;;  %v798_v17 = vadd.f32 %v2243_v41, %v797_v63 }
  0xfe   : > { %v1025_v9 = vsel %vm897_vm5, %v667_v53, %v961_v0  ;;  %vm929_vm6 = vcmp.gt.f32.partialorder %v795_v1, 0.0  ;;  %v993_v10 = vmul.f32 0.2, %v795_v1  ;;  %vm900_vm7 = vcmp.gt.f32.partialorder %v678_v2, 0.0 }
  0xff   : > { %v964_v11 = vmul.f32 0.2, %v678_v2  ;;  %vm932_vm8 = vcmp.gt.f32.partialorder %v806_v5, 0.0  ;;  %v996_v12 = vmul.f32 0.2, %v806_v5  ;;  %vm898_vm9 = vcmp.gt.f32.partialorder %v670_v6, 0.0  ;;  %v682_v13 = vpop.f32.mrf.mxu0  ;;  %v810_v14 = vpop.f32.mrf.mxu1 }
 0x100   : > { %v1057_v15 = vsel %vm929_vm6, %v795_v1, %v993_v10  ;;  %v962_v16 = vmul.f32 0.2, %v670_v6  ;;  %v691_v18 = vadd.f32 %v1966_v7, %v2243_v41  ;;  %v819_v21 = vadd.f32 %v1998_v8, %v2243_v41 }
 0x101   : > { %v1028_v19 = vsel %vm900_vm7, %v678_v2, %v964_v11  ;;  %v1060_v20 = vsel %vm932_vm8, %v806_v5, %v996_v12  ;;  %v683_v22 = vadd.f32 %v2243_v41, %v682_v13  ;;  %v1967_v23 = vpop.f32.mrf.mxu0  ;;  %v1999_v24 = vpop.f32.mrf.mxu1  ;;  %vm930_vm10 = vcmp.gt.f32.partialorder %v798_v17, 0.0 }
 0x102   : > { %v1742_v25 = vpack.c.bf16 %v1028_v19, %v1027_v3  ;;  %v1822_v26 = vpack.c.bf16 %v1060_v20, %v1059_v4  ;;  %v1026_v27 = vsel %vm898_vm9, %v670_v6, %v962_v16  ;;  %v994_v29 = vmul.f32 0.2, %v798_v17 }
 0x103   : > { %v1737_v28 = vpack.c.bf16 %v1026_v27, %v1025_v9  ;;  %vm903_vm11 = vcmp.gt.f32.partialorder %v691_v18, 0.0  ;;  %v967_v30 = vmul.f32 0.2, %v691_v18  ;;  %v685_v31 = vpop.f32.mrf.mxu0  ;;  %v813_v32 = vpop.f32.mrf.mxu1  ;;  %vm935_vm12 = vcmp.gt.f32.partialorder %v819_v21, 0.0 }
 0x104   : > { %1878 = vst [vmem:[%s2258_s8 + $0x28] sm:$0xff] %v1742_v25   ;;  %1894 = vst [vmem:[%s2258_s8 + $0xa8] sm:$0xff] %v1822_v26   ;;  %v999_v33 = vmul.f32 0.2, %v819_v21  ;;  %vm901_vm13 = vcmp.gt.f32.partialorder %v683_v22, 0.0  ;;  %v1058_v35 = vsel %vm930_vm10, %v798_v17, %v994_v29  ;;  %v811_v37 = vadd.f32 %v2243_v41, %v810_v14 }
 0x105   : > { %v965_v34 = vmul.f32 0.2, %v683_v22  ;;  %1877 = vst [vmem:[%s2258_s8 + $0x20] sm:$0xff] %v1737_v28   ;;  %v1031_v36 = vsel %vm903_vm11, %v691_v18, %v967_v30  ;;  %v694_v38 = vadd.f32 %v1967_v23, %v2243_v41  ;;  %v1970_v39 = vpop.f32.mrf.mxu0  ;;  %v2002_v40 = vpop.f32.mrf.mxu1  ;;  %v1817_v42 = vpack.c.bf16 %v1058_v35, %v1057_v15 }
 0x106   : > { %v1063_v43 = vsel %vm935_vm12, %v819_v21, %v999_v33  ;;  %v822_v45 = vadd.f32 %v1999_v24, %v2243_v41  ;;  %vm933_vm14 = vcmp.gt.f32.partialorder %v811_v37, 0.0  ;;  %v997_v46 = vmul.f32 0.2, %v811_v37 }
 0x107   : > { %v1029_v44 = vsel %vm901_vm13, %v683_v22, %v965_v34  ;;  %vm904_vm15 = vcmp.gt.f32.partialorder %v694_v38, 0.0  ;;  %v968_v47 = vmul.f32 0.2, %v694_v38  ;;  %v698_v48 = vpop.f32.mrf.mxu0  ;;  %v826_v49 = vpop.f32.mrf.mxu1  ;;  %1893 = vst [vmem:[%s2258_s8 + $0xa0] sm:$0xff] %v1817_v42   ;;  %v686_v51 = vadd.f32 %v2243_v41, %v685_v31 }
 0x108   : > { %vm936_vm0 = vcmp.gt.f32.partialorder %v822_v45, 0.0  ;;  %v1000_v50 = vmul.f32 0.2, %v822_v45  ;;  %v814_v52 = vadd.f32 %v2243_v41, %v813_v32  ;;  %v1061_v53 = vsel %vm933_vm14, %v811_v37, %v997_v46 }
 0x109   : > { %v1032_v54 = vsel %vm904_vm15, %v694_v38, %v968_v47  ;;  %v707_v55 = vadd.f32 %v1970_v39, %v2243_v41  ;;  %v835_v56 = vadd.f32 %v2002_v40, %v2243_v41  ;;  %v1971_v57 = vpop.f32.mrf.mxu0  ;;  %v2003_v58 = vpop.f32.mrf.mxu1  ;;  %vm902_vm1 = vcmp.gt.f32.partialorder %v686_v51, 0.0 }
 0x10a   : > { %v1752_v59 = vpack.c.bf16 %v1032_v54, %v1031_v36  ;;  %v1064_v60 = vsel %vm936_vm0, %v822_v45, %v1000_v50  ;;  %v966_v61 = vmul.f32 0.2, %v686_v51  ;;  %vm934_vm2 = vcmp.gt.f32.partialorder %v814_v52, 0.0 }
 0x10b   : > { %v1832_v62 = vpack.c.bf16 %v1064_v60, %v1063_v43  ;;  %v998_v63 = vmul.f32 0.2, %v814_v52  ;;  %vm907_vm3 = vcmp.gt.f32.partialorder %v707_v55, 0.0  ;;  %v701_v0 = vpop.f32.mrf.mxu0  ;;  %v829_v1 = vpop.f32.mrf.mxu1  ;;  %v971_v3 = vmul.f32 0.2, %v707_v55 }
 0x10c   : > { %1880 = vst [vmem:[%s2258_s8 + $0x38] sm:$0xff] %v1752_v59   ;;  %v1030_v2 = vsel %vm902_vm1, %v686_v51, %v966_v61  ;;  %vm939_vm4 = vcmp.gt.f32.partialorder %v835_v56, 0.0  ;;  %v1003_v4 = vmul.f32 0.2, %v835_v56  ;;  %v699_v7 = vadd.f32 %v2243_v41, %v698_v48 }
 0x10d   : > { %1896 = vst [vmem:[%s2258_s8 + $0xb8] sm:$0xff] %v1832_v62   ;;  %v1747_v5 = vpack.c.bf16 %v1030_v2, %v1029_v44  ;;  %v1062_v6 = vsel %vm934_vm2, %v814_v52, %v998_v63  ;;  %v827_v8 = vadd.f32 %v2243_v41, %v826_v49  ;;  %v1974_v9 = vpop.f32.mrf.mxu0  ;;  %v2006_v10 = vpop.f32.mrf.mxu1  ;;  %v1035_v12 = vsel %vm907_vm3, %v707_v55, %v971_v3 }
 0x10e   : > { %v1827_v11 = vpack.c.bf16 %v1062_v6, %v1061_v53  ;;  %v1067_v13 = vsel %vm939_vm4, %v835_v56, %v1003_v4  ;;  %v710_v14 = vadd.f32 %v1971_v57, %v2243_v41  ;;  %vm905_vm5 = vcmp.gt.f32.partialorder %v699_v7, 0.0 }
 0x10f   : > { %1879 = vst [vmem:[%s2258_s8 + $0x30] sm:$0xff] %v1747_v5   ;;  %v969_v15 = vmul.f32 0.2, %v699_v7  ;;  %vm937_vm6 = vcmp.gt.f32.partialorder %v827_v8, 0.0  ;;  %v1001_v16 = vmul.f32 0.2, %v827_v8  ;;  %v714_v17 = vpop.f32.mrf.mxu0  ;;  %v842_v18 = vpop.f32.mrf.mxu1  ;;  %v838_v20 = vadd.f32 %v2003_v58, %v2243_v41 }
 0x110   : > { %1895 = vst [vmem:[%s2258_s8 + $0xb0] sm:$0xff] %v1827_v11   ;;  %vm908_vm7 = vcmp.gt.f32.partialorder %v710_v14, 0.0  ;;  %v972_v19 = vmul.f32 0.2, %v710_v14  ;;  %v702_v21 = vadd.f32 %v2243_v41, %v701_v0  ;;  %v830_v24 = vadd.f32 %v2243_v41, %v829_v1 }
 0x111   : > { %v1033_v22 = vsel %vm905_vm5, %v699_v7, %v969_v15  ;;  %v1065_v23 = vsel %vm937_vm6, %v827_v8, %v1001_v16  ;;  %v723_v25 = vadd.f32 %v1974_v9, %v2243_v41  ;;  %v1975_v26 = vpop.f32.mrf.mxu0  ;;  %v2007_v27 = vpop.f32.mrf.mxu1  ;;  %vm940_vm8 = vcmp.gt.f32.partialorder %v838_v20, 0.0 }
 0x112   : > { %v1036_v28 = vsel %vm908_vm7, %v710_v14, %v972_v19  ;;  %v1004_v29 = vmul.f32 0.2, %v838_v20  ;;  %vm906_vm9 = vcmp.gt.f32.partialorder %v702_v21, 0.0  ;;  %v970_v31 = vmul.f32 0.2, %v702_v21 }
 0x113   : > { %v1762_v30 = vpack.c.bf16 %v1036_v28, %v1035_v12  ;;  %vm938_vm10 = vcmp.gt.f32.partialorder %v830_v24, 0.0  ;;  %v1002_v32 = vmul.f32 0.2, %v830_v24  ;;  %v717_v33 = vpop.f32.mrf.mxu0  ;;  %v845_v34 = vpop.f32.mrf.mxu1  ;;  %vm911_vm11 = vcmp.gt.f32.partialorder %v723_v25, 0.0 }
 0x114   : > { %v1068_v35 = vsel %vm940_vm8, %v838_v20, %v1004_v29  ;;  %v975_v36 = vmul.f32 0.2, %v723_v25  ;;  %v851_v37 = vadd.f32 %v2006_v10, %v2243_v41  ;;  %v1034_v39 = vsel %vm906_vm9, %v702_v21, %v970_v31 }
 0x115   : > { %1882 = vst [vmem:[%s2258_s8 + $0x48] sm:$0xff] %v1762_v30   ;;  %v1842_v38 = vpack.c.bf16 %v1068_v35, %v1067_v13  ;;  %v1066_v40 = vsel %vm938_vm10, %v830_v24, %v1002_v32  ;;  %v715_v42 = vadd.f32 %v2243_v41, %v714_v17  ;;  %v1978_v43 = vpop.f32.mrf.mxu0  ;;  %v2010_v44 = vpop.f32.mrf.mxu1  ;;  %v1757_v45 = vpack.c.bf16 %v1034_v39, %v1033_v22 }
 0x116   : > { %v1837_v46 = vpack.c.bf16 %v1066_v40, %v1065_v23  ;;  %v1039_v47 = vsel %vm911_vm11, %v723_v25, %v975_v36  ;;  %vm943_vm12 = vcmp.gt.f32.partialorder %v851_v37, 0.0  ;;  %v1007_v48 = vmul.f32 0.2, %v851_v37 }
 0x117   : > { %1898 = vst [vmem:[%s2258_s8 + $0xc8] sm:$0xff] %v1842_v38   ;;  %vm909_vm13 = vcmp.gt.f32.partialorder %v715_v42, 0.0  ;;  %v973_v49 = vmul.f32 0.2, %v715_v42  ;;  %v843_v50 = vadd.f32 %v2243_v41, %v842_v18  ;;  %v730_v51 = vpop.f32.mrf.mxu0  ;;  %v858_v52 = vpop.f32.mrf.mxu1  ;;  %1881 = vst [vmem:[%s2258_s8 + $0x40] sm:$0xff] %v1757_v45   ;;  %v726_v53 = vadd.f32 %v1975_v26, %v2243_v41 }
 0x118   : > { %1897 = vst [vmem:[%s2258_s8 + $0xc0] sm:$0xff] %v1837_v46   ;;  %v854_v54 = vadd.f32 %v2007_v27, %v2243_v41  ;;  %v718_v55 = vadd.f32 %v2243_v41, %v717_v33  ;;  %v846_v56 = vadd.f32 %v2243_v41, %v845_v34  ;;  %v1071_v57 = vsel %vm943_vm12, %v851_v37, %v1007_v48 }
 0x119   : > { %v1037_v58 = vsel %vm909_vm13, %v715_v42, %v973_v49  ;;  %vm941_vm14 = vcmp.gt.f32.partialorder %v843_v50, 0.0  ;;  %v1005_v59 = vmul.f32 0.2, %v843_v50  ;;  %v1979_v60 = vpop.f32.mrf.mxu0  ;;  %v2011_v61 = vpop.f32.mrf.mxu1  ;;  %vm912_vm15 = vcmp.gt.f32.partialorder %v726_v53, 0.0 }
 0x11a   : > { %v976_v62 = vmul.f32 0.2, %v726_v53  ;;  %vm944_vm0 = vcmp.gt.f32.partialorder %v854_v54, 0.0  ;;  %v1008_v63 = vmul.f32 0.2, %v854_v54  ;;  %vm910_vm1 = vcmp.gt.f32.partialorder %v718_v55, 0.0 }
 0x11b   : > { %v1069_v0 = vsel %vm941_vm14, %v843_v50, %v1005_v59  ;;  %v974_v1 = vmul.f32 0.2, %v718_v55  ;;  %vm942_vm2 = vcmp.gt.f32.partialorder %v846_v56, 0.0  ;;  %v733_v2 = vpop.f32.mrf.mxu0  ;;  %v861_v3 = vpop.f32.mrf.mxu1  ;;  %v1006_v6 = vmul.f32 0.2, %v846_v56 }
 0x11c   : > { %v1040_v4 = vsel %vm912_vm15, %v726_v53, %v976_v62  ;;  %v1072_v5 = vsel %vm944_vm0, %v854_v54, %v1008_v63  ;;  %v739_v7 = vadd.f32 %v1978_v43, %v2243_v41  ;;  %v867_v11 = vadd.f32 %v2010_v44, %v2243_v41 }
 0x11d   : > { %v1772_v8 = vpack.c.bf16 %v1040_v4, %v1039_v47  ;;  %v1852_v9 = vpack.c.bf16 %v1072_v5, %v1071_v57  ;;  %v1038_v10 = vsel %vm910_vm1, %v718_v55, %v974_v1  ;;  %v1982_v12 = vpop.f32.mrf.mxu0  ;;  %v2014_v13 = vpop.f32.mrf.mxu1  ;;  %v1070_v15 = vsel %vm942_vm2, %v846_v56, %v1006_v6 }
 0x11e   : > { %v1767_v14 = vpack.c.bf16 %v1038_v10, %v1037_v58  ;;  %vm915_vm3 = vcmp.gt.f32.partialorder %v739_v7, 0.0  ;;  %v979_v16 = vmul.f32 0.2, %v739_v7  ;;  %v1847_v17 = vpack.c.bf16 %v1070_v15, %v1069_v0 }
 0x11f   : > { %1884 = vst [vmem:[%s2258_s8 + $0x58] sm:$0xff] %v1772_v8   ;;  %1900 = vst [vmem:[%s2258_s8 + $0xd8] sm:$0xff] %v1852_v9   ;;  %vm947_vm4 = vcmp.gt.f32.partialorder %v867_v11, 0.0  ;;  %v1011_v18 = vmul.f32 0.2, %v867_v11  ;;  %v731_v19 = vadd.f32 %v2243_v41, %v730_v51  ;;  %v859_v20 = vadd.f32 %v2243_v41, %v858_v52  ;;  %v746_v26 = vpop.f32.mrf.mxu0  ;;  %v874_v27 = vpop.f32.mrf.mxu1 }
 0x120   : > { %1883 = vst [vmem:[%s2258_s8 + $0x50] sm:$0xff] %v1767_v14   ;;  %v742_v21 = vadd.f32 %v1979_v60, %v2243_v41  ;;  %v870_v22 = vadd.f32 %v2011_v61, %v2243_v41  ;;  %1899 = vst [vmem:[%s2258_s8 + $0xd0] sm:$0xff] %v1847_v17   ;;  %v1043_v23 = vsel %vm915_vm3, %v739_v7, %v979_v16 }
 0x121   : > { %vm913_vm5 = vcmp.gt.f32.partialorder %v731_v19, 0.0  ;;  %v977_v24 = vmul.f32 0.2, %v731_v19  ;;  %v734_v25 = vadd.f32 %v2243_v41, %v733_v2  ;;  %v1075_v28 = vsel %vm947_vm4, %v867_v11, %v1011_v18  ;;  %v1983_v40 = vpop.f32.mrf.mxu0  ;;  %v2015_v42 = vpop.f32.mrf.mxu1 }
 0x122   : > { %vm945_vm6 = vcmp.gt.f32.partialorder %v859_v20, 0.0  ;;  %vm916_vm7 = vcmp.gt.f32.partialorder %v742_v21, 0.0  ;;  %v980_v29 = vmul.f32 0.2, %v742_v21  ;;  %v1009_v30 = vmul.f32 0.2, %v859_v20 }
 0x123   : > { %vm948_vm8 = vcmp.gt.f32.partialorder %v870_v22, 0.0  ;;  %v1012_v31 = vmul.f32 0.2, %v870_v22  ;;  %vm914_vm9 = vcmp.gt.f32.partialorder %v734_v25, 0.0  ;;  %v1041_v32 = vsel %vm913_vm5, %v731_v19, %v977_v24  ;;  %v749_v56 = vpop.f32.mrf.mxu0  ;;  %v877_v57 = vpop.f32.mrf.mxu1 }
 0x124   : > { %v1044_v33 = vsel %vm916_vm7, %v742_v21, %v980_v29  ;;  %v978_v34 = vmul.f32 0.2, %v734_v25  ;;  %v862_v35 = vadd.f32 %v2243_v41, %v861_v3  ;;  %v755_v38 = vadd.f32 %v1982_v12, %v2243_v41 }
 0x125   : > { %v1782_v36 = vpack.c.bf16 %v1044_v33, %v1043_v23  ;;  %v1076_v37 = vsel %vm948_vm8, %v870_v22, %v1012_v31  ;;  %v883_v39 = vadd.f32 %v2014_v13, %v2243_v41  ;;  %v1073_v46 = vsel %vm945_vm6, %v859_v20, %v1009_v30 }
 0x126   : > { %v1862_v43 = vpack.c.bf16 %v1076_v37, %v1075_v28  ;;  %v1042_v44 = vsel %vm914_vm9, %v734_v25, %v978_v34  ;;  %vm946_vm10 = vcmp.gt.f32.partialorder %v862_v35, 0.0  ;;  %v1010_v45 = vmul.f32 0.2, %v862_v35 }
 0x127   : > { %1886 = vst [vmem:[%s2258_s8 + $0x68] sm:$0xff] %v1782_v36   ;;  %v1777_v47 = vpack.c.bf16 %v1042_v44, %v1041_v32  ;;  %vm919_vm11 = vcmp.gt.f32.partialorder %v755_v38, 0.0  ;;  %v983_v48 = vmul.f32 0.2, %v755_v38  ;;  %vm951_vm12 = vcmp.gt.f32.partialorder %v883_v39, 0.0 }
 0x128   : > { %1902 = vst [vmem:[%s2258_s8 + $0xe8] sm:$0xff] %v1862_v43   ;;  %v1074_v49 = vsel %vm946_vm10, %v862_v35, %v1010_v45  ;;  %v1015_v50 = vmul.f32 0.2, %v883_v39  ;;  %v747_v51 = vadd.f32 %v2243_v41, %v746_v26  ;;  %v875_v53 = vadd.f32 %v2243_v41, %v874_v27 }
 0x129   : > { %1885 = vst [vmem:[%s2258_s8 + $0x60] sm:$0xff] %v1777_v47   ;;  %v1857_v52 = vpack.c.bf16 %v1074_v49, %v1073_v46  ;;  %v758_v54 = vadd.f32 %v1983_v40, %v2243_v41  ;;  %v886_v55 = vadd.f32 %v2015_v42, %v2243_v41  ;;  %v1047_v58 = vsel %vm919_vm11, %v755_v38, %v983_v48 }
 0x12a   : > { %v1079_v59 = vsel %vm951_vm12, %v883_v39, %v1015_v50  ;;  %v981_v61 = vmul.f32 0.2, %v747_v51  ;;  %v750_v63 = vadd.f32 %v2243_v41, %v749_v56  ;;  %v878_v0 = vadd.f32 %v2243_v41, %v877_v57 }
 0x12b   : > { %1901 = vst [vmem:[%s2258_s8 + $0xe0] sm:$0xff] %v1857_v52   ;;  %vm920_vm13 = vcmp.gt.f32.partialorder %v758_v54, 0.0  ;;  %v984_v60 = vmul.f32 0.2, %v758_v54  ;;  %vm952_vm14 = vcmp.gt.f32.partialorder %v886_v55, 0.0  ;;  %vm917_vm15 = vcmp.gt.f32.partialorder %v747_v51, 0.0 }
 0x12c   : > { %v1016_v62 = vmul.f32 0.2, %v886_v55  ;;  %vm949_vm0 = vcmp.gt.f32.partialorder %v875_v53, 0.0  ;;  %v1013_v1 = vmul.f32 0.2, %v875_v53  ;;  %vm918_vm1 = vcmp.gt.f32.partialorder %v750_v63, 0.0 }
 0x12d   : > { %v1048_v2 = vsel %vm920_vm13, %v758_v54, %v984_v60  ;;  %v982_v5 = vmul.f32 0.2, %v750_v63  ;;  %vm950_vm2 = vcmp.gt.f32.partialorder %v878_v0, 0.0  ;;  %v1014_v7 = vmul.f32 0.2, %v878_v0 }
 0x12e   : > { %v1792_v3 = vpack.c.bf16 %v1048_v2, %v1047_v58  ;;  %v1080_v4 = vsel %vm952_vm14, %v886_v55, %v1016_v62  ;;  %v1045_v8 = vsel %vm917_vm15, %v747_v51, %v981_v61  ;;  %v1077_v10 = vsel %vm949_vm0, %v875_v53, %v1013_v1 }
 0x12f   : > { %v1872_v6 = vpack.c.bf16 %v1080_v4, %v1079_v59  ;;  %v1046_v9 = vsel %vm918_vm1, %v750_v63, %v982_v5  ;;  %v1078_v11 = vsel %vm950_vm2, %v878_v0, %v1014_v7 }
 0x130   : > { %1888 = vst [vmem:[%s2258_s8 + $0x78] sm:$0xff] %v1792_v3   ;;  %v1787_v41 = vpack.c.bf16 %v1046_v9, %v1045_v8  ;;  %v1867_v12 = vpack.c.bf16 %v1078_v11, %v1077_v10 }
 0x131   : > { %1904 = vst [vmem:[%s2258_s8 + $0xf8] sm:$0xff] %v1872_v6  }
 0x132   : > { %1887 = vst [vmem:[%s2258_s8 + $0x70] sm:$0xff] %v1787_v41   ;;  %1903 = vst [vmem:[%s2258_s8 + $0xf0] sm:$0xff] %v1867_v12  }
 0x133 PF: > { %s13_s14 = sadd.s32 1, %s2110_s14   ;;  %s2364_s12 = smov %s2106_s13 }
 0x134   : > { %p10_p5 = scmp.ge.s32.totalorder %s13_s14, 6   ;;  %s2365_s13 = smov %s2367_s15 }
 0x136   :  { %12 = sbr.rel (!%p10_p5) target bundleno = 2 (0x2), region = 68 }

// kernel: discriminator_forward.6
= control target key start
LH: loop header
LB: loop body
LE: loop exit
PB: predicated region body
PF: predicated region fallthrough
CT: control target
= control target key end

     0   :  { %v2884_v0 = vmov 0   ;;  %vm951_vm0 = vcmask 130048   ;;  %s3720_s1 = inlined_call_operand.vmem [shape: bf16[400,128], index: 1, kind: input, shape index: {}]   ;;  %s3721_s0 = inlined_call_operand.vmem [shape: bf16[512,400], index: 0, kind: input, shape index: {}]   ;;  %s3722_s2 = inlined_call_operand.vmem [shape: bf16[512,128], index: 2, kind: output, shape index: {0}]   ;;  %s3723_s3 = inlined_call_operand.vmem [shape: f32[1,1,128], index: 3, kind: output, shape index: {1}]   ;;  %s3724_s4 = inlined_call_operand.vmem [shape: f32[1,1,128], index: 4, kind: output, shape index: {2}]  }
   0x1   :  { %1048 = vmatprep.subr.bf16.mxu0 %v2884_v0  ;;  %v2667_v1 = vld [vmem:[%s3720_s1 + $0x38] sm:$0xff]   ;;  %1337 = vmatprep.subr.bf16.mxu1 %v2884_v0  ;;  %v2668_v2 = vld [vmem:[%s3720_s1 + $0x30] sm:$0xff]   ;;  %v2669_v3 = vld [vmem:[%s3720_s1 + $0x28] sm:$0xff]  }
   0x2   :  { %1049 = vmatpush1.bf16.msra.mxu0 %v2667_v1  ;;  %v2673_v4 = vld [vmem:[%s3720_s1 + $0xb8] sm:$0xff]   ;;  %v2675_v5 = vld [vmem:[%s3720_s1 + $0xb0] sm:$0xff]   ;;  %v2670_v6 = vld [vmem:[%s3720_s1 + $0x20] sm:$0xff]  }
   0x3   :  { %1050 = vmatprep.subr.bf16.mxu0 %v2884_v0  ;;  %1338 = vmatpush1.bf16.msra.mxu1 %v2673_v4  ;;  %v2677_v7 = vld [vmem:[%s3720_s1 + $0xa8] sm:$0xff]   ;;  %v2671_v8 = vld [vmem:[%s3720_s1 + $0x18] sm:$0xff]   ;;  %v2679_v9 = vld [vmem:[%s3720_s1 + $0xa0] sm:$0xff]  }
   0x4   :  { %1339 = vmatprep.subr.bf16.mxu1 %v2884_v0  ;;  %v2672_v10 = vld [vmem:[%s3720_s1 + $0x10] sm:$0xff]   ;;  %v2681_v11 = vld [vmem:[%s3720_s1 + $0x98] sm:$0xff]   ;;  %v2674_v12 = vld [vmem:[%s3720_s1 + $0x8] sm:$0xff]  }
   0x5   :  { %v2683_v13 = vld [vmem:[%s3720_s1 + $0x90] sm:$0xff]   ;;  %v2693_v14 = vld [vmem:[%s3721_s0 + $0xc] ss:$16 sps:$4 sm:$0xff]   ;;  %v2676_v15 = vld [vmem:[%s3720_s1] sm:$0xff]  }
   0x6   :  { %1051 = vmatpush1.bf16.msra.mxu0 %v2668_v2  ;;  %2315 = vmatprep.mubr.msk.bf16.mxu1 %vm951_vm0, %v2693_v14  ;;  %v2697_v16 = vld [vmem:[%s3721_s0 + $0x4] ss:$16 sps:$4 sm:$0xff]   ;;  %v2685_v17 = vld [vmem:[%s3720_s1 + $0x88] sm:$0xff]   ;;  %v2678_v18 = vld [vmem:[%s3720_s1 + $0x78] sm:$0xff]  }
   0x7   :  { %1052 = vmatprep.subr.bf16.mxu0 %v2884_v0  ;;  %1340 = vmatpush1.bf16.msra.mxu1 %v2675_v5  ;;  %v2687_v19 = vld [vmem:[%s3720_s1 + $0x80] sm:$0xff]   ;;  %v2680_v20 = vld [vmem:[%s3720_s1 + $0x70] sm:$0xff]   ;;  %v2682_v22 = vld [vmem:[%s3720_s1 + $0x68] sm:$0xff]  }
   0x8   :  { %1341 = vmatprep.subr.bf16.mxu1 %v2884_v0  ;;  %1080 = vmatprep.mubr.bf16.mxu0 %v2697_v16  ;;  %v2689_v21 = vld [vmem:[%s3720_s1 + $0xc0] sm:$0xff]   ;;  %v2691_v23 = vld [vmem:[%s3721_s0 + $0x8] ss:$16 sps:$4 sm:$0xff]   ;;  %v2698_v24 = vld [vmem:[%s3721_s0 + $0x2c] ss:$16 sps:$4 sm:$0xff]  }
   0x9   :  { %v2684_v25 = vld [vmem:[%s3720_s1 + $0x60] sm:$0xff]   ;;  %v2686_v26 = vld [vmem:[%s3720_s1 + $0x58] sm:$0xff]   ;;  %v2688_v29 = vld [vmem:[%s3720_s1 + $0x50] sm:$0xff]  }
   0xa   :  { %1053 = vmatpush1.bf16.msra.mxu0 %v2669_v3  ;;  %v2700_v27 = vld [vmem:[%s3721_s0 + $0x28] ss:$16 sps:$4 sm:$0xff]   ;;  %v2704_v28 = vld [vmem:[%s3721_s0 + $0x4c] ss:$16 sps:$4 sm:$0xff]   ;;  %v2694_v33 = vld [vmem:[%s3720_s1 + $0x40] sm:$0xff]  }
   0xb   :  { %1054 = vmatprep.subr.bf16.mxu0 %v2884_v0  ;;  %1342 = vmatpush1.bf16.msra.mxu1 %v2677_v7  ;;  %v2690_v30 = vld [vmem:[%s3720_s1 + $0x48] sm:$0xff]   ;;  %v2695_v34 = vld [vmem:[%s3721_s0] ss:$16 sps:$4 sm:$0xff]   ;;  %v2701_v35 = vld [vmem:[%s3721_s0 + $0x24] ss:$16 sps:$4 sm:$0xff]  }
   0xc   :  { %1343 = vmatprep.subr.bf16.mxu1 %v2884_v0  ;;  %v2706_v31 = vld [vmem:[%s3721_s0 + $0x48] ss:$16 sps:$4 sm:$0xff]   ;;  %v2710_v32 = vld [vmem:[%s3721_s0 + $0x6c] ss:$16 sps:$4 sm:$0xff]   ;;  %v2703_v38 = vld [vmem:[%s3721_s0 + $0x20] ss:$16 sps:$4 sm:$0xff]  }
   0xd   :  { %v2712_v36 = vld [vmem:[%s3721_s0 + $0x68] ss:$16 sps:$4 sm:$0xff]   ;;  %v2716_v37 = vld [vmem:[%s3721_s0 + $0x8c] ss:$16 sps:$4 sm:$0xff]   ;;  %v2707_v39 = vld [vmem:[%s3721_s0 + $0x44] ss:$16 sps:$4 sm:$0xff]  }
   0xe   :  { %1055 = vmatpush1.bf16.msra.mxu0 %v2670_v6  ;;  %v2718_v40 = vld [vmem:[%s3721_s0 + $0x88] ss:$16 sps:$4 sm:$0xff]   ;;  %v2722_v41 = vld [vmem:[%s3721_s0 + $0xac] ss:$16 sps:$4 sm:$0xff]   ;;  %v2709_v42 = vld [vmem:[%s3721_s0 + $0x40] ss:$16 sps:$4 sm:$0xff]  }
   0xf   :  { %1056 = vmatprep.subr.bf16.mxu0 %v2884_v0  ;;  %1344 = vmatpush1.bf16.msra.mxu1 %v2679_v9  ;;  %v2713_v43 = vld [vmem:[%s3721_s0 + $0x64] ss:$16 sps:$4 sm:$0xff]   ;;  %v2724_v44 = vld [vmem:[%s3721_s0 + $0xa8] ss:$16 sps:$4 sm:$0xff]   ;;  %v2728_v45 = vld [vmem:[%s3721_s0 + $0xcc] ss:$16 sps:$4 sm:$0xff]  }
  0x10   :  { %1345 = vmatprep.subr.bf16.mxu1 %v2884_v0  ;;  %v2715_v46 = vld [vmem:[%s3721_s0 + $0x60] ss:$16 sps:$4 sm:$0xff]   ;;  %v2719_v47 = vld [vmem:[%s3721_s0 + $0x84] ss:$16 sps:$4 sm:$0xff]   ;;  %v2730_v48 = vld [vmem:[%s3721_s0 + $0xc8] ss:$16 sps:$4 sm:$0xff]  }
  0x11   :  { %v2734_v49 = vld [vmem:[%s3721_s0 + $0xec] ss:$16 sps:$4 sm:$0xff]   ;;  %v2721_v50 = vld [vmem:[%s3721_s0 + $0x80] ss:$16 sps:$4 sm:$0xff]   ;;  %v2725_v51 = vld [vmem:[%s3721_s0 + $0xa4] ss:$16 sps:$4 sm:$0xff]  }
  0x12   :  { %1057 = vmatpush1.bf16.msra.mxu0 %v2671_v8  ;;  %v2736_v52 = vld [vmem:[%s3721_s0 + $0xe8] ss:$16 sps:$4 sm:$0xff]   ;;  %v2740_v53 = vld [vmem:[%s3721_s0 + $0x10c] ss:$16 sps:$4 sm:$0xff]   ;;  %v2727_v54 = vld [vmem:[%s3721_s0 + $0xa0] ss:$16 sps:$4 sm:$0xff]  }
  0x13   :  { %1058 = vmatprep.subr.bf16.mxu0 %v2884_v0  ;;  %1346 = vmatpush1.bf16.msra.mxu1 %v2681_v11  ;;  %v2731_v55 = vld [vmem:[%s3721_s0 + $0xc4] ss:$16 sps:$4 sm:$0xff]   ;;  %v2742_v56 = vld [vmem:[%s3721_s0 + $0x108] ss:$16 sps:$4 sm:$0xff]   ;;  %v2746_v57 = vld [vmem:[%s3721_s0 + $0x12c] ss:$16 sps:$4 sm:$0xff]  }
  0x14   :  { %1347 = vmatprep.subr.bf16.mxu1 %v2884_v0  ;;  %v2733_v58 = vld [vmem:[%s3721_s0 + $0xc0] ss:$16 sps:$4 sm:$0xff]   ;;  %v2737_v59 = vld [vmem:[%s3721_s0 + $0xe4] ss:$16 sps:$4 sm:$0xff]   ;;  %v2748_v60 = vld [vmem:[%s3721_s0 + $0x128] ss:$16 sps:$4 sm:$0xff]  }
  0x15   :  { %v2752_v61 = vld [vmem:[%s3721_s0 + $0x14c] ss:$16 sps:$4 sm:$0xff]   ;;  %v2739_v62 = vld [vmem:[%s3721_s0 + $0xe0] ss:$16 sps:$4 sm:$0xff]   ;;  %v2743_v63 = vld [vmem:[%s3721_s0 + $0x104] ss:$16 sps:$4 sm:$0xff]  }
  0x16   :  { %1059 = vmatpush1.bf16.msra.mxu0 %v2672_v10  ;;  %v2758_v1 = vld [vmem:[%s3721_s0 + $0x16c] ss:$16 sps:$4 sm:$0xff]   ;;  %v2745_v2 = vld [vmem:[%s3721_s0 + $0x100] ss:$16 sps:$4 sm:$0xff]   ;;  %v2749_v3 = vld [vmem:[%s3721_s0 + $0x124] ss:$16 sps:$4 sm:$0xff]  }
  0x17   :  { %1060 = vmatprep.subr.bf16.mxu0 %v2884_v0  ;;  %1348 = vmatpush1.bf16.msra.mxu1 %v2683_v13  ;;  %v2760_v4 = vld [vmem:[%s3721_s0 + $0x168] ss:$16 sps:$4 sm:$0xff]   ;;  %v2764_v5 = vld [vmem:[%s3721_s0 + $0x18c] ss:$16 sps:$4 sm:$0xff]   ;;  %v2751_v6 = vld [vmem:[%s3721_s0 + $0x120] ss:$16 sps:$4 sm:$0xff]  }
  0x18   :  { %1349 = vmatprep.subr.bf16.mxu1 %v2884_v0  ;;  %v2755_v7 = vld [vmem:[%s3721_s0 + $0x144] ss:$16 sps:$4 sm:$0xff]   ;;  %v2766_v8 = vld [vmem:[%s3721_s0 + $0x188] ss:$16 sps:$4 sm:$0xff]   ;;  %v2770_v9 = vld [vmem:[%s3721_s0 + $0x1ac] ss:$16 sps:$4 sm:$0xff]  }
  0x19   :  { %v2757_v10 = vld [vmem:[%s3721_s0 + $0x140] ss:$16 sps:$4 sm:$0xff]   ;;  %v2761_v11 = vld [vmem:[%s3721_s0 + $0x164] ss:$16 sps:$4 sm:$0xff]   ;;  %v2776_v13 = vld [vmem:[%s3721_s0 + $0x1cc] ss:$16 sps:$4 sm:$0xff]  }
  0x1a   :  { %1061 = vmatpush1.bf16.msra.mxu0 %v2674_v12  ;;  %v2772_v12 = vld [vmem:[%s3721_s0 + $0x1a8] ss:$16 sps:$4 sm:$0xff]   ;;  %v2763_v14 = vld [vmem:[%s3721_s0 + $0x160] ss:$16 sps:$4 sm:$0xff]  }
  0x1b   :  { %1062 = vmatprep.subr.bf16.mxu0 %v2884_v0  ;;  %1350 = vmatpush1.bf16.msra.mxu1 %v2685_v17  ;;  %v2778_v16 = vld [vmem:[%s3721_s0 + $0x1c8] ss:$16 sps:$4 sm:$0xff]   ;;  %v2782_v17 = vld [vmem:[%s3721_s0 + $0x1ec] ss:$16 sps:$4 sm:$0xff]  }
  0x1c   :  { %1351 = vmatprep.subr.bf16.mxu1 %v2884_v0 }
  0x1e   :  { %1063 = vmatpush1.bf16.msra.mxu0 %v2676_v15  ;;  %v2767_v15 = vld [vmem:[%s3721_s0 + $0x184] ss:$16 sps:$4 sm:$0xff]  }
  0x1f   :  { %1064 = vmatprep.subr.bf16.mxu0 %v2884_v0  ;;  %1352 = vmatpush1.bf16.msra.mxu1 %v2687_v19  ;;  %v2773_v19 = vld [vmem:[%s3721_s0 + $0x1a4] ss:$16 sps:$4 sm:$0xff]  }
  0x20   :  { %1367 = vmatprep.subr.bf16.mxu1 %v2884_v0 }
  0x22   :  { %1065 = vmatpush2.bf16.msra.mxu0 %v2678_v18  ;;  %v2769_v18 = vld [vmem:[%s3721_s0 + $0x180] ss:$16 sps:$4 sm:$0xff]  }
  0x23   :  { %1066 = vmatprep.subr.bf16.mxu0 %v2884_v0  ;;  %1368 = vmatpush2.bf16.msra.mxu1 %v2689_v21  ;;  %v2788_v21 = vld [vmem:[%s3721_s0 + $0x20c] ss:$16 sps:$4 sm:$0xff]  }
  0x26   :  { %1067 = vmatpush2.bf16.msra.mxu0 %v2680_v20  ;;  %1370 = vmatmul.mubr.bf16.vlgmr.msra.gmra.mxu1 %v2691_v23  ;;  %v2784_v20 = vld [vmem:[%s3721_s0 + $0x1e8] ss:$16 sps:$4 sm:$0xff]   ;;  %v2779_v23 = vld [vmem:[%s3721_s0 + $0x1c4] ss:$16 sps:$4 sm:$0xff]  }
  0x27   :  { %1068 = vmatprep.subr.bf16.mxu0 %v2884_v0  ;;  %2316 = vmatprep.mubr.msk.bf16.mxu1 %vm951_vm0, %v2698_v24  ;;  %v2790_v24 = vld [vmem:[%s3721_s0 + $0x208] ss:$16 sps:$4 sm:$0xff]  }
  0x2a   :  { %1069 = vmatpush2.bf16.msra.mxu0 %v2682_v22  ;;  %v2775_v22 = vld [vmem:[%s3721_s0 + $0x1a0] ss:$16 sps:$4 sm:$0xff]  }
  0x2b   :  { %1070 = vmatprep.subr.bf16.mxu0 %v2884_v0 }
  0x2e   :  { %1071 = vmatpush2.bf16.msra.mxu0 %v2684_v25  ;;  %1378 = vmatmul.mubr.bf16.gmra.mxu1 %v2700_v27  ;;  %v2794_v25 = vld [vmem:[%s3721_s0 + $0x22c] ss:$16 sps:$4 sm:$0xff]   ;;  %v2785_v27 = vld [vmem:[%s3721_s0 + $0x1e4] ss:$16 sps:$4 sm:$0xff]  }
  0x2f   :  { %1072 = vmatprep.subr.bf16.mxu0 %v2884_v0  ;;  %2317 = vmatprep.mubr.msk.bf16.mxu1 %vm951_vm0, %v2704_v28  ;;  %v2796_v28 = vld [vmem:[%s3721_s0 + $0x228] ss:$16 sps:$4 sm:$0xff]  }
  0x32   :  { %1073 = vmatpush2.bf16.msra.mxu0 %v2686_v26  ;;  %v2781_v26 = vld [vmem:[%s3721_s0 + $0x1c0] ss:$16 sps:$4 sm:$0xff]  }
  0x33   :  { %1074 = vmatprep.subr.bf16.mxu0 %v2884_v0 }
  0x36   :  { %1075 = vmatpush2.bf16.msra.mxu0 %v2688_v29  ;;  %1386 = vmatmul.mubr.bf16.gmra.mxu1 %v2706_v31  ;;  %v2800_v29 = vld [vmem:[%s3721_s0 + $0x24c] ss:$16 sps:$4 sm:$0xff]   ;;  %v2791_v31 = vld [vmem:[%s3721_s0 + $0x204] ss:$16 sps:$4 sm:$0xff]  }
  0x37   :  { %1076 = vmatprep.subr.bf16.mxu0 %v2884_v0  ;;  %2318 = vmatprep.mubr.msk.bf16.mxu1 %vm951_vm0, %v2710_v32  ;;  %v2802_v32 = vld [vmem:[%s3721_s0 + $0x248] ss:$16 sps:$4 sm:$0xff]  }
  0x3a   :  { %1077 = vmatpush2.bf16.msra.mxu0 %v2690_v30  ;;  %v2787_v30 = vld [vmem:[%s3721_s0 + $0x1e0] ss:$16 sps:$4 sm:$0xff]  }
  0x3b   :  { %1078 = vmatprep.subr.bf16.mxu0 %v2884_v0  ;;  %v2754_v0 = vld [vmem:[%s3721_s0 + $0x148] ss:$16 sps:$4 sm:$0xff]  }
  0x3e   :  { %1079 = vmatpush2.bf16.msra.mxu0 %v2694_v33  ;;  %1394 = vmatmul.mubr.bf16.gmra.mxu1 %v2712_v36  ;;  %v2806_v33 = vld [vmem:[%s3721_s0 + $0x26c] ss:$16 sps:$4 sm:$0xff]   ;;  %v2808_v36 = vld [vmem:[%s3721_s0 + $0x268] ss:$16 sps:$4 sm:$0xff]  }
  0x3f   :  { %2319 = vmatprep.mubr.msk.bf16.mxu1 %vm951_vm0, %v2716_v37  ;;  %v2812_v37 = vld [vmem:[%s3721_s0 + $0x28c] ss:$16 sps:$4 sm:$0xff]  }
  0x41   :  { %1081 = vmatmul.mubr.bf16.vlgmr.msra.gmra.mxu0 %v2695_v34  ;;  %v2793_v34 = vld [vmem:[%s3721_s0 + $0x200] ss:$16 sps:$4 sm:$0xff]  }
  0x42   :  { %1088 = vmatprep.mubr.bf16.mxu0 %v2701_v35  ;;  %v2797_v35 = vld [vmem:[%s3721_s0 + $0x224] ss:$16 sps:$4 sm:$0xff]  }
  0x46   :  { %1402 = vmatmul.mubr.bf16.gmra.mxu1 %v2718_v40  ;;  %v2814_v40 = vld [vmem:[%s3721_s0 + $0x288] ss:$16 sps:$4 sm:$0xff]  }
  0x47   :  { %2320 = vmatprep.mubr.msk.bf16.mxu1 %vm951_vm0, %v2722_v41  ;;  %v2818_v41 = vld [vmem:[%s3721_s0 + $0x2ac] ss:$16 sps:$4 sm:$0xff]  }
  0x49   :  { %1089 = vmatmul.mubr.bf16.gmra.mxu0 %v2703_v38  ;;  %v2799_v38 = vld [vmem:[%s3721_s0 + $0x220] ss:$16 sps:$4 sm:$0xff]  }
  0x4a   :  { %1096 = vmatprep.mubr.bf16.mxu0 %v2707_v39  ;;  %v2803_v39 = vld [vmem:[%s3721_s0 + $0x244] ss:$16 sps:$4 sm:$0xff]  }
  0x4e   :  { %1410 = vmatmul.mubr.bf16.gmra.mxu1 %v2724_v44  ;;  %v2820_v44 = vld [vmem:[%s3721_s0 + $0x2a8] ss:$16 sps:$4 sm:$0xff]  }
  0x4f   :  { %2321 = vmatprep.mubr.msk.bf16.mxu1 %vm951_vm0, %v2728_v45  ;;  %v2824_v45 = vld [vmem:[%s3721_s0 + $0x2cc] ss:$16 sps:$4 sm:$0xff]  }
  0x51   :  { %1097 = vmatmul.mubr.bf16.gmra.mxu0 %v2709_v42  ;;  %v2805_v42 = vld [vmem:[%s3721_s0 + $0x240] ss:$16 sps:$4 sm:$0xff]  }
  0x52   :  { %1104 = vmatprep.mubr.bf16.mxu0 %v2713_v43  ;;  %v2809_v43 = vld [vmem:[%s3721_s0 + $0x264] ss:$16 sps:$4 sm:$0xff]  }
  0x56   :  { %1418 = vmatmul.mubr.bf16.gmra.mxu1 %v2730_v48  ;;  %v2826_v48 = vld [vmem:[%s3721_s0 + $0x2c8] ss:$16 sps:$4 sm:$0xff]  }
  0x57   :  { %2322 = vmatprep.mubr.msk.bf16.mxu1 %vm951_vm0, %v2734_v49  ;;  %v2830_v49 = vld [vmem:[%s3721_s0 + $0x2ec] ss:$16 sps:$4 sm:$0xff]  }
  0x59   :  { %1105 = vmatmul.mubr.bf16.gmra.mxu0 %v2715_v46  ;;  %v2811_v46 = vld [vmem:[%s3721_s0 + $0x260] ss:$16 sps:$4 sm:$0xff]  }
  0x5a   :  { %1112 = vmatprep.mubr.bf16.mxu0 %v2719_v47  ;;  %v2815_v47 = vld [vmem:[%s3721_s0 + $0x284] ss:$16 sps:$4 sm:$0xff]  }
  0x5e   :  { %1426 = vmatmul.mubr.bf16.gmra.mxu1 %v2736_v52  ;;  %v2832_v52 = vld [vmem:[%s3721_s0 + $0x2e8] ss:$16 sps:$4 sm:$0xff]  }
  0x5f   :  { %2323 = vmatprep.mubr.msk.bf16.mxu1 %vm951_vm0, %v2740_v53  ;;  %v2836_v53 = vld [vmem:[%s3721_s0 + $0x30c] ss:$16 sps:$4 sm:$0xff]  }
  0x61   :  { %1113 = vmatmul.mubr.bf16.gmra.mxu0 %v2721_v50  ;;  %v2817_v50 = vld [vmem:[%s3721_s0 + $0x280] ss:$16 sps:$4 sm:$0xff]  }
  0x62   :  { %1120 = vmatprep.mubr.bf16.mxu0 %v2725_v51  ;;  %v2821_v51 = vld [vmem:[%s3721_s0 + $0x2a4] ss:$16 sps:$4 sm:$0xff]  }
  0x66   :  { %1434 = vmatmul.mubr.bf16.gmra.mxu1 %v2742_v56  ;;  %v2838_v56 = vld [vmem:[%s3721_s0 + $0x308] ss:$16 sps:$4 sm:$0xff]  }
  0x67   :  { %2324 = vmatprep.mubr.msk.bf16.mxu1 %vm951_vm0, %v2746_v57  ;;  %v2842_v57 = vld [vmem:[%s3721_s0 + $0x32c] ss:$16 sps:$4 sm:$0xff]  }
  0x69   :  { %1121 = vmatmul.mubr.bf16.gmra.mxu0 %v2727_v54  ;;  %v2823_v54 = vld [vmem:[%s3721_s0 + $0x2a0] ss:$16 sps:$4 sm:$0xff]  }
  0x6a   :  { %1128 = vmatprep.mubr.bf16.mxu0 %v2731_v55  ;;  %v2827_v55 = vld [vmem:[%s3721_s0 + $0x2c4] ss:$16 sps:$4 sm:$0xff]  }
  0x6e   :  { %1442 = vmatmul.mubr.bf16.gmra.mxu1 %v2748_v60 }
  0x6f   :  { %2325 = vmatprep.mubr.msk.bf16.mxu1 %vm951_vm0, %v2752_v61  ;;  %v2833_v61 = vld [vmem:[%s3721_s0 + $0x2e4] ss:$16 sps:$4 sm:$0xff]  }
  0x71   :  { %1129 = vmatmul.mubr.bf16.gmra.mxu0 %v2733_v58 }
  0x72   :  { %1136 = vmatprep.mubr.bf16.mxu0 %v2737_v59  ;;  %v2829_v59 = vld [vmem:[%s3721_s0 + $0x2c0] ss:$16 sps:$4 sm:$0xff]  }
  0x76   :  { %1450 = vmatmul.mubr.bf16.gmra.mxu1 %v2754_v0  ;;  %v2848_v0 = vld [vmem:[%s3721_s0 + $0x34c] ss:$16 sps:$4 sm:$0xff]  }
  0x77   :  { %2326 = vmatprep.mubr.msk.bf16.mxu1 %vm951_vm0, %v2758_v1 }
  0x79   :  { %1137 = vmatmul.mubr.bf16.gmra.mxu0 %v2739_v62 }
  0x7a   :  { %1144 = vmatprep.mubr.bf16.mxu0 %v2743_v63  ;;  %v2844_v63 = vld [vmem:[%s3721_s0 + $0x328] ss:$16 sps:$4 sm:$0xff]  }
  0x7e   :  { %1458 = vmatmul.mubr.bf16.gmra.mxu1 %v2760_v4 }
  0x7f   :  { %2327 = vmatprep.mubr.msk.bf16.mxu1 %vm951_vm0, %v2764_v5  ;;  %v2839_v5 = vld [vmem:[%s3721_s0 + $0x304] ss:$16 sps:$4 sm:$0xff]  }
  0x81   :  { %1145 = vmatmul.mubr.bf16.gmra.mxu0 %v2745_v2 }
  0x82   :  { %1152 = vmatprep.mubr.bf16.mxu0 %v2749_v3  ;;  %v2835_v3 = vld [vmem:[%s3721_s0 + $0x2e0] ss:$16 sps:$4 sm:$0xff]  }
  0x86   :  { %1466 = vmatmul.mubr.bf16.gmra.mxu1 %v2766_v8  ;;  %v2854_v8 = vld [vmem:[%s3721_s0 + $0x36c] ss:$16 sps:$4 sm:$0xff]  }
  0x87   :  { %2328 = vmatprep.mubr.msk.bf16.mxu1 %vm951_vm0, %v2770_v9 }
  0x89   :  { %1153 = vmatmul.mubr.bf16.gmra.mxu0 %v2751_v6 }
  0x8a   :  { %1160 = vmatprep.mubr.bf16.mxu0 %v2755_v7  ;;  %v2850_v7 = vld [vmem:[%s3721_s0 + $0x348] ss:$16 sps:$4 sm:$0xff]  }
  0x8e   :  { %1474 = vmatmul.mubr.bf16.gmra.mxu1 %v2772_v12 }
  0x8f   :  { %2329 = vmatprep.mubr.msk.bf16.mxu1 %vm951_vm0, %v2776_v13  ;;  %v2845_v13 = vld [vmem:[%s3721_s0 + $0x324] ss:$16 sps:$4 sm:$0xff]  }
  0x91   :  { %1161 = vmatmul.mubr.bf16.gmra.mxu0 %v2757_v10 }
  0x92   :  { %1168 = vmatprep.mubr.bf16.mxu0 %v2761_v11  ;;  %v2841_v11 = vld [vmem:[%s3721_s0 + $0x300] ss:$16 sps:$4 sm:$0xff]  }
  0x96   :  { %1482 = vmatmul.mubr.bf16.gmra.mxu1 %v2778_v16  ;;  %v2860_v16 = vld [vmem:[%s3721_s0 + $0x38c] ss:$16 sps:$4 sm:$0xff]  }
  0x97   :  { %2330 = vmatprep.mubr.msk.bf16.mxu1 %vm951_vm0, %v2782_v17 }
  0x99   :  { %1169 = vmatmul.mubr.bf16.gmra.mxu0 %v2763_v14 }
  0x9a   :  { %1176 = vmatprep.mubr.bf16.mxu0 %v2767_v15  ;;  %v2856_v15 = vld [vmem:[%s3721_s0 + $0x368] ss:$16 sps:$4 sm:$0xff]  }
  0x9e   :  { %1490 = vmatmul.mubr.bf16.gmra.mxu1 %v2784_v20 }
  0x9f   :  { %2331 = vmatprep.mubr.msk.bf16.mxu1 %vm951_vm0, %v2788_v21 }
  0xa1   :  { %1177 = vmatmul.mubr.bf16.gmra.mxu0 %v2769_v18 }
  0xa2   :  { %1184 = vmatprep.mubr.bf16.mxu0 %v2773_v19 }
  0xa6   :  { %1498 = vmatmul.mubr.bf16.gmra.mxu1 %v2790_v24 }
  0xa7   :  { %2332 = vmatprep.mubr.msk.bf16.mxu1 %vm951_vm0, %v2794_v25 }
  0xa9   :  { %1185 = vmatmul.mubr.bf16.gmra.mxu0 %v2775_v22 }
  0xaa   :  { %1192 = vmatprep.mubr.bf16.mxu0 %v2779_v23  ;;  %v2847_v23 = vld [vmem:[%s3721_s0 + $0x320] ss:$16 sps:$4 sm:$0xff]  }
  0xae   :  { %1506 = vmatmul.mubr.bf16.gmra.mxu1 %v2796_v28 }
  0xaf   :  { %2333 = vmatprep.mubr.msk.bf16.mxu1 %vm951_vm0, %v2800_v29  ;;  %v2862_v29 = vld [vmem:[%s3721_s0 + $0x388] ss:$16 sps:$4 sm:$0xff]  }
  0xb1   :  { %1193 = vmatmul.mubr.bf16.gmra.mxu0 %v2781_v26  ;;  %v2851_v26 = vld [vmem:[%s3721_s0 + $0x344] ss:$16 sps:$4 sm:$0xff]  }
  0xb2   :  { %1200 = vmatprep.mubr.bf16.mxu0 %v2785_v27 }
  0xb6   :  { %1514 = vmatmul.mubr.bf16.gmra.mxu1 %v2802_v32 }
  0xb7   :  { %2334 = vmatprep.mubr.msk.bf16.mxu1 %vm951_vm0, %v2806_v33 }
  0xb9   :  { %1201 = vmatmul.mubr.bf16.gmra.mxu0 %v2787_v30 }
  0xba   :  { %1208 = vmatprep.mubr.bf16.mxu0 %v2791_v31 }
  0xbe   :  { %1522 = vmatmul.mubr.bf16.gmra.mxu1 %v2808_v36 }
  0xbf   :  { %2335 = vmatprep.mubr.msk.bf16.mxu1 %vm951_vm0, %v2812_v37 }
  0xc1   :  { %1209 = vmatmul.mubr.bf16.gmra.mxu0 %v2793_v34  ;;  %v2866_v34 = vld [vmem:[%s3721_s0 + $0x3ac] ss:$16 sps:$4 sm:$0xff]  }
  0xc2   :  { %1216 = vmatprep.mubr.bf16.mxu0 %v2797_v35 }
  0xc6   :  { %1530 = vmatmul.mubr.bf16.gmra.mxu1 %v2814_v40 }
  0xc7   :  { %2336 = vmatprep.mubr.msk.bf16.mxu1 %vm951_vm0, %v2818_v41 }
  0xc9   :  { %1217 = vmatmul.mubr.bf16.gmra.mxu0 %v2799_v38 }
  0xca   :  { %1224 = vmatprep.mubr.bf16.mxu0 %v2803_v39 }
  0xce   :  { %1538 = vmatmul.mubr.bf16.gmra.mxu1 %v2820_v44  ;;  %v2853_v44 = vld [vmem:[%s3721_s0 + $0x340] ss:$16 sps:$4 sm:$0xff]  }
  0xcf   :  { %2337 = vmatprep.mubr.msk.bf16.mxu1 %vm951_vm0, %v2824_v45 }
  0xd1   :  { %1225 = vmatmul.mubr.bf16.gmra.mxu0 %v2805_v42 }
  0xd2   :  { %1232 = vmatprep.mubr.bf16.mxu0 %v2809_v43 }
  0xd6   :  { %1546 = vmatmul.mubr.bf16.gmra.mxu1 %v2826_v48  ;;  %v2857_v48 = vld [vmem:[%s3721_s0 + $0x364] ss:$16 sps:$4 sm:$0xff]  }
  0xd7   :  { %2338 = vmatprep.mubr.msk.bf16.mxu1 %vm951_vm0, %v2830_v49 }
  0xd9   :  { %1233 = vmatmul.mubr.bf16.gmra.mxu0 %v2811_v46 }
  0xda   :  { %1240 = vmatprep.mubr.bf16.mxu0 %v2815_v47 }
  0xde   :  { %1554 = vmatmul.mubr.bf16.gmra.mxu1 %v2832_v52 }
  0xdf   :  { %2339 = vmatprep.mubr.msk.bf16.mxu1 %vm951_vm0, %v2836_v53 }
  0xe1   :  { %1241 = vmatmul.mubr.bf16.gmra.mxu0 %v2817_v50 }
  0xe2   :  { %1248 = vmatprep.mubr.bf16.mxu0 %v2821_v51  ;;  %v2868_v51 = vld [vmem:[%s3721_s0 + $0x3a8] ss:$16 sps:$4 sm:$0xff]  }
  0xe6   :  { %v1371_v58 = vpop.f32.mrf.mxu1  ;;  %1562 = vmatmul.mubr.bf16.gmra.mxu1 %v2838_v56 }
  0xe7   :  { %2340 = vmatprep.mubr.msk.bf16.mxu1 %vm951_vm0, %v2842_v57 }
  0xe8   :  { %v1373_v60 = vpop.f32.mrf.mxu1 }
  0xe9   :  { %1249 = vmatmul.mubr.bf16.gmra.mxu0 %v2823_v54 }
  0xea   :  { %1256 = vmatprep.mubr.bf16.mxu0 %v2827_v55  ;;  %v1374_v62 = vpop.f32.mrf.mxu1  ;;  %v2872_v55 = vld [vmem:[%s3721_s0 + $0x3cc] ss:$16 sps:$4 sm:$0xff]  }
  0xec   :  { %v1376_v1 = vpop.f32.mrf.mxu1 }
  0xed   :  { %v2859_v1 = vld [vmem:[%s3721_s0 + $0x360] ss:$16 sps:$4 sm:$0xff]  }
  0xee   :  { %v1379_v2 = vpop.f32.mrf.mxu1  ;;  %1570 = vmatmul.mubr.bf16.gmra.mxu1 %v2844_v63 }
  0xef   :  { %2341 = vmatprep.mubr.msk.bf16.mxu1 %vm951_vm0, %v2848_v0 }
  0xf0   :  { %v1381_v4 = vpop.f32.mrf.mxu1 }
  0xf1   :  { %1257 = vmatmul.mubr.bf16.gmra.mxu0 %v2829_v59 }
  0xf2   :  { %1264 = vmatprep.mubr.bf16.mxu0 %v2833_v61  ;;  %v1382_v6 = vpop.f32.mrf.mxu1 }
  0xf4   :  { %v1384_v9 = vpop.f32.mrf.mxu1 }
  0xf6   :  { %v3349_v10 = vpop.f32.mrf.mxu1  ;;  %1578 = vmatmul.mubr.bf16.gmra.mxu1 %v2850_v7 }
  0xf7   :  { %2342 = vmatprep.mubr.msk.bf16.mxu1 %vm951_vm0, %v2854_v8  ;;  %v2874_v8 = vld [vmem:[%s3721_s0 + $0x3c8] ss:$16 sps:$4 sm:$0xff]  }
  0xf8   :  { %v1389_v12 = vpop.f32.mrf.mxu1 }
  0xf9   :  { %1265 = vmatmul.mubr.bf16.gmra.mxu0 %v2835_v3  ;;  %v2878_v12 = vld [vmem:[%s3721_s0 + $0x3ec] ss:$16 sps:$4 sm:$0xff]  }
  0xfa   :  { %1272 = vmatprep.mubr.bf16.mxu0 %v2839_v5  ;;  %v3358_v14 = vpop.f32.mrf.mxu1  ;;  %v2865_v5 = vld [vmem:[%s3721_s0 + $0x384] ss:$16 sps:$4 sm:$0xff]  }
  0xfc   :  { %v1392_v18 = vpop.f32.mrf.mxu1 }
  0xfe   :  { %v3366_v20 = vpop.f32.mrf.mxu1  ;;  %1586 = vmatmul.mubr.bf16.gmra.mxu1 %v2856_v15 }
  0xff   :  { %2343 = vmatprep.mubr.msk.bf16.mxu1 %vm951_vm0, %v2860_v16 }
 0x100   :  { %v1397_v24 = vpop.f32.mrf.mxu1 }
 0x101   :  { %v1082_v17 = vpop.f32.mrf.mxu0  ;;  %1273 = vmatmul.mubr.bf16.gmra.mxu0 %v2841_v11 }
 0x102   :  { %1280 = vmatprep.mubr.bf16.mxu0 %v2845_v13  ;;  %v1372_v21 = vadd.f32 %v1371_v58, %v1082_v17  ;;  %v3375_v28 = vpop.f32.mrf.mxu1 }
 0x103   :  { %v1084_v19 = vpop.f32.mrf.mxu0 }
 0x104   :  { %v2016_v30 = vmul.f32 %v1372_v21, %v1372_v21  ;;  %v1400_v36 = vpop.f32.mrf.mxu1 }
 0x105   :  { %v1085_v22 = vpop.f32.mrf.mxu0 }
 0x106   :  { %v1375_v25 = vadd.f32 %v1374_v62, %v1085_v22  ;;  %v3386_v40 = vpop.f32.mrf.mxu1  ;;  %1594 = vmatmul.mubr.bf16.gmra.mxu1 %v2862_v29 }
 0x107   :  { %v1087_v27 = vpop.f32.mrf.mxu0  ;;  %2344 = vmatprep.mubr.msk.bf16.mxu1 %vm951_vm0, %v2866_v34 }
 0x108   :  { %v2478_v31 = vpack.c.bf16 %v1375_v25, %v1372_v21  ;;  %v1946_v32 = vadd.f32 %v1375_v25, %v1372_v21  ;;  %v2017_v33 = vmul.f32 %v1375_v25, %v1375_v25  ;;  %v1405_v45 = vpop.f32.mrf.mxu1 }
 0x109   :  { %v1090_v35 = vpop.f32.mrf.mxu0  ;;  %1281 = vmatmul.mubr.bf16.gmra.mxu0 %v2847_v23  ;;  %v2863_v23 = vld [vmem:[%s3721_s0 + $0x380] ss:$16 sps:$4 sm:$0xff]  }
 0x10a   :  { %2479 = vst [vmem:[%s3722_s2] sm:$0xff] %v2478_v31   ;;  %v2080_v37 = vadd.f32 %v2017_v33, %v2016_v30  ;;  %v1380_v38 = vadd.f32 %v1379_v2, %v1090_v35  ;;  %1288 = vmatprep.mubr.bf16.mxu0 %v2851_v26  ;;  %v3395_v50 = vpop.f32.mrf.mxu1  ;;  %v2880_v30 = vld [vmem:[%s3721_s0 + $0x3e8] ss:$16 sps:$4 sm:$0xff]  }
 0x10b   :  { %v1092_v39 = vpop.f32.mrf.mxu0 }
 0x10c   :  { %v1947_v41 = vadd.f32 %v1946_v32, %v1380_v38  ;;  %v2018_v42 = vmul.f32 %v1380_v38, %v1380_v38  ;;  %v1408_v57 = vpop.f32.mrf.mxu1 }
 0x10d   :  { %v1093_v43 = vpop.f32.mrf.mxu0 }
 0x10e   :  { %v2081_v46 = vadd.f32 %v2080_v37, %v2018_v42  ;;  %v1383_v47 = vadd.f32 %v1382_v6, %v1093_v43  ;;  %v3407_v61 = vpop.f32.mrf.mxu1  ;;  %1602 = vmatmul.mubr.bf16.gmra.mxu1 %v2868_v51  ;;  %v2869_v43 = vld [vmem:[%s3721_s0 + $0x3a0] ss:$16 sps:$4 sm:$0xff]  }
 0x10f   :  { %v1095_v49 = vpop.f32.mrf.mxu0  ;;  %2345 = vmatprep.mubr.msk.bf16.mxu1 %vm951_vm0, %v2872_v55 }
 0x110   :  { %v2483_v52 = vpack.c.bf16 %v1383_v47, %v1380_v38  ;;  %v1948_v53 = vadd.f32 %v1947_v41, %v1383_v47  ;;  %v2019_v54 = vmul.f32 %v1383_v47, %v1383_v47  ;;  %v1413_v2 = vpop.f32.mrf.mxu1 }
 0x111   :  { %v1098_v56 = vpop.f32.mrf.mxu0  ;;  %1289 = vmatmul.mubr.bf16.gmra.mxu0 %v2853_v44  ;;  %v2883_v2 = vld [vmem:[%s3721_s0 + $0x3e4] ss:$16 sps:$4 sm:$0xff]  }
 0x112   :  { %2635 = vst [vmem:[%s3722_s2 + $0x8] sm:$0xff] %v2483_v52   ;;  %v2082_v58 = vadd.f32 %v2081_v46, %v2019_v54  ;;  %v1388_v59 = vadd.f32 %v3349_v10, %v1098_v56  ;;  %1296 = vmatprep.mubr.bf16.mxu0 %v2857_v48  ;;  %v3417_v7 = vpop.f32.mrf.mxu1 }
 0x113   :  { %v1100_v60 = vpop.f32.mrf.mxu0 }
 0x114   :  { %v1949_v62 = vadd.f32 %v1948_v53, %v1388_v59  ;;  %v2020_v63 = vmul.f32 %v1388_v59, %v1388_v59 }
 0x115   :  { %v1101_v0 = vpop.f32.mrf.mxu0 }
 0x116   :  { %v2083_v3 = vadd.f32 %v2082_v58, %v2020_v63  ;;  %v1391_v4 = vadd.f32 %v3358_v14, %v1101_v0  ;;  %v1416_v14 = vpop.f32.mrf.mxu1  ;;  %1610 = vmatmul.mubr.bf16.gmra.mxu1 %v2874_v8 }
 0x117   :  { %v1103_v6 = vpop.f32.mrf.mxu0  ;;  %2346 = vmatprep.mubr.msk.bf16.mxu1 %vm951_vm0, %v2878_v12 }
 0x118   :  { %v2488_v9 = vpack.c.bf16 %v1391_v4, %v1388_v59  ;;  %v1950_v10 = vadd.f32 %v1949_v62, %v1391_v4  ;;  %v2021_v11 = vmul.f32 %v1391_v4, %v1391_v4  ;;  %v3429_v18 = vpop.f32.mrf.mxu1  ;;  %v2875_v62 = vld [vmem:[%s3721_s0 + $0x3c0] ss:$16 sps:$4 sm:$0xff]  }
 0x119   :  { %v1106_v13 = vpop.f32.mrf.mxu0  ;;  %1297 = vmatmul.mubr.bf16.gmra.mxu0 %v2859_v1 }
 0x11a   :  { %2636 = vst [vmem:[%s3722_s2 + $0x10] sm:$0xff] %v2488_v9   ;;  %v2084_v15 = vadd.f32 %v2083_v3, %v2021_v11  ;;  %v1396_v16 = vadd.f32 %v3366_v20, %v1106_v13  ;;  %1304 = vmatprep.mubr.bf16.mxu0 %v2865_v5  ;;  %v1421_v24 = vpop.f32.mrf.mxu1  ;;  %v2871_v20 = vld [vmem:[%s3721_s0 + $0x3a4] ss:$16 sps:$4 sm:$0xff]  }
 0x11b   :  { %v1108_v17 = vpop.f32.mrf.mxu0 }
 0x11c   :  { %v1951_v19 = vadd.f32 %v1950_v10, %v1396_v16  ;;  %v2022_v21 = vmul.f32 %v1396_v16, %v1396_v16  ;;  %v3439_v29 = vpop.f32.mrf.mxu1 }
 0x11d   :  { %v1109_v22 = vpop.f32.mrf.mxu0 }
 0x11e   :  { %v2085_v25 = vadd.f32 %v2084_v15, %v2022_v21  ;;  %v1399_v26 = vadd.f32 %v3375_v28, %v1109_v22  ;;  %v1424_v35 = vpop.f32.mrf.mxu1  ;;  %1618 = vmatmul.mubr.bf16.gmra.mxu1 %v2880_v30 }
 0x11f   :  { %v1111_v27 = vpop.f32.mrf.mxu0 }
 0x120   :  { %v2493_v31 = vpack.c.bf16 %v1399_v26, %v1396_v16  ;;  %v1952_v32 = vadd.f32 %v1951_v19, %v1399_v26  ;;  %v2023_v33 = vmul.f32 %v1399_v26, %v1399_v26  ;;  %v3448_v38 = vpop.f32.mrf.mxu1  ;;  %v2881_v16 = vld [vmem:[%s3721_s0 + $0x3e0] ss:$16 sps:$4 sm:$0xff]  }
 0x121   :  { %v1114_v34 = vpop.f32.mrf.mxu0  ;;  %1305 = vmatmul.mubr.bf16.gmra.mxu0 %v2863_v23 }
 0x122   :  { %2637 = vst [vmem:[%s3722_s2 + $0x18] sm:$0xff] %v2493_v31   ;;  %v2086_v28 = vadd.f32 %v2085_v25, %v2023_v33  ;;  %v1404_v36 = vadd.f32 %v3386_v40, %v1114_v34  ;;  %1312 = vmatprep.mubr.bf16.mxu0 %v2871_v20  ;;  %v1429_v44 = vpop.f32.mrf.mxu1  ;;  %v2877_v40 = vld [vmem:[%s3721_s0 + $0x3c4] ss:$16 sps:$4 sm:$0xff]  }
 0x123   :  { %v1116_v37 = vpop.f32.mrf.mxu0 }
 0x124   :  { %v1953_v39 = vadd.f32 %v1952_v32, %v1404_v36  ;;  %v2024_v41 = vmul.f32 %v1404_v36, %v1404_v36  ;;  %v1430_v48 = vpop.f32.mrf.mxu1 }
 0x125   :  { %v1117_v42 = vpop.f32.mrf.mxu0 }
 0x126   :  { %v2087_v45 = vadd.f32 %v2086_v28, %v2024_v41  ;;  %v1407_v46 = vadd.f32 %v3395_v50, %v1117_v42  ;;  %v1432_v54 = vpop.f32.mrf.mxu1 }
 0x127   :  { %v1119_v47 = vpop.f32.mrf.mxu0 }
 0x128   :  { %v2498_v49 = vpack.c.bf16 %v1407_v46, %v1404_v36  ;;  %v1954_v51 = vadd.f32 %v1953_v39, %v1407_v46  ;;  %v2025_v52 = vmul.f32 %v1407_v46, %v1407_v46  ;;  %v1435_v57 = vpop.f32.mrf.mxu1 }
 0x129   :  { %v1122_v53 = vpop.f32.mrf.mxu0  ;;  %1313 = vmatmul.mubr.bf16.gmra.mxu0 %v2869_v43 }
 0x12a   :  { %2638 = vst [vmem:[%s3722_s2 + $0x20] sm:$0xff] %v2498_v49   ;;  %v2088_v55 = vadd.f32 %v2087_v45, %v2025_v52  ;;  %v1412_v56 = vadd.f32 %v3407_v61, %v1122_v53  ;;  %1320 = vmatprep.mubr.bf16.mxu0 %v2877_v40  ;;  %v1437_v63 = vpop.f32.mrf.mxu1 }
 0x12b   :  { %v1124_v50 = vpop.f32.mrf.mxu0 }
 0x12c   :  { %v1955_v58 = vadd.f32 %v1954_v51, %v1412_v56  ;;  %v2026_v59 = vmul.f32 %v1412_v56, %v1412_v56  ;;  %v1438_v61 = vpop.f32.mrf.mxu1 }
 0x12d   :  { %v1125_v60 = vpop.f32.mrf.mxu0 }
 0x12e   :  { %v2089_v0 = vadd.f32 %v2088_v55, %v2026_v59  ;;  %v1415_v1 = vadd.f32 %v3417_v7, %v1125_v60  ;;  %v1440_v9 = vpop.f32.mrf.mxu1 }
 0x12f   :  { %v1127_v3 = vpop.f32.mrf.mxu0 }
 0x130   :  { %v2503_v4 = vpack.c.bf16 %v1415_v1, %v1412_v56  ;;  %v1956_v5 = vadd.f32 %v1955_v58, %v1415_v1  ;;  %v2027_v6 = vmul.f32 %v1415_v1, %v1415_v1  ;;  %v1443_v12 = vpop.f32.mrf.mxu1 }
 0x131   :  { %v1130_v8 = vpop.f32.mrf.mxu0  ;;  %1321 = vmatmul.mubr.bf16.gmra.mxu0 %v2875_v62 }
 0x132   :  { %2639 = vst [vmem:[%s3722_s2 + $0x28] sm:$0xff] %v2503_v4   ;;  %v2090_v10 = vadd.f32 %v2089_v0, %v2027_v6  ;;  %v1420_v11 = vadd.f32 %v3429_v18, %v1130_v8  ;;  %1328 = vmatprep.mubr.bf16.mxu0 %v2883_v2  ;;  %v1445_v17 = vpop.f32.mrf.mxu1 }
 0x133   :  { %v1132_v7 = vpop.f32.mrf.mxu0 }
 0x134   :  { %v1957_v13 = vadd.f32 %v1956_v5, %v1420_v11  ;;  %v2028_v14 = vmul.f32 %v1420_v11, %v1420_v11  ;;  %v1446_v23 = vpop.f32.mrf.mxu1 }
 0x135   :  { %v1133_v15 = vpop.f32.mrf.mxu0 }
 0x136   :  { %v2091_v19 = vadd.f32 %v2090_v10, %v2028_v14  ;;  %v1423_v21 = vadd.f32 %v3439_v29, %v1133_v15  ;;  %v1448_v20 = vpop.f32.mrf.mxu1 }
 0x137   :  { %v1135_v22 = vpop.f32.mrf.mxu0 }
 0x138   :  { %v2508_v24 = vpack.c.bf16 %v1423_v21, %v1420_v11  ;;  %v1958_v25 = vadd.f32 %v1957_v13, %v1423_v21  ;;  %v2029_v26 = vmul.f32 %v1423_v21, %v1423_v21  ;;  %v1451_v32 = vpop.f32.mrf.mxu1 }
 0x139   :  { %v1138_v18 = vpop.f32.mrf.mxu0  ;;  %1329 = vmatmul.mubr.bf16.gmra.mxu0 %v2881_v16 }
 0x13a   :  { %2640 = vst [vmem:[%s3722_s2 + $0x30] sm:$0xff] %v2508_v24   ;;  %v2092_v27 = vadd.f32 %v2091_v19, %v2029_v26  ;;  %v1428_v30 = vadd.f32 %v3448_v38, %v1138_v18  ;;  %v1453_v35 = vpop.f32.mrf.mxu1 }
 0x13b   :  { %v1140_v31 = vpop.f32.mrf.mxu0 }
 0x13c   :  { %v1959_v33 = vadd.f32 %v1958_v25, %v1428_v30  ;;  %v2030_v34 = vmul.f32 %v1428_v30, %v1428_v30  ;;  %v1454_v39 = vpop.f32.mrf.mxu1 }
 0x13d   :  { %v1141_v29 = vpop.f32.mrf.mxu0 }
 0x13e   :  { %v2093_v28 = vadd.f32 %v2092_v27, %v2030_v34  ;;  %v1431_v36 = vadd.f32 %v1430_v48, %v1141_v29  ;;  %v1456_v45 = vpop.f32.mrf.mxu1 }
 0x13f   :  { %v1143_v37 = vpop.f32.mrf.mxu0 }
 0x140   :  { %v2513_v41 = vpack.c.bf16 %v1431_v36, %v1428_v30  ;;  %v1960_v42 = vadd.f32 %v1959_v33, %v1431_v36  ;;  %v2031_v43 = vmul.f32 %v1431_v36, %v1431_v36  ;;  %v1459_v47 = vpop.f32.mrf.mxu1 }
 0x141   :  { %v1146_v44 = vpop.f32.mrf.mxu0 }
 0x142   :  { %2641 = vst [vmem:[%s3722_s2 + $0x38] sm:$0xff] %v2513_v41   ;;  %v2094_v38 = vadd.f32 %v2093_v28, %v2031_v43  ;;  %v1436_v46 = vadd.f32 %v1435_v57, %v1146_v44  ;;  %v1461_v53 = vpop.f32.mrf.mxu1 }
 0x143   :  { %v1148_v40 = vpop.f32.mrf.mxu0 }
 0x144   :  { %v1961_v49 = vadd.f32 %v1960_v42, %v1436_v46  ;;  %v2032_v51 = vmul.f32 %v1436_v46, %v1436_v46  ;;  %v1462_v56 = vpop.f32.mrf.mxu1 }
 0x145   :  { %v1149_v52 = vpop.f32.mrf.mxu0 }
 0x146   :  { %v2095_v48 = vadd.f32 %v2094_v38, %v2032_v51  ;;  %v1439_v54 = vadd.f32 %v1438_v61, %v1149_v52  ;;  %v1464_v62 = vpop.f32.mrf.mxu1 }
 0x147   :  { %v1151_v55 = vpop.f32.mrf.mxu0 }
 0x148   :  { %v2518_v50 = vpack.c.bf16 %v1439_v54, %v1436_v46  ;;  %v1962_v58 = vadd.f32 %v1961_v49, %v1439_v54  ;;  %v2033_v59 = vmul.f32 %v1439_v54, %v1439_v54  ;;  %v1467_v1 = vpop.f32.mrf.mxu1 }
 0x149   :  { %v1154_v60 = vpop.f32.mrf.mxu0 }
 0x14a   :  { %2642 = vst [vmem:[%s3722_s2 + $0x40] sm:$0xff] %v2518_v50   ;;  %v2096_v57 = vadd.f32 %v2095_v48, %v2033_v59  ;;  %v1444_v63 = vadd.f32 %v1443_v12, %v1154_v60  ;;  %v1469_v5 = vpop.f32.mrf.mxu1 }
 0x14b   :  { %v1156_v0 = vpop.f32.mrf.mxu0 }
 0x14c   :  { %v1963_v2 = vadd.f32 %v1962_v58, %v1444_v63  ;;  %v2034_v3 = vmul.f32 %v1444_v63, %v1444_v63  ;;  %v1470_v9 = vpop.f32.mrf.mxu1 }
 0x14d   :  { %v1157_v4 = vpop.f32.mrf.mxu0 }
 0x14e   :  { %v2097_v61 = vadd.f32 %v2096_v57, %v2034_v3  ;;  %v1447_v6 = vadd.f32 %v1446_v23, %v1157_v4  ;;  %v1472_v14 = vpop.f32.mrf.mxu1 }
 0x14f   :  { %v1159_v8 = vpop.f32.mrf.mxu0 }
 0x150   :  { %v2523_v10 = vpack.c.bf16 %v1447_v6, %v1444_v63  ;;  %v1964_v11 = vadd.f32 %v1963_v2, %v1447_v6  ;;  %v2035_v7 = vmul.f32 %v1447_v6, %v1447_v6  ;;  %v1475_v17 = vpop.f32.mrf.mxu1 }
 0x151   :  { %v1162_v13 = vpop.f32.mrf.mxu0 }
 0x152   :  { %2643 = vst [vmem:[%s3722_s2 + $0x48] sm:$0xff] %v2523_v10   ;;  %v2098_v12 = vadd.f32 %v2097_v61, %v2035_v7  ;;  %v1452_v15 = vadd.f32 %v1451_v32, %v1162_v13  ;;  %v1477_v24 = vpop.f32.mrf.mxu1 }
 0x153   :  { %v1164_v16 = vpop.f32.mrf.mxu0 }
 0x154   :  { %v1965_v19 = vadd.f32 %v1964_v11, %v1452_v15  ;;  %v2036_v21 = vmul.f32 %v1452_v15, %v1452_v15  ;;  %v1478_v18 = vpop.f32.mrf.mxu1 }
 0x155   :  { %v1165_v22 = vpop.f32.mrf.mxu0 }
 0x156   :  { %v2099_v23 = vadd.f32 %v2098_v12, %v2036_v21  ;;  %v1455_v25 = vadd.f32 %v1454_v39, %v1165_v22  ;;  %v1480_v33 = vpop.f32.mrf.mxu1 }
 0x157   :  { %v1167_v26 = vpop.f32.mrf.mxu0 }
 0x158   :  { %v2528_v20 = vpack.c.bf16 %v1455_v25, %v1452_v15  ;;  %v1966_v27 = vadd.f32 %v1965_v19, %v1455_v25  ;;  %v2037_v30 = vmul.f32 %v1455_v25, %v1455_v25  ;;  %v1483_v35 = vpop.f32.mrf.mxu1 }
 0x159   :  { %v1170_v31 = vpop.f32.mrf.mxu0 }
 0x15a   :  { %2644 = vst [vmem:[%s3722_s2 + $0x50] sm:$0xff] %v2528_v20   ;;  %v2100_v32 = vadd.f32 %v2099_v23, %v2037_v30  ;;  %v1460_v34 = vadd.f32 %v1459_v47, %v1170_v31  ;;  %v1485_v41 = vpop.f32.mrf.mxu1 }
 0x15b   :  { %v1172_v29 = vpop.f32.mrf.mxu0 }
 0x15c   :  { %v1967_v28 = vadd.f32 %v1966_v27, %v1460_v34  ;;  %v2038_v36 = vmul.f32 %v1460_v34, %v1460_v34  ;;  %v1486_v44 = vpop.f32.mrf.mxu1 }
 0x15d   :  { %v1173_v37 = vpop.f32.mrf.mxu0 }
 0x15e   :  { %v2101_v39 = vadd.f32 %v2100_v32, %v2038_v36  ;;  %v1463_v42 = vadd.f32 %v1462_v56, %v1173_v37  ;;  %v1488_v49 = vpop.f32.mrf.mxu1 }
 0x15f   :  { %v1175_v43 = vpop.f32.mrf.mxu0 }
 0x160   :  { %v2533_v45 = vpack.c.bf16 %v1463_v42, %v1460_v34  ;;  %v1968_v38 = vadd.f32 %v1967_v28, %v1463_v42  ;;  %v2039_v46 = vmul.f32 %v1463_v42, %v1463_v42  ;;  %v1491_v53 = vpop.f32.mrf.mxu1 }
 0x161   :  { %v1178_v40 = vpop.f32.mrf.mxu0 }
 0x162   :  { %2645 = vst [vmem:[%s3722_s2 + $0x58] sm:$0xff] %v2533_v45   ;;  %v2102_v47 = vadd.f32 %v2101_v39, %v2039_v46  ;;  %v1468_v51 = vadd.f32 %v1467_v1, %v1178_v40  ;;  %v1493_v50 = vpop.f32.mrf.mxu1 }
 0x163   :  { %v1180_v52 = vpop.f32.mrf.mxu0 }
 0x164   :  { %v1969_v48 = vadd.f32 %v1968_v38, %v1468_v51  ;;  %v2040_v54 = vmul.f32 %v1468_v51, %v1468_v51  ;;  %v1494_v60 = vpop.f32.mrf.mxu1 }
 0x165   :  { %v1181_v55 = vpop.f32.mrf.mxu0 }
 0x166   :  { %v2103_v56 = vadd.f32 %v2102_v47, %v2040_v54  ;;  %v1471_v58 = vadd.f32 %v1470_v9, %v1181_v55  ;;  %v1496_v2 = vpop.f32.mrf.mxu1 }
 0x167   :  { %v1183_v59 = vpop.f32.mrf.mxu0 }
 0x168   :  { %v2538_v62 = vpack.c.bf16 %v1471_v58, %v1468_v51  ;;  %v1970_v57 = vadd.f32 %v1969_v48, %v1471_v58  ;;  %v2041_v63 = vmul.f32 %v1471_v58, %v1471_v58  ;;  %v1499_v5 = vpop.f32.mrf.mxu1 }
 0x169   :  { %v1186_v0 = vpop.f32.mrf.mxu0 }
 0x16a   :  { %2646 = vst [vmem:[%s3722_s2 + $0x60] sm:$0xff] %v2538_v62   ;;  %v2104_v1 = vadd.f32 %v2103_v56, %v2041_v63  ;;  %v1476_v3 = vadd.f32 %v1475_v17, %v1186_v0  ;;  %v1501_v10 = vpop.f32.mrf.mxu1 }
 0x16b   :  { %v1188_v4 = vpop.f32.mrf.mxu0 }
 0x16c   :  { %v1971_v61 = vadd.f32 %v1970_v57, %v1476_v3  ;;  %v2042_v6 = vmul.f32 %v1476_v3, %v1476_v3  ;;  %v1502_v13 = vpop.f32.mrf.mxu1 }
 0x16d   :  { %v1189_v8 = vpop.f32.mrf.mxu0 }
 0x16e   :  { %v2105_v9 = vadd.f32 %v2104_v1, %v2042_v6  ;;  %v1479_v11 = vadd.f32 %v1478_v18, %v1189_v8  ;;  %v1504_v19 = vpop.f32.mrf.mxu1 }
 0x16f   :  { %v1191_v7 = vpop.f32.mrf.mxu0 }
 0x170   :  { %v2543_v14 = vpack.c.bf16 %v1479_v11, %v1476_v3  ;;  %v1972_v12 = vadd.f32 %v1971_v61, %v1479_v11  ;;  %v2043_v15 = vmul.f32 %v1479_v11, %v1479_v11  ;;  %v1507_v24 = vpop.f32.mrf.mxu1 }
 0x171   :  { %v1194_v16 = vpop.f32.mrf.mxu0 }
 0x172   :  { %2647 = vst [vmem:[%s3722_s2 + $0x68] sm:$0xff] %v2543_v14   ;;  %v2106_v17 = vadd.f32 %v2105_v9, %v2043_v15  ;;  %v1484_v21 = vadd.f32 %v1483_v35, %v1194_v16  ;;  %v1509_v20 = vpop.f32.mrf.mxu1 }
 0x173   :  { %v1196_v22 = vpop.f32.mrf.mxu0 }
 0x174   :  { %v1973_v23 = vadd.f32 %v1972_v12, %v1484_v21  ;;  %v2044_v25 = vmul.f32 %v1484_v21, %v1484_v21  ;;  %v1510_v31 = vpop.f32.mrf.mxu1 }
 0x175   :  { %v1197_v26 = vpop.f32.mrf.mxu0 }
 0x176   :  { %v2107_v18 = vadd.f32 %v2106_v17, %v2044_v25  ;;  %v1487_v27 = vadd.f32 %v1486_v44, %v1197_v26  ;;  %v1512_v28 = vpop.f32.mrf.mxu1 }
 0x177   :  { %v1199_v30 = vpop.f32.mrf.mxu0 }
 0x178   :  { %v2548_v33 = vpack.c.bf16 %v1487_v27, %v1484_v21  ;;  %v1974_v32 = vadd.f32 %v1973_v23, %v1487_v27  ;;  %v2045_v34 = vmul.f32 %v1487_v27, %v1487_v27  ;;  %v1515_v41 = vpop.f32.mrf.mxu1 }
 0x179   :  { %v1202_v29 = vpop.f32.mrf.mxu0 }
 0x17a   :  { %2648 = vst [vmem:[%s3722_s2 + $0x70] sm:$0xff] %v2548_v33   ;;  %v2108_v35 = vadd.f32 %v2107_v18, %v2045_v34  ;;  %v1492_v36 = vadd.f32 %v1491_v53, %v1202_v29  ;;  %v1517_v43 = vpop.f32.mrf.mxu1 }
 0x17b   :  { %v1204_v37 = vpop.f32.mrf.mxu0 }
 0x17c   :  { %v2046_v39 = vmul.f32 %v1492_v36, %v1492_v36  ;;  %v1975_v45 = vadd.f32 %v1974_v32, %v1492_v36  ;;  %v1518_v46 = vpop.f32.mrf.mxu1 }
 0x17d   :  { %v1205_v42 = vpop.f32.mrf.mxu0 }
 0x17e   :  { %v1495_v44 = vadd.f32 %v1494_v60, %v1205_v42  ;;  %v2109_v40 = vadd.f32 %v2108_v35, %v2046_v39  ;;  %v1520_v48 = vpop.f32.mrf.mxu1 }
 0x17f   :  { %v1207_v38 = vpop.f32.mrf.mxu0 }
 0x180   :  { %v2553_v49 = vpack.c.bf16 %v1495_v44, %v1492_v36  ;;  %v3504_v47 = vadd.f32 %v1975_v45, %v1495_v44  ;;  %v2047_v51 = vmul.f32 %v1495_v44, %v1495_v44  ;;  %v1523_v55 = vpop.f32.mrf.mxu1 }
 0x181   :  { %v1210_v52 = vpop.f32.mrf.mxu0 }
 0x182   :  { %2649 = vst [vmem:[%s3722_s2 + $0x78] sm:$0xff] %v2553_v49   ;;  %v3509_v53 = vadd.f32 %v2109_v40, %v2047_v51  ;;  %v1525_v56 = vpop.f32.mrf.mxu1  ;;  %v3511_v58 = vadd.f32 %v1499_v5, %v1210_v52 }
 0x183   :  { %v1212_v54 = vpop.f32.mrf.mxu0 }
 0x184   :  { %v1526_v62 = vpop.f32.mrf.mxu1 }
 0x185   :  { %v1213_v50 = vpop.f32.mrf.mxu0 }
 0x186   :  { %v3513_v59 = vadd.f32 %v1502_v13, %v1213_v50  ;;  %v1528_v0 = vpop.f32.mrf.mxu1 }
 0x187   :  { %v1215_v60 = vpop.f32.mrf.mxu0 }
 0x188   :  { %v2558_v57 = vpack.c.bf16 %v3513_v59, %v3511_v58  ;;  %v1531_v1 = vpop.f32.mrf.mxu1 }
 0x189   :  { %v1218_v63 = vpop.f32.mrf.mxu0 }
 0x18a   :  { %2650 = vst [vmem:[%s3722_s2 + $0x80] sm:$0xff] %v2558_v57   ;;  %v1533_v4 = vpop.f32.mrf.mxu1  ;;  %v3520_v61 = vadd.f32 %v1507_v24, %v1218_v63 }
 0x18b   :  { %v1220_v2 = vpop.f32.mrf.mxu0 }
 0x18c   :  { %v1534_v8 = vpop.f32.mrf.mxu1 }
 0x18d   :  { %v1221_v3 = vpop.f32.mrf.mxu0 }
 0x18e   :  { %v3522_v5 = vadd.f32 %v1510_v31, %v1221_v3  ;;  %v1536_v11 = vpop.f32.mrf.mxu1 }
 0x18f   :  { %v1223_v6 = vpop.f32.mrf.mxu0 }
 0x190   :  { %v2563_v10 = vpack.c.bf16 %v3522_v5, %v3520_v61  ;;  %v1539_v13 = vpop.f32.mrf.mxu1 }
 0x191   :  { %v1226_v9 = vpop.f32.mrf.mxu0 }
 0x192   :  { %2651 = vst [vmem:[%s3722_s2 + $0x88] sm:$0xff] %v2563_v10   ;;  %v1541_v12 = vpop.f32.mrf.mxu1  ;;  %v3529_v15 = vadd.f32 %v1515_v41, %v1226_v9 }
 0x193   :  { %v1228_v7 = vpop.f32.mrf.mxu0  ;;  %v2048_v12 = vmul.f32 %v3511_v58, %v3511_v58 }
 0x194   :  { %v1542_v17 = vpop.f32.mrf.mxu1 }
 0x195   :  { %v1229_v14 = vpop.f32.mrf.mxu0 }
 0x196   :  { %v3531_v16 = vadd.f32 %v1518_v46, %v1229_v14  ;;  %v1544_v24 = vpop.f32.mrf.mxu1 }
 0x197   :  { %v1231_v19 = vpop.f32.mrf.mxu0 }
 0x198   :  { %v2568_v21 = vpack.c.bf16 %v3531_v16, %v3529_v15  ;;  %v1547_v25 = vpop.f32.mrf.mxu1 }
 0x199   :  { %v1234_v22 = vpop.f32.mrf.mxu0 }
 0x19a   :  { %2652 = vst [vmem:[%s3722_s2 + $0x90] sm:$0xff] %v2568_v21   ;;  %v1549_v20 = vpop.f32.mrf.mxu1  ;;  %v3538_v18 = vadd.f32 %v1523_v55, %v1234_v22  ;;  %v2049_v22 = vmul.f32 %v3513_v59, %v3513_v59 }
 0x19b   :  { %v1236_v23 = vpop.f32.mrf.mxu0  ;;  %v2050_v20 = vmul.f32 %v3520_v61, %v3520_v61 }
 0x19c   :  { %v1550_v31 = vpop.f32.mrf.mxu1 }
 0x19d   :  { %v1237_v26 = vpop.f32.mrf.mxu0 }
 0x19e   :  { %v3540_v27 = vadd.f32 %v1526_v62, %v1237_v26  ;;  %v1552_v34 = vpop.f32.mrf.mxu1  ;;  %v2111_v26 = vadd.f32 %v3509_v53, %v2048_v12 }
 0x19f   :  { %v1239_v30 = vpop.f32.mrf.mxu0  ;;  %v2051_v34 = vmul.f32 %v3522_v5, %v3522_v5 }
 0x1a0   :  { %v2573_v33 = vpack.c.bf16 %v3540_v27, %v3538_v18  ;;  %v1555_v28 = vpop.f32.mrf.mxu1 }
 0x1a1   :  { %v1242_v32 = vpop.f32.mrf.mxu0 }
 0x1a2   :  { %2653 = vst [vmem:[%s3722_s2 + $0x98] sm:$0xff] %v2573_v33   ;;  %v1557_v36 = vpop.f32.mrf.mxu1  ;;  %v3547_v37 = vadd.f32 %v1531_v1, %v1242_v32  ;;  %v2112_v32 = vadd.f32 %v2111_v26, %v2049_v22 }
 0x1a3   :  { %v1244_v29 = vpop.f32.mrf.mxu0  ;;  %v2052_v36 = vmul.f32 %v3529_v15, %v3529_v15 }
 0x1a4   :  { %v1558_v42 = vpop.f32.mrf.mxu1  ;;  %v2113_v53 = vadd.f32 %v2112_v32, %v2050_v20 }
 0x1a5   :  { %v1245_v35 = vpop.f32.mrf.mxu0 }
 0x1a6   :  { %v3549_v41 = vadd.f32 %v1534_v8, %v1245_v35  ;;  %v1560_v44 = vpop.f32.mrf.mxu1 }
 0x1a7   :  { %v1247_v39 = vpop.f32.mrf.mxu0 }
 0x1a8   :  { %v2578_v43 = vpack.c.bf16 %v3549_v41, %v3547_v37  ;;  %v1563_v46 = vpop.f32.mrf.mxu1 }
 0x1a9   :  { %v1250_v45 = vpop.f32.mrf.mxu0 }
 0x1aa   :  { %2654 = vst [vmem:[%s3722_s2 + $0xa0] sm:$0xff] %v2578_v43   ;;  %v1565_v49 = vpop.f32.mrf.mxu1  ;;  %v3556_v51 = vadd.f32 %v1539_v13, %v1250_v45  ;;  %v2114_v45 = vadd.f32 %v2113_v53, %v2051_v34 }
 0x1ab   :  { %v1252_v38 = vpop.f32.mrf.mxu0  ;;  %v2054_v49 = vmul.f32 %v3538_v18, %v3538_v18 }
 0x1ac   :  { %v1566_v54 = vpop.f32.mrf.mxu1 }
 0x1ad   :  { %v1253_v40 = vpop.f32.mrf.mxu0 }
 0x1ae   :  { %v3558_v52 = vadd.f32 %v1542_v17, %v1253_v40  ;;  %v1568_v56 = vpop.f32.mrf.mxu1  ;;  %v2115_v40 = vadd.f32 %v2114_v45, %v2052_v36 }
 0x1af   :  { %v1255_v48 = vpop.f32.mrf.mxu0 }
 0x1b0   :  { %v2583_v55 = vpack.c.bf16 %v3558_v52, %v3556_v51  ;;  %v1571_v62 = vpop.f32.mrf.mxu1 }
 0x1b1   :  { %v1258_v50 = vpop.f32.mrf.mxu0 }
 0x1b2   :  { %2655 = vst [vmem:[%s3722_s2 + $0xa8] sm:$0xff] %v2583_v55   ;;  %v1573_v63 = vpop.f32.mrf.mxu1  ;;  %v3565_v0 = vadd.f32 %v1547_v25, %v1258_v50  ;;  %v1977_v25 = vadd.f32 %v3504_v47, %v3511_v58  ;;  %v2055_v50 = vmul.f32 %v3540_v27, %v3540_v27 }
 0x1b3   :  { %v1260_v60 = vpop.f32.mrf.mxu0 }
 0x1b4   :  { %v1574_v3 = vpop.f32.mrf.mxu1  ;;  %v1978_v33 = vadd.f32 %v1977_v25, %v3513_v59  ;;  %v2060_v32 = vmul.f32 %v3565_v0, %v3565_v0 }
 0x1b5   :  { %v1261_v57 = vpop.f32.mrf.mxu0 }
 0x1b6   :  { %v3567_v2 = vadd.f32 %v1550_v31, %v1261_v57  ;;  %v1576_v8 = vpop.f32.mrf.mxu1  ;;  %v1979_v58 = vadd.f32 %v1978_v33, %v3520_v61  ;;  %v2053_v61 = vmul.f32 %v3531_v16, %v3531_v16 }
 0x1b7   :  { %v1263_v1 = vpop.f32.mrf.mxu0 }
 0x1b8   :  { %v2588_v4 = vpack.c.bf16 %v3567_v2, %v3565_v0  ;;  %v3574_v9 = vpop.f32.mrf.mxu1  ;;  %v1980_v59 = vadd.f32 %v1979_v58, %v3522_v5  ;;  %v2116_v55 = vadd.f32 %v2115_v40, %v2053_v61 }
 0x1b9   :  { %v1266_v6 = vpop.f32.mrf.mxu0 }
 0x1ba   :  { %2656 = vst [vmem:[%s3722_s2 + $0xb0] sm:$0xff] %v2588_v4   ;;  %v1581_v7 = vpop.f32.mrf.mxu1  ;;  %v3576_v13 = vadd.f32 %v1555_v28, %v1266_v6  ;;  %v2117_v1 = vadd.f32 %v2116_v55, %v2054_v49  ;;  %v2056_v4 = vmul.f32 %v3547_v37, %v3547_v37 }
 0x1bb   :  { %v1268_v10 = vpop.f32.mrf.mxu0 }
 0x1bc   :  { %v3582_v17 = vpop.f32.mrf.mxu1 }
 0x1bd   :  { %v1269_v11 = vpop.f32.mrf.mxu0 }
 0x1be   :  { %v3578_v14 = vadd.f32 %v1558_v42, %v1269_v11  ;;  %v1584_v23 = vpop.f32.mrf.mxu1  ;;  %v2118_v11 = vadd.f32 %v2117_v1, %v2055_v50 }
 0x1bf   :  { %v1271_v19 = vpop.f32.mrf.mxu0  ;;  %v2059_v23 = vmul.f32 %v3558_v52, %v3558_v52 }
 0x1c0   :  { %v2593_v21 = vpack.c.bf16 %v3578_v14, %v3576_v13  ;;  %v3596_v31 = vpop.f32.mrf.mxu1  ;;  %v2119_v12 = vadd.f32 %v2118_v11, %v2056_v4  ;;  %v2058_v19 = vmul.f32 %v3556_v51, %v3556_v51  ;;  %v2063_v61 = vmul.f32 %v3578_v14, %v3578_v14 }
 0x1c1   :  { %v1274_v24 = vpop.f32.mrf.mxu0 }
 0x1c2   :  { %2657 = vst [vmem:[%s3722_s2 + $0xb8] sm:$0xff] %v2593_v21   ;;  %v1589_v47 = vpop.f32.mrf.mxu1  ;;  %v3602_v28 = vadd.f32 %v1563_v46, %v1274_v24  ;;  %v1981_v46 = vadd.f32 %v1980_v59, %v3529_v15 }
 0x1c3   :  { %v1276_v30 = vpop.f32.mrf.mxu0 }
 0x1c4   :  { %v3608_v42 = vpop.f32.mrf.mxu1 }
 0x1c5   :  { %v1277_v29 = vpop.f32.mrf.mxu0 }
 0x1c6   :  { %v3604_v35 = vadd.f32 %v1566_v54, %v1277_v29  ;;  %v1592_v38 = vpop.f32.mrf.mxu1  ;;  %v1982_v54 = vadd.f32 %v1981_v46, %v3531_v16 }
 0x1c7   :  { %v1279_v39 = vpop.f32.mrf.mxu0 }
 0x1c8   :  { %v2598_v43 = vpack.c.bf16 %v3604_v35, %v3602_v28  ;;  %v3621_v48 = vpop.f32.mrf.mxu1  ;;  %v1983_v15 = vadd.f32 %v1982_v54, %v3538_v18  ;;  %v2057_v18 = vmul.f32 %v3549_v41, %v3549_v41  ;;  %v2062_v39 = vmul.f32 %v3576_v13, %v3576_v13 }
 0x1c9   :  { %v1282_v44 = vpop.f32.mrf.mxu0 }
 0x1ca   :  { %2658 = vst [vmem:[%s3722_s2 + $0xc0] sm:$0xff] %v2598_v43   ;;  %v1597_v60 = vpop.f32.mrf.mxu1  ;;  %v3627_v57 = vadd.f32 %v1571_v62, %v1282_v44  ;;  %v1984_v16 = vadd.f32 %v1983_v15, %v3540_v27  ;;  %v2120_v24 = vadd.f32 %v2119_v12, %v2057_v18 }
 0x1cb   :  { %v1284_v5 = vpop.f32.mrf.mxu0  ;;  %v2065_v60 = vmul.f32 %v3604_v35, %v3604_v35 }
 0x1cc   :  { %v3633_v8 = vpop.f32.mrf.mxu1  ;;  %v2121_v33 = vadd.f32 %v2120_v24, %v2058_v19  ;;  %v2064_v5 = vmul.f32 %v3602_v28, %v3602_v28 }
 0x1cd   :  { %v1285_v56 = vpop.f32.mrf.mxu0 }
 0x1ce   :  { %v3629_v63 = vadd.f32 %v1574_v3, %v1285_v56  ;;  %v1600_v7 = vpop.f32.mrf.mxu1  ;;  %v1985_v3 = vadd.f32 %v1984_v16, %v3547_v37  ;;  %v2122_v58 = vadd.f32 %v2121_v33, %v2059_v23 }
 0x1cf   :  { %v1287_v6 = vpop.f32.mrf.mxu0 }
 0x1d0   :  { %v2603_v10 = vpack.c.bf16 %v3629_v63, %v3627_v57  ;;  %v3646_v21 = vpop.f32.mrf.mxu1  ;;  %v1986_v22 = vadd.f32 %v1985_v3, %v3549_v41  ;;  %v2123_v36 = vadd.f32 %v2122_v58, %v2060_v32 }
 0x1d1   :  { %v1290_v62 = vpop.f32.mrf.mxu0 }
 0x1d2   :  { %2659 = vst [vmem:[%s3722_s2 + $0xc8] sm:$0xff] %v2603_v10   ;;  %v1605_v26 = vpop.f32.mrf.mxu1  ;;  %v1987_v37 = vadd.f32 %v1986_v22, %v3556_v51  ;;  %v1580_v20 = vadd.f32 %v3574_v9, %v1290_v62  ;;  %v2061_v51 = vmul.f32 %v3567_v2, %v3567_v2  ;;  %v2067_v10 = vmul.f32 %v3629_v63, %v3629_v63 }
 0x1d3   :  { %v1292_v27 = vpop.f32.mrf.mxu0 }
 0x1d4   :  { %v3658_v29 = vpop.f32.mrf.mxu1  ;;  %v1988_v41 = vadd.f32 %v1987_v37, %v3558_v52  ;;  %v2124_v45 = vadd.f32 %v2123_v36, %v2061_v51  ;;  %v2068_v12 = vmul.f32 %v1580_v20, %v1580_v20 }
 0x1d5   :  { %v1293_v25 = vpop.f32.mrf.mxu0 }
 0x1d6   :  { %v3654_v30 = vadd.f32 %v3582_v17, %v1293_v25  ;;  %v1608_v9 = vpop.f32.mrf.mxu1  ;;  %v1989_v17 = vadd.f32 %v1988_v41, %v3565_v0  ;;  %v2125_v49 = vadd.f32 %v2124_v45, %v2062_v39 }
 0x1d7   :  { %v1295_v34 = vpop.f32.mrf.mxu0 }
 0x1d8   :  { %v2608_v47 = vpack.c.bf16 %v3654_v30, %v1580_v20  ;;  %v3670_v52 = vpop.f32.mrf.mxu1  ;;  %v1990_v43 = vadd.f32 %v1989_v17, %v3567_v2  ;;  %v2126_v56 = vadd.f32 %v2125_v49, %v2063_v61  ;;  %v2069_v23 = vmul.f32 %v3654_v30, %v3654_v30 }
 0x1d9   :  { %v1298_v53 = vpop.f32.mrf.mxu0 }
 0x1da   :  { %2660 = vst [vmem:[%s3722_s2 + $0xd0] sm:$0xff] %v2608_v47   ;;  %v1613_v38 = vpop.f32.mrf.mxu1  ;;  %v1991_v0 = vadd.f32 %v1990_v43, %v3576_v13  ;;  %v1588_v46 = vadd.f32 %v3596_v31, %v1298_v53  ;;  %v2127_v31 = vadd.f32 %v2126_v56, %v2064_v5 }
 0x1db   :  { %v1300_v59 = vpop.f32.mrf.mxu0 }
 0x1dc   :  { %v1614_v55 = vpop.f32.mrf.mxu1  ;;  %v1992_v2 = vadd.f32 %v1991_v0, %v3578_v14  ;;  %v2128_v16 = vadd.f32 %v2127_v31, %v2065_v60  ;;  %v2070_v33 = vmul.f32 %v1588_v46, %v1588_v46 }
 0x1dd   :  { %v1301_v44 = vpop.f32.mrf.mxu0 }
 0x1de   :  { %v1591_v40 = vadd.f32 %v3608_v42, %v1301_v44  ;;  %v1616_v1 = vpop.f32.mrf.mxu1  ;;  %v1993_v13 = vadd.f32 %v1992_v2, %v3602_v28  ;;  %v2066_v42 = vmul.f32 %v3627_v57, %v3627_v57 }
 0x1df   :  { %v1303_v54 = vpop.f32.mrf.mxu0 }
 0x1e0   :  { %v2613_v50 = vpack.c.bf16 %v1591_v40, %v1588_v46  ;;  %v1619_v6 = vpop.f32.mrf.mxu1  ;;  %v1994_v14 = vadd.f32 %v1993_v13, %v3604_v35  ;;  %v2129_v3 = vadd.f32 %v2128_v16, %v2066_v42  ;;  %v2071_v41 = vmul.f32 %v1591_v40, %v1591_v40 }
 0x1e1   :  { %v1306_v15 = vpop.f32.mrf.mxu0 }
 0x1e2   :  { %2661 = vst [vmem:[%s3722_s2 + $0xd8] sm:$0xff] %v2613_v50   ;;  %v1621_v18 = vpop.f32.mrf.mxu1  ;;  %v1995_v28 = vadd.f32 %v1994_v14, %v3627_v57  ;;  %v1596_v62 = vadd.f32 %v3621_v48, %v1306_v15  ;;  %v2130_v35 = vadd.f32 %v2129_v3, %v2067_v10 }
 0x1e3   :  { %v1308_v4 = vpop.f32.mrf.mxu0 }
 0x1e4   :  { %v1622_v27 = vpop.f32.mrf.mxu1  ;;  %v1996_v22 = vadd.f32 %v1995_v28, %v3629_v63  ;;  %v2131_v48 = vadd.f32 %v2130_v35, %v2068_v12  ;;  %v2072_v9 = vmul.f32 %v1596_v62, %v1596_v62 }
 0x1e5   :  { %v1309_v11 = vpop.f32.mrf.mxu0 }
 0x1e6   :  { %v1599_v7 = vadd.f32 %v3633_v8, %v1309_v11  ;;  %v1624_v26 = vpop.f32.mrf.mxu1  ;;  %v1997_v37 = vadd.f32 %v1996_v22, %v1580_v20  ;;  %v2132_v32 = vadd.f32 %v2131_v48, %v2069_v23 }
 0x1e7   :  { %v1311_v19 = vpop.f32.mrf.mxu0 }
 0x1e8   :  { %v2618_v24 = vpack.c.bf16 %v1599_v7, %v1596_v62  ;;  %v1998_v8 = vadd.f32 %v1997_v37, %v3654_v30  ;;  %v2133_v53 = vadd.f32 %v2132_v32, %v2070_v33  ;;  %v2073_v43 = vmul.f32 %v1599_v7, %v1599_v7 }
 0x1e9   :  { %v1314_v25 = vpop.f32.mrf.mxu0 }
 0x1ea   :  { %2662 = vst [vmem:[%s3722_s2 + $0xe0] sm:$0xff] %v2618_v24   ;;  %v1999_v63 = vadd.f32 %v1998_v8, %v1588_v46  ;;  %v1604_v47 = vadd.f32 %v3646_v21, %v1314_v25  ;;  %v2134_v39 = vadd.f32 %v2133_v53, %v2071_v41 }
 0x1eb   :  { %v1316_v57 = vpop.f32.mrf.mxu0 }
 0x1ec   :  { %v2000_v20 = vadd.f32 %v1999_v63, %v1591_v40  ;;  %v2135_v45 = vadd.f32 %v2134_v39, %v2072_v9  ;;  %v2074_v44 = vmul.f32 %v1604_v47, %v1604_v47 }
 0x1ed   :  { %v1317_v34 = vpop.f32.mrf.mxu0 }
 0x1ee   :  { %v1607_v58 = vadd.f32 %v3658_v29, %v1317_v34  ;;  %v2001_v59 = vadd.f32 %v2000_v20, %v1596_v62  ;;  %v2136_v38 = vadd.f32 %v2135_v45, %v2073_v43 }
 0x1ef   :  { %v1319_v51 = vpop.f32.mrf.mxu0 }
 0x1f0   :  { %v2623_v17 = vpack.c.bf16 %v1607_v58, %v1604_v47  ;;  %v2002_v61 = vadd.f32 %v2001_v59, %v1599_v7  ;;  %v2075_v46 = vmul.f32 %v1607_v58, %v1607_v58  ;;  %v2137_v5 = vadd.f32 %v2136_v38, %v2074_v44 }
 0x1f1   :  { %v1322_v36 = vpop.f32.mrf.mxu0 }
 0x1f2   :  { %2663 = vst [vmem:[%s3722_s2 + $0xe8] sm:$0xff] %v2623_v17   ;;  %v1612_v21 = vadd.f32 %v3670_v52, %v1322_v36  ;;  %v2003_v0 = vadd.f32 %v2002_v61, %v1604_v47  ;;  %v2138_v60 = vadd.f32 %v2137_v5, %v2075_v46 }
 0x1f3   :  { %v1324_v30 = vpop.f32.mrf.mxu0 }
 0x1f4   :  { %v2004_v54 = vadd.f32 %v2003_v0, %v1607_v58  ;;  %v2076_v2 = vmul.f32 %v1612_v21, %v1612_v21 }
 0x1f5   :  { %v1325_v29 = vpop.f32.mrf.mxu0 }
 0x1f6   :  { %v1615_v40 = vadd.f32 %v1614_v55, %v1325_v29  ;;  %v2005_v15 = vadd.f32 %v2004_v54, %v1612_v21  ;;  %v2139_v31 = vadd.f32 %v2138_v60, %v2076_v2 }
 0x1f7   :  { %v1327_v49 = vpop.f32.mrf.mxu0 }
 0x1f8   :  { %v2628_v50 = vpack.c.bf16 %v1615_v40, %v1612_v21  ;;  %v2077_v1 = vmul.f32 %v1615_v40, %v1615_v40  ;;  %v2006_v42 = vadd.f32 %v2005_v15, %v1615_v40 }
 0x1f9   :  { %v1330_v56 = vpop.f32.mrf.mxu0 }
 0x1fa   :  { %2664 = vst [vmem:[%s3722_s2 + $0xf0] sm:$0xff] %v2628_v50   ;;  %v1620_v13 = vadd.f32 %v1619_v6, %v1330_v56  ;;  %v2140_v55 = vadd.f32 %v2139_v31, %v2077_v1 }
 0x1fb   :  { %v1332_v52 = vpop.f32.mrf.mxu0 }
 0x1fc   :  { %v2078_v4 = vmul.f32 %v1620_v13, %v1620_v13  ;;  %v2007_v16 = vadd.f32 %v2006_v42, %v1620_v13 }
 0x1fd   :  { %v1333_v14 = vpop.f32.mrf.mxu0 }
 0x1fe   :  { %v1623_v10 = vadd.f32 %v1622_v27, %v1333_v14  ;;  %v2141_v18 = vadd.f32 %v2140_v55, %v2078_v4 }
 0x1ff   :  { %v1335_v11 = vpop.f32.mrf.mxu0 }
 0x200   :  { %v2633_v28 = vpack.c.bf16 %v1623_v10, %v1620_v13  ;;  %v2008_v62 = vadd.f32 %v2007_v16, %v1623_v10  ;;  %v2079_v7 = vmul.f32 %v1623_v10, %v1623_v10 }
 0x202   :  { %2665 = vst [vmem:[%s3722_s2 + $0xf8] sm:$0xff] %v2633_v28   ;;  %v2009_v3 = vrot.slane %v2008_v62, 4  ;;  %v2142_v12 = vadd.f32 %v2141_v18, %v2079_v7 }
 0x204   :  { %v2010_v6 = vadd.f32 %v2009_v3, %v2008_v62  ;;  %v2143_v19 = vrot.slane %v2142_v12, 4 }
 0x206   :  { %v2011_v22 = vrot.slane %v2010_v6, 2  ;;  %v2144_v24 = vadd.f32 %v2143_v19, %v2142_v12 }
 0x208   :  { %v2012_v35 = vadd.f32 %v2011_v22, %v2010_v6  ;;  %v2145_v23 = vrot.slane %v2144_v24, 2 }
 0x20a   :  { %v2013_v25 = vrot.slane %v2012_v35, 1  ;;  %v2146_v26 = vadd.f32 %v2145_v23, %v2144_v24 }
 0x20c   :  { %v2014_v27 = vadd.f32 %v2013_v25, %v2012_v35  ;;  %v2147_v37 = vrot.slane %v2146_v26, 1 }
 0x20e   :  { %2015 = vst [vmem:[%s3723_s3] sm:$0x1] %v2014_v27  ;;  %v2148_v48 = vadd.f32 %v2147_v37, %v2146_v26 }
 0x210   :  { %2149 = vst [vmem:[%s3724_s4] sm:$0x1] %v2148_v48 }

// kernel: discriminator_forward.7
= control target key start
LH: loop header
LB: loop body
LE: loop exit
PB: predicated region body
PF: predicated region fallthrough
CT: control target
= control target key end

     0   :  { %vm759_vm0 = vcmask 261120   ;;  %s2404_s1 = inlined_call_operand.vmem [shape: bf16[800,128], index: 1, kind: input, shape index: {}]   ;;  %s2405_s0 = inlined_call_operand.vmem [shape: bf16[128,800], index: 0, kind: input, shape index: {}]   ;;  %s2406_s2 = inlined_call_operand.vmem [shape: bf16[128,128], index: 2, kind: output, shape index: {0}]   ;;  %s2407_s3 = inlined_call_operand.vmem [shape: f32[1,1,128], index: 3, kind: output, shape index: {1}]   ;;  %s2408_s4 = inlined_call_operand.vmem [shape: f32[1,1,128], index: 4, kind: output, shape index: {2}]  }
   0x1   :  { %v1755_v0 = vld [vmem:[%s2404_s1 + $0x78] sm:$0xff]   ;;  %v1759_v4 = vld [vmem:[%s2404_s1 + $0x70] sm:$0xff]   ;;  %v1763_v8 = vld [vmem:[%s2404_s1 + $0x68] sm:$0xff]  }
   0x2   :  { %v1756_v1 = vld [vmem:[%s2404_s1 + $0xf8] sm:$0xff]   ;;  %1517 = vmatprep.subr.bf16.mxu0 %v1755_v0  ;;  %v1760_v5 = vld [vmem:[%s2404_s1 + $0xf0] sm:$0xff]   ;;  %v1764_v9 = vld [vmem:[%s2404_s1 + $0xe8] sm:$0xff]  }
   0x3   :  { %v1757_v2 = vld [vmem:[%s2404_s1 + $0x38] sm:$0xff]   ;;  %1581 = vmatprep.subr.bf16.mxu1 %v1756_v1  ;;  %v1761_v6 = vld [vmem:[%s2404_s1 + $0x30] sm:$0xff]   ;;  %v1765_v10 = vld [vmem:[%s2404_s1 + $0x28] sm:$0xff]  }
   0x4   :  { %v1758_v3 = vld [vmem:[%s2404_s1 + $0xb8] sm:$0xff]   ;;  %1518 = vmatpush3.bf16.msra.mxu0 %v1757_v2  ;;  %v1762_v7 = vld [vmem:[%s2404_s1 + $0xb0] sm:$0xff]   ;;  %v1766_v11 = vld [vmem:[%s2404_s1 + $0xa8] sm:$0xff]  }
   0x5   :  { %1582 = vmatpush3.bf16.msra.mxu1 %v1758_v3  ;;  %1519 = vmatprep.subr.bf16.mxu0 %v1759_v4  ;;  %v1767_v12 = vld [vmem:[%s2404_s1 + $0x60] sm:$0xff]   ;;  %v1771_v16 = vld [vmem:[%s2404_s1 + $0x58] sm:$0xff]   ;;  %v1775_v20 = vld [vmem:[%s2404_s1 + $0x50] sm:$0xff]  }
   0x6   :  { %1583 = vmatprep.subr.bf16.mxu1 %v1760_v5  ;;  %v1768_v13 = vld [vmem:[%s2404_s1 + $0xe0] sm:$0xff]   ;;  %v1772_v17 = vld [vmem:[%s2404_s1 + $0xd8] sm:$0xff]   ;;  %v1776_v21 = vld [vmem:[%s2404_s1 + $0xd0] sm:$0xff]  }
   0x7   :  { %v1769_v14 = vld [vmem:[%s2404_s1 + $0x20] sm:$0xff]   ;;  %v1773_v18 = vld [vmem:[%s2404_s1 + $0x18] sm:$0xff]   ;;  %v1777_v22 = vld [vmem:[%s2404_s1 + $0x10] sm:$0xff]  }
   0x8   :  { %1520 = vmatpush3.bf16.msra.mxu0 %v1761_v6  ;;  %v1770_v15 = vld [vmem:[%s2404_s1 + $0xa0] sm:$0xff]   ;;  %v1774_v19 = vld [vmem:[%s2404_s1 + $0x98] sm:$0xff]   ;;  %v1778_v23 = vld [vmem:[%s2404_s1 + $0x90] sm:$0xff]  }
   0x9   :  { %1584 = vmatpush3.bf16.msra.mxu1 %v1762_v7  ;;  %1521 = vmatprep.subr.bf16.mxu0 %v1763_v8  ;;  %v1779_v24 = vld [vmem:[%s2404_s1 + $0x48] sm:$0xff]   ;;  %v1783_v28 = vld [vmem:[%s2404_s1 + $0x40] sm:$0xff]   ;;  %v1793_v36 = vld [vmem:[%s2404_s1 + $0x178] sm:$0xff]  }
   0xa   :  { %1585 = vmatprep.subr.bf16.mxu1 %v1764_v9  ;;  %v1780_v25 = vld [vmem:[%s2404_s1 + $0xc8] sm:$0xff]   ;;  %v1784_v29 = vld [vmem:[%s2404_s1 + $0xc0] sm:$0xff]   ;;  %v1794_v37 = vld [vmem:[%s2404_s1 + $0x138] sm:$0xff]  }
   0xb   :  { %v1781_v26 = vld [vmem:[%s2404_s1 + $0x8] sm:$0xff]   ;;  %v1785_v30 = vld [vmem:[%s2404_s1] sm:$0xff]   ;;  %v1795_v38 = vld [vmem:[%s2405_s0 + $0x3c] ss:$28 sps:$4 sm:$0xff]  }
   0xc   :  { %1522 = vmatpush3.bf16.msra.mxu0 %v1765_v10  ;;  %v1782_v27 = vld [vmem:[%s2404_s1 + $0x88] sm:$0xff]   ;;  %v1786_v31 = vld [vmem:[%s2404_s1 + $0x80] sm:$0xff]   ;;  %v1799_v40 = vld [vmem:[%s2405_s0 + $0x38] ss:$28 sps:$4 sm:$0xff]  }
   0xd   :  { %1586 = vmatpush3.bf16.msra.mxu1 %v1766_v11  ;;  %1523 = vmatprep.subr.bf16.mxu0 %v1767_v12  ;;  %v1787_v32 = vld [vmem:[%s2405_s0] ss:$28 sps:$4 sm:$0xff]   ;;  %v1790_v34 = vld [vmem:[%s2405_s0 + $0x8] ss:$28 sps:$4 sm:$0xff]   ;;  %v1801_v42 = vld [vmem:[%s2404_s1 + $0x170] sm:$0xff]  }
   0xe   :  { %1587 = vmatprep.subr.bf16.mxu1 %v1768_v13  ;;  %v1789_v33 = vld [vmem:[%s2405_s0 + $0x4] ss:$28 sps:$4 sm:$0xff]   ;;  %v1792_v35 = vld [vmem:[%s2405_s0 + $0xc] ss:$28 sps:$4 sm:$0xff]   ;;  %v1802_v43 = vld [vmem:[%s2404_s1 + $0x130] sm:$0xff]  }
   0xf   :  { %816 = vmatprep.mubr.bf16.mxu0 %v1789_v33  ;;  %913 = vmatprep.mubr.bf16.mxu1 %v1792_v35  ;;  %v1797_v39 = vld [vmem:[%s2405_s0 + $0x44] ss:$28 sps:$4 sm:$0xff]   ;;  %v1803_v44 = vld [vmem:[%s2405_s0 + $0x74] ss:$28 sps:$4 sm:$0xff]   ;;  %v1805_v45 = vld [vmem:[%s2405_s0 + $0x7c] ss:$28 sps:$4 sm:$0xff]  }
  0x10   :  { %1524 = vmatpush3.bf16.msra.mxu0 %v1769_v14  ;;  %v1800_v41 = vld [vmem:[%s2405_s0 + $0x40] ss:$28 sps:$4 sm:$0xff]   ;;  %v1809_v46 = vld [vmem:[%s2404_s1 + $0x168] sm:$0xff]   ;;  %v1808_v49 = vld [vmem:[%s2405_s0 + $0x78] ss:$28 sps:$4 sm:$0xff]  }
  0x11   :  { %1588 = vmatpush3.bf16.msra.mxu1 %v1770_v15  ;;  %1525 = vmatprep.subr.bf16.mxu0 %v1771_v16  ;;  %v1810_v47 = vld [vmem:[%s2404_s1 + $0x128] sm:$0xff]   ;;  %v1813_v51 = vld [vmem:[%s2405_s0 + $0xb4] ss:$28 sps:$4 sm:$0xff]   ;;  %v1817_v52 = vld [vmem:[%s2404_s1 + $0x160] sm:$0xff]  }
  0x12   :  { %1589 = vmatprep.subr.bf16.mxu1 %v1772_v17  ;;  %v1807_v48 = vld [vmem:[%s2405_s0 + $0x70] ss:$28 sps:$4 sm:$0xff]   ;;  %v1818_v53 = vld [vmem:[%s2404_s1 + $0x120] sm:$0xff]   ;;  %v1825_v54 = vld [vmem:[%s2404_s1 + $0x158] sm:$0xff]  }
  0x13   :  { %v1811_v50 = vld [vmem:[%s2405_s0 + $0xac] ss:$28 sps:$4 sm:$0xff]   ;;  %v1826_v55 = vld [vmem:[%s2404_s1 + $0x118] sm:$0xff]   ;;  %v1819_v58 = vld [vmem:[%s2405_s0 + $0xe4] ss:$28 sps:$4 sm:$0xff]  }
  0x14   :  { %1526 = vmatpush3.bf16.msra.mxu0 %v1773_v18  ;;  %v1815_v56 = vld [vmem:[%s2405_s0 + $0xa8] ss:$28 sps:$4 sm:$0xff]   ;;  %v1816_v57 = vld [vmem:[%s2405_s0 + $0xb0] ss:$28 sps:$4 sm:$0xff]   ;;  %v1823_v62 = vld [vmem:[%s2405_s0 + $0xe0] ss:$28 sps:$4 sm:$0xff]  }
  0x15   :  { %1590 = vmatpush3.bf16.msra.mxu1 %v1774_v19  ;;  %1527 = vmatprep.subr.bf16.mxu0 %v1775_v20  ;;  %v1821_v59 = vld [vmem:[%s2405_s0 + $0xec] ss:$28 sps:$4 sm:$0xff]   ;;  %v1833_v60 = vld [vmem:[%s2404_s1 + $0x150] sm:$0xff]   ;;  %v1827_v2 = vld [vmem:[%s2405_s0 + $0x11c] ss:$28 sps:$4 sm:$0xff]  }
  0x16   :  { %1591 = vmatprep.subr.bf16.mxu1 %v1776_v21  ;;  %v1834_v61 = vld [vmem:[%s2404_s1 + $0x110] sm:$0xff]   ;;  %v1824_v63 = vld [vmem:[%s2405_s0 + $0xe8] ss:$28 sps:$4 sm:$0xff]   ;;  %v1832_v7 = vld [vmem:[%s2405_s0 + $0x120] ss:$28 sps:$4 sm:$0xff]  }
  0x17   :  { %v1841_v0 = vld [vmem:[%s2404_s1 + $0x148] sm:$0xff]   ;;  %v1829_v3 = vld [vmem:[%s2405_s0 + $0x124] ss:$28 sps:$4 sm:$0xff]   ;;  %v1831_v6 = vld [vmem:[%s2405_s0 + $0x118] ss:$28 sps:$4 sm:$0xff]  }
  0x18   :  { %1528 = vmatpush3.bf16.msra.mxu0 %v1777_v22  ;;  %v1842_v1 = vld [vmem:[%s2404_s1 + $0x108] sm:$0xff]   ;;  %v1849_v4 = vld [vmem:[%s2404_s1 + $0x140] sm:$0xff]   ;;  %v1835_v8 = vld [vmem:[%s2405_s0 + $0x154] ss:$28 sps:$4 sm:$0xff]  }
  0x19   :  { %1592 = vmatpush3.bf16.msra.mxu1 %v1778_v23  ;;  %1529 = vmatprep.subr.bf16.mxu0 %v1779_v24  ;;  %v1850_v5 = vld [vmem:[%s2404_s1 + $0x100] sm:$0xff]   ;;  %v1837_v9 = vld [vmem:[%s2405_s0 + $0x15c] ss:$28 sps:$4 sm:$0xff]   ;;  %v1863_v10 = vld [vmem:[%s2404_s1 + $0x188] sm:$0xff]  }
  0x1a   :  { %1593 = vmatprep.subr.bf16.mxu1 %v1780_v25  ;;  %v1839_v11 = vld [vmem:[%s2405_s0 + $0x150] ss:$28 sps:$4 sm:$0xff]   ;;  %v1840_v12 = vld [vmem:[%s2405_s0 + $0x158] ss:$28 sps:$4 sm:$0xff]   ;;  %v1847_v15 = vld [vmem:[%s2405_s0 + $0x188] ss:$28 sps:$4 sm:$0xff]  }
  0x1b   :  { %v1843_v13 = vld [vmem:[%s2405_s0 + $0x18c] ss:$28 sps:$4 sm:$0xff]   ;;  %v1845_v14 = vld [vmem:[%s2405_s0 + $0x194] ss:$28 sps:$4 sm:$0xff]   ;;  %v1856_v18 = vld [vmem:[%s2405_s0 + $0x164] ss:$28 sps:$4 sm:$0xff]  }
  0x1c   :  { %1530 = vmatpush3.bf16.msra.mxu0 %v1781_v26  ;;  %v1848_v16 = vld [vmem:[%s2405_s0 + $0x190] ss:$28 sps:$4 sm:$0xff]   ;;  %v1854_v20 = vld [vmem:[%s2405_s0 + $0x160] ss:$28 sps:$4 sm:$0xff]   ;;  %v1861_v24 = vld [vmem:[%s2405_s0 + $0x48] ss:$28 sps:$4 sm:$0xff]  }
  0x1d   :  { %1594 = vmatpush3.bf16.msra.mxu1 %v1782_v27  ;;  %1531 = vmatprep.subr.bf16.mxu0 %v1783_v28  ;;  %v1853_v17 = vld [vmem:[%s2405_s0 + $0x14] ss:$28 sps:$4 sm:$0xff]   ;;  %v1857_v21 = vld [vmem:[%s2405_s0 + $0x4c] ss:$28 sps:$4 sm:$0xff]   ;;  %v1859_v22 = vld [vmem:[%s2405_s0 + $0x19c] ss:$28 sps:$4 sm:$0xff]  }
  0x1e   :  { %1595 = vmatprep.subr.bf16.mxu1 %v1784_v29  ;;  %v1851_v19 = vld [vmem:[%s2405_s0 + $0x10] ss:$28 sps:$4 sm:$0xff]   ;;  %v1864_v23 = vld [vmem:[%s2404_s1 + $0x180] sm:$0xff]   ;;  %v1862_v25 = vld [vmem:[%s2405_s0 + $0x198] ss:$28 sps:$4 sm:$0xff]  }
  0x1f   :  { %v1865_v26 = vld [vmem:[%s2405_s0 + $0x84] ss:$28 sps:$4 sm:$0xff]   ;;  %v1867_v27 = vld [vmem:[%s2405_s0 + $0x18] ss:$28 sps:$4 sm:$0xff]   ;;  %v1869_v29 = vld [vmem:[%s2405_s0 + $0x50] ss:$28 sps:$4 sm:$0xff]  }
  0x20   :  { %1532 = vmatpush3.bf16.msra.mxu0 %v1785_v30  ;;  %v1868_v28 = vld [vmem:[%s2405_s0 + $0x80] ss:$28 sps:$4 sm:$0xff]   ;;  %v1877_v35 = vld [vmem:[%s2405_s0 + $0xf8] ss:$28 sps:$4 sm:$0xff]  }
  0x21   :  { %1596 = vmatpush3.bf16.msra.mxu1 %v1786_v31  ;;  %1645 = vmatprep.subr.bf16.mxu0 %v1793_v36  ;;  %v1870_v30 = vld [vmem:[%s2405_s0 + $0xbc] ss:$28 sps:$4 sm:$0xff]   ;;  %v1872_v31 = vld [vmem:[%s2405_s0 + $0x88] ss:$28 sps:$4 sm:$0xff]  }
  0x22   :  { %1739 = vmatprep.subr.bf16.mxu1 %v1793_v36  ;;  %v1874_v33 = vld [vmem:[%s2405_s0 + $0xc0] ss:$28 sps:$4 sm:$0xff]   ;;  %v1878_v36 = vld [vmem:[%s2405_s0 + $0xf0] ss:$28 sps:$4 sm:$0xff]  }
  0x23   :  { %817 = vmatmul.mubr.bf16.vlgmr.msra.gmra.mxu0 %v1787_v32  ;;  %v1873_v32 = vld [vmem:[%s2405_s0 + $0xb8] ss:$28 sps:$4 sm:$0xff]  }
  0x24   :  { %914 = vmatmul.mubr.bf16.vlgmr.msra.gmra.mxu1 %v1790_v34  ;;  %1646 = vmatpush3.bf16.msra.mxu0 %v1794_v37  ;;  %v1875_v34 = vld [vmem:[%s2405_s0 + $0xf4] ss:$28 sps:$4 sm:$0xff]  }
  0x25   :  { %824 = vmatprep.mubr.bf16.mxu0 %v1795_v38  ;;  %1747 = vmatpush3.bf16.msra.mxu1 %v1794_v37  ;;  %v1879_v37 = vld [vmem:[%s2405_s0 + $0x130] ss:$28 sps:$4 sm:$0xff]  }
  0x26   :  { %921 = vmatprep.mubr.bf16.mxu1 %v1797_v39  ;;  %1647 = vmatprep.subr.bf16.mxu0 %v1801_v42  ;;  %v1880_v38 = vld [vmem:[%s2405_s0 + $0x12c] ss:$28 sps:$4 sm:$0xff]  }
  0x27   :  { %1740 = vmatprep.subr.bf16.mxu1 %v1801_v42  ;;  %v1882_v39 = vld [vmem:[%s2405_s0 + $0x168] ss:$28 sps:$4 sm:$0xff]  }
  0x28   :  { %1648 = vmatpush3.bf16.msra.mxu0 %v1802_v43 }
  0x29   :  { %1748 = vmatpush3.bf16.msra.mxu1 %v1802_v43  ;;  %1649 = vmatprep.subr.bf16.mxu0 %v1809_v46 }
  0x2a   :  { %1741 = vmatprep.subr.bf16.mxu1 %v1809_v46 }
  0x2b   :  { %825 = vmatmul.mubr.bf16.gmra.mxu0 %v1799_v40  ;;  %v1883_v40 = vld [vmem:[%s2405_s0 + $0x128] ss:$28 sps:$4 sm:$0xff]  }
  0x2c   :  { %922 = vmatmul.mubr.bf16.gmra.mxu1 %v1800_v41  ;;  %832 = vmatprep.mubr.bf16.mxu0 %v1803_v44  ;;  %v1884_v41 = vld [vmem:[%s2405_s0 + $0x1a0] ss:$28 sps:$4 sm:$0xff]  }
  0x2d   :  { %929 = vmatprep.mubr.bf16.mxu1 %v1805_v45  ;;  %1650 = vmatpush3.bf16.msra.mxu0 %v1810_v47 }
  0x2e   :  { %1749 = vmatpush3.bf16.msra.mxu1 %v1810_v47  ;;  %1651 = vmatprep.subr.bf16.mxu0 %v1817_v52 }
  0x2f   :  { %1742 = vmatprep.subr.bf16.mxu1 %v1817_v52 }
  0x31   :  { %1652 = vmatpush3.bf16.msra.mxu0 %v1818_v53 }
  0x32   :  { %1750 = vmatpush3.bf16.msra.mxu1 %v1818_v53  ;;  %1653 = vmatprep.subr.bf16.mxu0 %v1825_v54 }
  0x33   :  { %833 = vmatmul.mubr.bf16.gmra.mxu0 %v1807_v48  ;;  %1743 = vmatprep.subr.bf16.mxu1 %v1825_v54 }
  0x34   :  { %930 = vmatmul.mubr.bf16.gmra.mxu1 %v1808_v49  ;;  %840 = vmatprep.mubr.bf16.mxu0 %v1811_v50 }
  0x35   :  { %937 = vmatprep.mubr.bf16.mxu1 %v1813_v51  ;;  %1654 = vmatpush3.bf16.msra.mxu0 %v1826_v55 }
  0x36   :  { %1751 = vmatpush3.bf16.msra.mxu1 %v1826_v55  ;;  %1655 = vmatprep.subr.bf16.mxu0 %v1833_v60 }
  0x37   :  { %1744 = vmatprep.subr.bf16.mxu1 %v1833_v60 }
  0x39   :  { %1656 = vmatpush3.bf16.msra.mxu0 %v1834_v61 }
  0x3a   :  { %1752 = vmatpush3.bf16.msra.mxu1 %v1834_v61  ;;  %1657 = vmatprep.subr.bf16.mxu0 %v1841_v0 }
  0x3b   :  { %841 = vmatmul.mubr.bf16.gmra.mxu0 %v1815_v56  ;;  %1745 = vmatprep.subr.bf16.mxu1 %v1841_v0 }
  0x3c   :  { %938 = vmatmul.mubr.bf16.gmra.mxu1 %v1816_v57  ;;  %848 = vmatprep.mubr.bf16.mxu0 %v1819_v58 }
  0x3d   :  { %945 = vmatprep.mubr.bf16.mxu1 %v1821_v59  ;;  %1658 = vmatpush3.bf16.msra.mxu0 %v1842_v1 }
  0x3e   :  { %1753 = vmatpush3.bf16.msra.mxu1 %v1842_v1  ;;  %1659 = vmatprep.subr.bf16.mxu0 %v1849_v4 }
  0x3f   :  { %1746 = vmatprep.subr.bf16.mxu1 %v1849_v4 }
  0x41   :  { %1660 = vmatpush3.bf16.msra.mxu0 %v1850_v5 }
  0x42   :  { %1754 = vmatpush3.bf16.msra.mxu1 %v1850_v5 }
  0x43   :  { %849 = vmatmul.mubr.bf16.gmra.mxu0 %v1823_v62  ;;  %1719 = vmatprep.subr.bf16.mxu1 %v1863_v10 }
  0x44   :  { %946 = vmatmul.mubr.bf16.gmra.mxu1 %v1824_v63  ;;  %856 = vmatprep.mubr.bf16.mxu0 %v1827_v2 }
  0x45   :  { %953 = vmatprep.mubr.bf16.mxu1 %v1829_v3 }
  0x4b   :  { %857 = vmatmul.mubr.bf16.gmra.mxu0 %v1831_v6 }
  0x4c   :  { %954 = vmatmul.mubr.bf16.gmra.mxu1 %v1832_v7  ;;  %864 = vmatprep.mubr.bf16.mxu0 %v1835_v8 }
  0x4d   :  { %961 = vmatprep.mubr.bf16.mxu1 %v1837_v9 }
  0x53   :  { %865 = vmatmul.mubr.bf16.gmra.mxu0 %v1839_v11 }
  0x54   :  { %962 = vmatmul.mubr.bf16.gmra.mxu1 %v1840_v12  ;;  %872 = vmatprep.mubr.bf16.mxu0 %v1843_v13 }
  0x55   :  { %969 = vmatprep.mubr.bf16.mxu1 %v1845_v14 }
  0x5b   :  { %873 = vmatmul.mubr.bf16.gmra.mxu0 %v1847_v15 }
  0x5c   :  { %970 = vmatmul.mubr.bf16.gmra.mxu1 %v1848_v16  ;;  %1010 = vmatprep.mubr.bf16.mxu0 %v1853_v17 }
  0x5d   :  { %1058 = vmatprep.mubr.bf16.mxu1 %v1856_v18 }
  0x63   :  { %1011 = vmatmul.mubr.bf16.vlgmr.msra.gmra.mxu0 %v1851_v19 }
  0x64   :  { %1059 = vmatmul.mubr.bf16.vlgmr.msra.gmra.mxu1 %v1854_v20  ;;  %1018 = vmatprep.mubr.bf16.mxu0 %v1857_v21 }
  0x65   :  { %1066 = vmatprep.mubr.bf16.mxu1 %v1859_v22  ;;  %1720 = vmatpush3.bf16.msra.mxu1 %v1863_v10 }
  0x66   :  { %1721 = vmatprep.subr.bf16.mxu1 %v1864_v23 }
  0x69   :  { %1722 = vmatpush3.bf16.msra.mxu1 %v1864_v23 }
  0x6b   :  { %1019 = vmatmul.mubr.bf16.gmra.mxu0 %v1861_v24 }
  0x6c   :  { %1067 = vmatmul.mubr.bf16.gmra.mxu1 %v1862_v25  ;;  %1026 = vmatprep.mubr.bf16.mxu0 %v1865_v26 }
  0x6d   :  { %1723 = vmatprep.mubr.msk.bf16.mxu1 %vm759_vm0, %v1867_v27 }
  0x73   :  { %1027 = vmatmul.mubr.bf16.gmra.mxu0 %v1868_v28 }
  0x74   :  { %1724 = vmatmul.mubr.msk.bf16.vlgmr.msra.gmra.mxu1 %vm759_vm0, %v1869_v29  ;;  %1034 = vmatprep.mubr.bf16.mxu0 %v1870_v30 }
  0x75   :  { %1727 = vmatprep.mubr.msk.bf16.mxu1 %vm759_vm0, %v1872_v31 }
  0x7b   :  { %1035 = vmatmul.mubr.bf16.gmra.mxu0 %v1873_v32 }
  0x7c   :  { %1728 = vmatmul.mubr.msk.bf16.gmra.mxu1 %vm759_vm0, %v1874_v33  ;;  %1042 = vmatprep.mubr.bf16.mxu0 %v1875_v34 }
  0x7d   :  { %1731 = vmatprep.mubr.msk.bf16.mxu1 %vm759_vm0, %v1877_v35 }
  0x83   :  { %1043 = vmatmul.mubr.bf16.gmra.mxu0 %v1878_v36 }
  0x84   :  { %1732 = vmatmul.mubr.msk.bf16.gmra.mxu1 %vm759_vm0, %v1879_v37  ;;  %1050 = vmatprep.mubr.bf16.mxu0 %v1880_v38 }
  0x85   :  { %1735 = vmatprep.mubr.msk.bf16.mxu1 %vm759_vm0, %v1882_v39 }
  0x8b   :  { %1051 = vmatmul.mubr.bf16.gmra.mxu0 %v1883_v40 }
  0x8c   :  { %1736 = vmatmul.mubr.msk.bf16.gmra.mxu1 %vm759_vm0, %v1884_v41 }
  0xe3   :  { %v1533_v42 = vpop.f32.mrf.mxu0 }
  0xe4   :  { %v1597_v43 = vpop.f32.mrf.mxu1 }
  0xe5   :  { %v1534_v44 = vpop.f32.mrf.mxu0 }
  0xe6   :  { %v1535_v45 = vadd.f32 %v1534_v44, %v1533_v42  ;;  %v1598_v46 = vpop.f32.mrf.mxu1 }
  0xe7   :  { %v1599_v47 = vadd.f32 %v1598_v46, %v1597_v43  ;;  %v1536_v48 = vpop.f32.mrf.mxu0 }
  0xe8   :  { %v1600_v49 = vpop.f32.mrf.mxu1 }
  0xe9   :  { %v2236_v50 = vadd.f32 %v1599_v47, %v1535_v45  ;;  %v1537_v51 = vpop.f32.mrf.mxu0 }
  0xea   :  { %v1538_v52 = vadd.f32 %v1537_v51, %v1536_v48  ;;  %v1601_v53 = vpop.f32.mrf.mxu1 }
  0xeb   :  { %v1602_v54 = vadd.f32 %v1601_v53, %v1600_v49  ;;  %v1539_v55 = vpop.f32.mrf.mxu0 }
  0xec   :  { %v1603_v56 = vpop.f32.mrf.mxu1 }
  0xed   :  { %v2238_v57 = vadd.f32 %v1602_v54, %v1538_v52  ;;  %v1540_v58 = vpop.f32.mrf.mxu0 }
  0xee   :  { %v1541_v59 = vadd.f32 %v1540_v58, %v1539_v55  ;;  %v1604_v60 = vpop.f32.mrf.mxu1 }
  0xef   :  { %v1605_v61 = vadd.f32 %v1604_v60, %v1603_v56  ;;  %v1542_v62 = vpop.f32.mrf.mxu0 }
  0xf0   :  { %v1606_v63 = vpop.f32.mrf.mxu1 }
  0xf1   :  { %v2240_v0 = vadd.f32 %v1605_v61, %v1541_v59  ;;  %v1543_v1 = vpop.f32.mrf.mxu0 }
  0xf2   :  { %v1544_v2 = vadd.f32 %v1543_v1, %v1542_v62  ;;  %v1607_v3 = vpop.f32.mrf.mxu1 }
  0xf3   :  { %v1608_v4 = vadd.f32 %v1607_v3, %v1606_v63  ;;  %v1545_v5 = vpop.f32.mrf.mxu0 }
  0xf4   :  { %v1609_v6 = vpop.f32.mrf.mxu1 }
  0xf5   :  { %v2242_v7 = vadd.f32 %v1608_v4, %v1544_v2  ;;  %v1546_v8 = vpop.f32.mrf.mxu0 }
  0xf6   :  { %v1547_v9 = vadd.f32 %v1546_v8, %v1545_v5  ;;  %v1610_v10 = vpop.f32.mrf.mxu1 }
  0xf7   :  { %v1611_v11 = vadd.f32 %v1610_v10, %v1609_v6  ;;  %v1548_v12 = vpop.f32.mrf.mxu0 }
  0xf8   :  { %v1612_v13 = vpop.f32.mrf.mxu1 }
  0xf9   :  { %v2244_v14 = vadd.f32 %v1611_v11, %v1547_v9  ;;  %v1549_v15 = vpop.f32.mrf.mxu0 }
  0xfa   :  { %v1550_v16 = vadd.f32 %v1549_v15, %v1548_v12  ;;  %v1613_v17 = vpop.f32.mrf.mxu1 }
  0xfb   :  { %v1614_v18 = vadd.f32 %v1613_v17, %v1612_v13  ;;  %v1551_v19 = vpop.f32.mrf.mxu0 }
  0xfc   :  { %v1615_v20 = vpop.f32.mrf.mxu1 }
  0xfd   :  { %v2246_v21 = vadd.f32 %v1614_v18, %v1550_v16  ;;  %v1552_v22 = vpop.f32.mrf.mxu0 }
  0xfe   :  { %v1553_v23 = vadd.f32 %v1552_v22, %v1551_v19  ;;  %v1616_v24 = vpop.f32.mrf.mxu1 }
  0xff   :  { %v1617_v25 = vadd.f32 %v1616_v24, %v1615_v20  ;;  %v2248_v26 = vpop.f32.mrf.mxu0 }
 0x100   :  { %v2250_v27 = vpop.f32.mrf.mxu1 }
 0x101   :  { %v2252_v28 = vadd.f32 %v1617_v25, %v1553_v23  ;;  %v2254_v29 = vpop.f32.mrf.mxu0 }
 0x102   :  { %v2256_v30 = vpop.f32.mrf.mxu1 }
 0x103   :  { %v1557_v31 = vpop.f32.mrf.mxu0 }
 0x104   :  { %v1621_v32 = vpop.f32.mrf.mxu1 }
 0x105   :  { %v1558_v33 = vpop.f32.mrf.mxu0 }
 0x106   :  { %v1559_v34 = vadd.f32 %v1558_v33, %v1557_v31  ;;  %v1622_v35 = vpop.f32.mrf.mxu1 }
 0x107   :  { %v1623_v36 = vadd.f32 %v1622_v35, %v1621_v32  ;;  %v2258_v37 = vpop.f32.mrf.mxu0 }
 0x108   :  { %v2260_v38 = vpop.f32.mrf.mxu1 }
 0x109   :  { %v2262_v39 = vadd.f32 %v1623_v36, %v1559_v34  ;;  %v2264_v40 = vpop.f32.mrf.mxu0 }
 0x10a   :  { %v2266_v41 = vpop.f32.mrf.mxu1 }
 0x10b   :  { %v1563_v42 = vpop.f32.mrf.mxu0 }
 0x10c   :  { %v1627_v43 = vpop.f32.mrf.mxu1 }
 0x10d   :  { %v1564_v44 = vpop.f32.mrf.mxu0 }
 0x10e   :  { %v1565_v45 = vadd.f32 %v1564_v44, %v1563_v42  ;;  %v1628_v46 = vpop.f32.mrf.mxu1 }
 0x10f   :  { %v1629_v47 = vadd.f32 %v1628_v46, %v1627_v43  ;;  %v2268_v48 = vpop.f32.mrf.mxu0 }
 0x110   :  { %v2270_v49 = vpop.f32.mrf.mxu1 }
 0x111   :  { %2409 = vst [vmem:[#allocation2_spill] sm:$0xff] %v2270_v49  ;;  %v2272_v51 = vadd.f32 %v1629_v47, %v1565_v45  ;;  %v2274_v52 = vpop.f32.mrf.mxu0 }
 0x112   :  { %v2276_v53 = vpop.f32.mrf.mxu1 }
 0x113   :  { %2410 = vst [vmem:[#allocation3_spill] sm:$0xff] %v2272_v51  ;;  %2411 = vst [vmem:[#allocation4_spill] sm:$0xff] %v2276_v53  ;;  %v2278_v54 = vpop.f32.mrf.mxu0 }
 0x114   :  { %v2280_v55 = vpop.f32.mrf.mxu1 }
 0x115   :  { %v2282_v56 = vpop.f32.mrf.mxu0 }
 0x116   :  { %v2284_v58 = vpop.f32.mrf.mxu1 }
 0x117   :  { %v2286_v59 = vpop.f32.mrf.mxu0 }
 0x118   :  { %v2288_v60 = vpop.f32.mrf.mxu1 }
 0x119   :  { %v2290_v61 = vpop.f32.mrf.mxu0 }
 0x11a   :  { %v2292_v62 = vpop.f32.mrf.mxu1 }
 0x11b   :  { %v2294_v63 = vpop.f32.mrf.mxu0 }
 0x11c   :  { %v2296_v1 = vpop.f32.mrf.mxu1 }
 0x11d   :  { %v2298_v2 = vpop.f32.mrf.mxu0 }
 0x11e   :  { %v2300_v3 = vpop.f32.mrf.mxu1 }
 0x11f   :  { %v2302_v4 = vpop.f32.mrf.mxu0 }
 0x120   :  { %v2304_v5 = vpop.f32.mrf.mxu1 }
 0x121   :  { %v2306_v6 = vpop.f32.mrf.mxu0 }
 0x122   :  { %v2308_v8 = vpop.f32.mrf.mxu1 }
 0x123   :  { %v1661_v9 = vpop.f32.mrf.mxu0 }
 0x124   :  { %v2310_v10 = vpop.f32.mrf.mxu1 }
 0x125   :  { %v1662_v11 = vpop.f32.mrf.mxu0 }
 0x126   :  { %v2312_v12 = vpop.f32.mrf.mxu1  ;;  %v1663_v31 = vadd.f32 %v1662_v11, %v1661_v9 }
 0x127   :  { %v1664_v13 = vpop.f32.mrf.mxu0 }
 0x128   :  { %v2314_v15 = vpop.f32.mrf.mxu1  ;;  %v1013_v44 = vadd.f32 %v1663_v31, %v2236_v50  ;;  %v1556_v50 = vadd.f32 %v2254_v29, %v2248_v26 }
 0x129   :  { %2412 = vst [vmem:[#allocation5_spill] sm:$0xff] %v2314_v15  ;;  %v1665_v16 = vpop.f32.mrf.mxu0 }
 0x12a   :  { %v2316_v17 = vpop.f32.mrf.mxu1  ;;  %v1666_v42 = vadd.f32 %v1665_v16, %v1664_v13 }
 0x12b   :  { %2413 = vst [vmem:[#allocation6_spill] sm:$0xff] %v2316_v17  ;;  %v1667_v18 = vpop.f32.mrf.mxu0 }
 0x12c   :  { %v2318_v19 = vpop.f32.mrf.mxu1 }
 0x12d   :  { %v1668_v20 = vpop.f32.mrf.mxu0 }
 0x12e   :  { %v2320_v22 = vpop.f32.mrf.mxu1  ;;  %v1669_v33 = vadd.f32 %v1668_v20, %v1667_v18  ;;  %v1016_v18 = vadd.f32 %v1666_v42, %v2238_v57 }
 0x12f   :  { %v1670_v23 = vpop.f32.mrf.mxu0 }
 0x130   :  { %v2322_v24 = vpop.f32.mrf.mxu1  ;;  %v1021_v46 = vadd.f32 %v1669_v33, %v2240_v0  ;;  %v1620_v0 = vadd.f32 %v2256_v30, %v2250_v27 }
 0x131   :  { %v1671_v25 = vpop.f32.mrf.mxu0 }
 0x132   :  { %v2324_v32 = vpop.f32.mrf.mxu1  ;;  %v1672_v34 = vadd.f32 %v1671_v25, %v1670_v23  ;;  %v943_v30 = vadd.f32 %v1620_v0, %v1556_v50 }
 0x133   :  { %v1673_v35 = vpop.f32.mrf.mxu0 }
 0x134   :  { %v1725_v36 = vpop.f32.mrf.mxu1  ;;  %v1024_v51 = vadd.f32 %v1672_v34, %v2242_v7 }
 0x135   :  { %v1674_v43 = vpop.f32.mrf.mxu0  ;;  %v1118_v9 = vadd.f32 %v1725_v36, %v1021_v46 }
 0x136   :  { %v1109_v45 = vpop.f32.mrf.mxu1  ;;  %v1675_v53 = vadd.f32 %v1674_v43, %v1673_v35 }
 0x137   :  { %v1676_v47 = vpop.f32.mrf.mxu0  ;;  %v1110_v49 = vadd.f32 %v1109_v45, %v1013_v44  ;;  %v1276_v42 = vmul.f32 %v1118_v9, %v1118_v9 }
 0x138   :  { %v1726_v17 = vpop.f32.mrf.mxu1  ;;  %v1029_v31 = vadd.f32 %v1675_v53, %v2244_v14 }
 0x139   :  { %v1121_v11 = vadd.f32 %v1726_v17, %v1024_v51  ;;  %v1677_v15 = vpop.f32.mrf.mxu0  ;;  %v1274_v25 = vmul.f32 %v1110_v49, %v1110_v49 }
 0x13a   :  { %v1112_v20 = vpop.f32.mrf.mxu1  ;;  %v1678_v51 = vadd.f32 %v1677_v15, %v1676_v47  ;;  %v1562_v47 = vadd.f32 %v2264_v40, %v2258_v37 }
 0x13b   :  { %v1478_v23 = vpack.c.bf16 %v1121_v11, %v1118_v9  ;;  %v1113_v13 = vadd.f32 %v1112_v20, %v1016_v18  ;;  %v1679_v16 = vpop.f32.mrf.mxu0  ;;  %v1277_v15 = vmul.f32 %v1121_v11, %v1121_v11  ;;  %v1626_v18 = vadd.f32 %v2266_v41, %v2260_v38 }
 0x13c   :  { %v1729_v7 = vpop.f32.mrf.mxu1  ;;  %v1032_v46 = vadd.f32 %v1678_v51, %v2246_v21  ;;  %v1571_v38 = vadd.f32 %v2282_v56, %v2278_v54 }
 0x13d   :  { %1510 = vst [vmem:[%s2406_s2 + $0x8] sm:$0xff] %v1478_v23   ;;  %v1473_v57 = vpack.c.bf16 %v1113_v13, %v1110_v49  ;;  %v1252_v17 = vadd.f32 %v1113_v13, %v1110_v49  ;;  %v1275_v33 = vmul.f32 %v1113_v13, %v1113_v13  ;;  %v1680_v34 = vpop.f32.mrf.mxu0  ;;  %v951_v37 = vadd.f32 %v1626_v18, %v1562_v47  ;;  %v2415_v47 = vld [vmem:[#allocation6_spill] sm:$0xff] }
 0x13e   :  { %v1681_v35 = vadd.f32 %v1680_v34, %v1679_v16  ;;  %v1125_v36 = vpop.f32.mrf.mxu1  ;;  %v2416_v18 = vld [vmem:[#allocation2_spill] sm:$0xff] }
 0x13f   :  { %1474 = vst [vmem:[%s2406_s2] sm:$0xff] %v1473_v57   ;;  %v1253_v26 = vadd.f32 %v1252_v17, %v1118_v9  ;;  %v1290_v27 = vadd.f32 %v1275_v33, %v1274_v25  ;;  %v1126_v29 = vadd.f32 %v1125_v36, %v1029_v31  ;;  %v1682_v14 = vpop.f32.mrf.mxu0 }
 0x140   :  { %v1037_v53 = vadd.f32 %v1681_v35, %v2252_v28  ;;  %v1730_v43 = vpop.f32.mrf.mxu1 }
 0x141   :  { %v1291_v44 = vadd.f32 %v1290_v27, %v1276_v42  ;;  %v1254_v49 = vadd.f32 %v1253_v26, %v1121_v11  ;;  %v1683_v45 = vpop.f32.mrf.mxu0  ;;  %v1278_v9 = vmul.f32 %v1126_v29, %v1126_v29  ;;  %v1641_v26 = vadd.f32 %v2300_v3, %v2296_v1 }
 0x142   :  { %v1684_v20 = vadd.f32 %v1683_v45, %v1682_v14  ;;  %v1128_v23 = vpop.f32.mrf.mxu1  ;;  %v1134_v13 = vadd.f32 %v1729_v7, %v1037_v53  ;;  %v1577_v7 = vadd.f32 %v2298_v2, %v2294_v63  ;;  %v1580_v14 = vadd.f32 %v2306_v6, %v2302_v4 }
 0x143   :  { %v1255_v16 = vadd.f32 %v1254_v49, %v1126_v29  ;;  %v1292_v50 = vadd.f32 %v1291_v44, %v1277_v15  ;;  %v1129_v28 = vadd.f32 %v1128_v23, %v1032_v46  ;;  %v1685_v0 = vpop.f32.mrf.mxu0  ;;  %v1644_v63 = vadd.f32 %v2308_v8, %v2304_v5 }
 0x144   :  { %v1040_v25 = vadd.f32 %v1684_v20, %v943_v30  ;;  %v2347_v31 = vpop.f32.mrf.mxu1  ;;  %v1280_v34 = vmul.f32 %v1134_v13, %v1134_v13  ;;  %v1574_v1 = vadd.f32 %v2290_v61, %v2286_v59  ;;  %v1638_v4 = vadd.f32 %v2292_v62, %v2288_v60  ;;  %v2414_v62 = vld [vmem:[#allocation5_spill] sm:$0xff] }
 0x145   :  { %v1293_v11 = vadd.f32 %v1292_v50, %v1278_v9  ;;  %v1483_v57 = vpack.c.bf16 %v1129_v28, %v1126_v29  ;;  %v1256_v21 = vadd.f32 %v1255_v16, %v1129_v28  ;;  %v1279_v51 = vmul.f32 %v1129_v28, %v1129_v28  ;;  %v1686_v17 = vpop.f32.mrf.mxu0 }
 0x146   :  { %v1137_v40 = vadd.f32 %v1730_v43, %v1040_v25  ;;  %v1687_v41 = vadd.f32 %v1686_v17, %v1685_v0  ;;  %v1141_v33 = vpop.f32.mrf.mxu1  ;;  %v1635_v43 = vadd.f32 %v2284_v58, %v2280_v55  ;;  %v1705_v5 = vadd.f32 %v2320_v22, %v2318_v19 }
 0x147   :  { %1511 = vst [vmem:[%s2406_s2 + $0x10] sm:$0xff] %v1483_v57   ;;  %v1257_v35 = vadd.f32 %v1256_v21, %v1134_v13  ;;  %v1294_v36 = vadd.f32 %v1293_v11, %v1279_v51  ;;  %v1688_v42 = vpop.f32.mrf.mxu0  ;;  %v1708_v6 = vadd.f32 %v2324_v32, %v2322_v24  ;;  %v1568_v59 = vadd.f32 %v2274_v52, %v2268_v48  ;;  %v2417_v24 = vld [vmem:[#allocation4_spill] sm:$0xff] }
 0x148   :  { %v1488_v27 = vpack.c.bf16 %v1137_v40, %v1134_v13  ;;  %v1281_v29 = vmul.f32 %v1137_v40, %v1137_v40  ;;  %v1045_v54 = vadd.f32 %v1687_v41, %v2262_v39  ;;  %v1734_v56 = vpop.f32.mrf.mxu1  ;;  %v972_v45 = vadd.f32 %v1641_v26, %v1577_v7 }
 0x149   :  { %v1295_v2 = vadd.f32 %v1294_v36, %v1280_v34  ;;  %v1258_v30 = vadd.f32 %v1257_v35, %v1137_v40  ;;  %v1689_v53 = vpop.f32.mrf.mxu0  ;;  %v975_v46 = vadd.f32 %v1644_v63, %v1580_v14  ;;  %v1699_v60 = vadd.f32 %v2312_v12, %v2310_v10  ;;  %v2418_v10 = vld [vmem:[#allocation3_spill] sm:$0xff] }
 0x14a   :  { %1512 = vst [vmem:[%s2406_s2 + $0x18] sm:$0xff] %v1488_v27   ;;  %v1142_v39 = vadd.f32 %v1141_v33, %v1045_v54  ;;  %v1690_v3 = vadd.f32 %v1689_v53, %v1688_v42  ;;  %v1144_v15 = vpop.f32.mrf.mxu1  ;;  %v1702_v19 = vadd.f32 %v2415_v47, %v2414_v62  ;;  %v1632_v32 = vadd.f32 %v2417_v24, %v2416_v18 }
 0x14b   :  { %v1296_v55 = vadd.f32 %v1295_v2, %v1281_v29  ;;  %v1691_v58 = vpop.f32.mrf.mxu0  ;;  %v964_v52 = vadd.f32 %v1635_v43, %v1571_v38  ;;  %v967_v13 = vadd.f32 %v1638_v4, %v1574_v1  ;;  %v1069_v16 = vadd.f32 %v1705_v5, %v972_v45 }
 0x14c   :  { %v1259_v61 = vadd.f32 %v1258_v30, %v1142_v39  ;;  %v1282_v8 = vmul.f32 %v1142_v39, %v1142_v39  ;;  %v1048_v44 = vadd.f32 %v1690_v3, %v951_v37  ;;  %v1737_v49 = vpop.f32.mrf.mxu1  ;;  %v1072_v28 = vadd.f32 %v1708_v6, %v975_v46 }
 0x14d   :  { %v1692_v22 = vpop.f32.mrf.mxu0  ;;  %v1166_v21 = vadd.f32 %v1737_v49, %v1069_v16  ;;  %v1061_v51 = vadd.f32 %v1699_v60, %v964_v52  ;;  %v1064_v40 = vadd.f32 %v1702_v19, %v967_v13  ;;  %v959_v41 = vadd.f32 %v1632_v32, %v1568_v59 }
 0x14e   :  { %v1297_v9 = vadd.f32 %v1296_v55, %v1282_v8  ;;  %v1145_v20 = vadd.f32 %v1144_v15, %v1048_v44  ;;  %v1693_v23 = vadd.f32 %v1692_v22, %v1691_v58  ;;  %v1157_v48 = vpop.f32.mrf.mxu1 }
 0x14f   :  { %v1694_v50 = vpop.f32.mrf.mxu0  ;;  %v1158_v35 = vadd.f32 %v1157_v48, %v1061_v51  ;;  %v1288_v4 = vmul.f32 %v1166_v21, %v1166_v21 }
 0x150   :  { %v1493_v0 = vpack.c.bf16 %v1145_v20, %v1142_v39  ;;  %v1260_v25 = vadd.f32 %v1259_v61, %v1145_v20  ;;  %v1283_v11 = vmul.f32 %v1145_v20, %v1145_v20  ;;  %v1053_v12 = vadd.f32 %v1693_v23, %v2418_v10  ;;  %v1738_v57 = vpop.f32.mrf.mxu1 }
 0x151   :  { %v1169_v17 = vadd.f32 %v1738_v57, %v1072_v28  ;;  %v1695_v37 = vpop.f32.mrf.mxu0  ;;  %v1286_v53 = vmul.f32 %v1158_v35, %v1158_v35 }
 0x152   :  { %1513 = vst [vmem:[%s2406_s2 + $0x20] sm:$0xff] %v1493_v0   ;;  %v1298_v38 = vadd.f32 %v1297_v9, %v1283_v11  ;;  %v1150_v33 = vadd.f32 %v2347_v31, %v1053_v12  ;;  %v1696_v7 = vadd.f32 %v1695_v37, %v1694_v50  ;;  %v1160_v34 = vpop.f32.mrf.mxu1 }
 0x153   :  { %v1508_v36 = vpack.c.bf16 %v1169_v17, %v1166_v21  ;;  %v1161_v42 = vadd.f32 %v1160_v34, %v1064_v40  ;;  %v1289_v6 = vmul.f32 %v1169_v17, %v1169_v17 }
 0x154   :  { %v1261_v26 = vadd.f32 %v1260_v25, %v1150_v33  ;;  %v1284_v27 = vmul.f32 %v1150_v33, %v1150_v33  ;;  %v1056_v29 = vadd.f32 %v1696_v7, %v959_v41 }
 0x155   :  { %1516 = vst [vmem:[%s2406_s2 + $0x38] sm:$0xff] %v1508_v36   ;;  %v1503_v54 = vpack.c.bf16 %v1161_v42, %v1158_v35  ;;  %v1287_v3 = vmul.f32 %v1161_v42, %v1161_v42 }
 0x156   :  { %v1299_v14 = vadd.f32 %v1298_v38, %v1284_v27  ;;  %v1153_v63 = vadd.f32 %v1734_v56, %v1056_v29 }
 0x157   :  { %1515 = vst [vmem:[%s2406_s2 + $0x30] sm:$0xff] %v1503_v54  }
 0x158   :  { %v1498_v31 = vpack.c.bf16 %v1153_v63, %v1150_v33  ;;  %v1285_v2 = vmul.f32 %v1153_v63, %v1153_v63  ;;  %v1262_v30 = vadd.f32 %v1261_v26, %v1153_v63 }
 0x15a   :  { %1514 = vst [vmem:[%s2406_s2 + $0x28] sm:$0xff] %v1498_v31   ;;  %v1263_v43 = vadd.f32 %v1262_v30, %v1158_v35  ;;  %v1300_v1 = vadd.f32 %v1299_v14, %v1285_v2 }
 0x15c   :  { %v1264_v39 = vadd.f32 %v1263_v43, %v1161_v42  ;;  %v1301_v15 = vadd.f32 %v1300_v1, %v1286_v53 }
 0x15e   :  { %v1265_v5 = vadd.f32 %v1264_v39, %v1166_v21  ;;  %v1302_v56 = vadd.f32 %v1301_v15, %v1287_v3 }
 0x160   :  { %v1266_v55 = vadd.f32 %v1265_v5, %v1169_v17  ;;  %v1303_v58 = vadd.f32 %v1302_v56, %v1288_v4 }
 0x162   :  { %v1267_v59 = vrot.slane %v1266_v55, 4  ;;  %v1304_v61 = vadd.f32 %v1303_v58, %v1289_v6 }
 0x164   :  { %v1268_v8 = vadd.f32 %v1267_v59, %v1266_v55  ;;  %v1305_v44 = vrot.slane %v1304_v61, 4 }
 0x166   :  { %v1269_v49 = vrot.slane %v1268_v8, 2  ;;  %v1306_v45 = vadd.f32 %v1305_v44, %v1304_v61 }
 0x168   :  { %v1270_v46 = vadd.f32 %v1269_v49, %v1268_v8  ;;  %v1307_v60 = vrot.slane %v1306_v45, 2 }
 0x16a   :  { %v1271_v62 = vrot.slane %v1270_v46, 1  ;;  %v1308_v47 = vadd.f32 %v1307_v60, %v1306_v45 }
 0x16c   :  { %v1272_v19 = vadd.f32 %v1271_v62, %v1270_v46  ;;  %v1309_v22 = vrot.slane %v1308_v47, 1 }
 0x16e   :  { %1273 = vst [vmem:[%s2407_s3] sm:$0x1] %v1272_v19  ;;  %v1310_v18 = vadd.f32 %v1309_v22, %v1308_v47 }
 0x170   :  { %1311 = vst [vmem:[%s2408_s4] sm:$0x1] %v1310_v18 }

// kernel: discriminator_forward.8
= control target key start
LH: loop header
LB: loop body
LE: loop exit
PB: predicated region body
PF: predicated region fallthrough
CT: control target
= control target key end

     0   :  { %vm973_vm0 = vcmask 523264   ;;  %s2265_s1 = inlined_call_operand.vmem [shape: bf16[1600,128], index: 1, kind: input, shape index: {}]   ;;  %s2266_s0 = inlined_call_operand.vmem [shape: bf16[32,1600], index: 0, kind: input, shape index: {}]   ;;  %s2267_s2 = inlined_call_operand.vmem [shape: bf16[32,128], index: 2, kind: output, shape index: {0}]   ;;  %s2268_s3 = inlined_call_operand.vmem [shape: f32[1,1,128], index: 3, kind: output, shape index: {1}]   ;;  %s2269_s4 = inlined_call_operand.vmem [shape: f32[1,1,128], index: 4, kind: output, shape index: {2}]  }
   0x1   :  { %v1712_v0 = vld [vmem:[%s2265_s1 + $0x78] sm:$0xff]   ;;  %v1716_v4 = vld [vmem:[%s2265_s1 + $0x70] sm:$0xff]   ;;  %v1720_v8 = vld [vmem:[%s2265_s1 + $0x68] sm:$0xff]  }
   0x2   :  { %v1713_v1 = vld [vmem:[%s2265_s1 + $0xf8] sm:$0xff]   ;;  %1526 = vmatprep.subr.bf16.mxu0 %v1712_v0  ;;  %v1717_v5 = vld [vmem:[%s2265_s1 + $0xf0] sm:$0xff]   ;;  %v1721_v9 = vld [vmem:[%s2265_s1 + $0xe8] sm:$0xff]  }
   0x3   :  { %v1714_v2 = vld [vmem:[%s2265_s1 + $0x38] sm:$0xff]   ;;  %1554 = vmatprep.subr.bf16.mxu1 %v1713_v1  ;;  %v1718_v6 = vld [vmem:[%s2265_s1 + $0x30] sm:$0xff]   ;;  %v1722_v10 = vld [vmem:[%s2265_s1 + $0x28] sm:$0xff]  }
   0x4   :  { %v1715_v3 = vld [vmem:[%s2265_s1 + $0xb8] sm:$0xff]   ;;  %1527 = vmatpush3.bf16.msra.mxu0 %v1714_v2  ;;  %v1719_v7 = vld [vmem:[%s2265_s1 + $0xb0] sm:$0xff]   ;;  %v1723_v11 = vld [vmem:[%s2265_s1 + $0xa8] sm:$0xff]  }
   0x5   :  { %1555 = vmatpush3.bf16.msra.mxu1 %v1715_v3  ;;  %1528 = vmatprep.subr.bf16.mxu0 %v1716_v4  ;;  %v1724_v12 = vld [vmem:[%s2265_s1 + $0x60] sm:$0xff]   ;;  %v1728_v16 = vld [vmem:[%s2265_s1 + $0x58] sm:$0xff]   ;;  %v1732_v20 = vld [vmem:[%s2265_s1 + $0x50] sm:$0xff]  }
   0x6   :  { %1556 = vmatprep.subr.bf16.mxu1 %v1717_v5  ;;  %v1725_v13 = vld [vmem:[%s2265_s1 + $0xe0] sm:$0xff]   ;;  %v1729_v17 = vld [vmem:[%s2265_s1 + $0xd8] sm:$0xff]   ;;  %v1733_v21 = vld [vmem:[%s2265_s1 + $0xd0] sm:$0xff]  }
   0x7   :  { %v1726_v14 = vld [vmem:[%s2265_s1 + $0x20] sm:$0xff]   ;;  %v1730_v18 = vld [vmem:[%s2265_s1 + $0x18] sm:$0xff]   ;;  %v1734_v22 = vld [vmem:[%s2265_s1 + $0x10] sm:$0xff]  }
   0x8   :  { %1529 = vmatpush3.bf16.msra.mxu0 %v1718_v6  ;;  %v1727_v15 = vld [vmem:[%s2265_s1 + $0xa0] sm:$0xff]   ;;  %v1731_v19 = vld [vmem:[%s2265_s1 + $0x98] sm:$0xff]   ;;  %v1735_v23 = vld [vmem:[%s2265_s1 + $0x90] sm:$0xff]  }
   0x9   :  { %1557 = vmatpush3.bf16.msra.mxu1 %v1719_v7  ;;  %1530 = vmatprep.subr.bf16.mxu0 %v1720_v8  ;;  %v1736_v24 = vld [vmem:[%s2265_s1 + $0x48] sm:$0xff]   ;;  %v1740_v28 = vld [vmem:[%s2265_s1 + $0x40] sm:$0xff]   ;;  %v1750_v36 = vld [vmem:[%s2265_s1 + $0x178] sm:$0xff]  }
   0xa   :  { %1558 = vmatprep.subr.bf16.mxu1 %v1721_v9  ;;  %v1737_v25 = vld [vmem:[%s2265_s1 + $0xc8] sm:$0xff]   ;;  %v1741_v29 = vld [vmem:[%s2265_s1 + $0xc0] sm:$0xff]   ;;  %v1751_v37 = vld [vmem:[%s2265_s1 + $0x138] sm:$0xff]  }
   0xb   :  { %v1738_v26 = vld [vmem:[%s2265_s1 + $0x8] sm:$0xff]   ;;  %v1742_v30 = vld [vmem:[%s2265_s1] sm:$0xff]   ;;  %v1752_v38 = vld [vmem:[%s2265_s1 + $0x1f8] sm:$0xff]  }
   0xc   :  { %1531 = vmatpush3.bf16.msra.mxu0 %v1722_v10  ;;  %v1739_v27 = vld [vmem:[%s2265_s1 + $0x88] sm:$0xff]   ;;  %v1743_v31 = vld [vmem:[%s2265_s1 + $0x80] sm:$0xff]   ;;  %v1753_v39 = vld [vmem:[%s2265_s1 + $0x1b8] sm:$0xff]  }
   0xd   :  { %1559 = vmatpush3.bf16.msra.mxu1 %v1723_v11  ;;  %1532 = vmatprep.subr.bf16.mxu0 %v1724_v12  ;;  %v1744_v32 = vld [vmem:[%s2266_s0] ss:$52 sps:$4 sm:$0xff]   ;;  %v1746_v33 = vld [vmem:[%s2266_s0 + $0x4] ss:$52 sps:$4 sm:$0xff]   ;;  %v1747_v34 = vld [vmem:[%s2266_s0 + $0x8] ss:$52 sps:$4 sm:$0xff]  }
   0xe   :  { %1560 = vmatprep.subr.bf16.mxu1 %v1725_v13  ;;  %v1749_v35 = vld [vmem:[%s2266_s0 + $0xc] ss:$52 sps:$4 sm:$0xff]   ;;  %1012 = vmatprep.mubr.bf16.mxu0 %v1746_v33  ;;  %v1754_v40 = vld [vmem:[%s2265_s1 + $0x170] sm:$0xff]   ;;  %v1766_v52 = vld [vmem:[%s2265_s1 + $0x158] sm:$0xff]  }
   0xf   :  { %1061 = vmatprep.mubr.bf16.mxu1 %v1749_v35  ;;  %v1755_v41 = vld [vmem:[%s2265_s1 + $0x130] sm:$0xff]   ;;  %v1758_v44 = vld [vmem:[%s2265_s1 + $0x168] sm:$0xff]   ;;  %v1762_v48 = vld [vmem:[%s2265_s1 + $0x160] sm:$0xff]  }
  0x10   :  { %1533 = vmatpush3.bf16.msra.mxu0 %v1726_v14  ;;  %v1756_v42 = vld [vmem:[%s2265_s1 + $0x1f0] sm:$0xff]   ;;  %v1759_v45 = vld [vmem:[%s2265_s1 + $0x128] sm:$0xff]   ;;  %v1763_v49 = vld [vmem:[%s2265_s1 + $0x120] sm:$0xff]  }
  0x11   :  { %1561 = vmatpush3.bf16.msra.mxu1 %v1727_v15  ;;  %1534 = vmatprep.subr.bf16.mxu0 %v1728_v16  ;;  %v1757_v43 = vld [vmem:[%s2265_s1 + $0x1b0] sm:$0xff]   ;;  %v1760_v46 = vld [vmem:[%s2265_s1 + $0x1e8] sm:$0xff]   ;;  %v1764_v50 = vld [vmem:[%s2265_s1 + $0x1e0] sm:$0xff]  }
  0x12   :  { %1562 = vmatprep.subr.bf16.mxu1 %v1729_v17  ;;  %v1761_v47 = vld [vmem:[%s2265_s1 + $0x1a8] sm:$0xff]   ;;  %v1765_v51 = vld [vmem:[%s2265_s1 + $0x1a0] sm:$0xff]   ;;  %v1767_v53 = vld [vmem:[%s2265_s1 + $0x118] sm:$0xff]  }
  0x13   :  { %v1768_v54 = vld [vmem:[%s2266_s0 + $0x6c] ss:$52 sps:$4 sm:$0xff]   ;;  %v1770_v55 = vld [vmem:[%s2266_s0 + $0x74] ss:$52 sps:$4 sm:$0xff]   ;;  %v1772_v56 = vld [vmem:[%s2265_s1 + $0x1d8] sm:$0xff]  }
  0x14   :  { %1535 = vmatpush3.bf16.msra.mxu0 %v1730_v18  ;;  %v1773_v57 = vld [vmem:[%s2266_s0 + $0x68] ss:$52 sps:$4 sm:$0xff]   ;;  %v1774_v58 = vld [vmem:[%s2266_s0 + $0x70] ss:$52 sps:$4 sm:$0xff]   ;;  %v1792_v11 = vld [vmem:[%s2266_s0 + $0x18] ss:$52 sps:$4 sm:$0xff]  }
  0x15   :  { %1563 = vmatpush3.bf16.msra.mxu1 %v1731_v19  ;;  %1536 = vmatprep.subr.bf16.mxu0 %v1732_v20  ;;  %v1775_v59 = vld [vmem:[%s2265_s1 + $0x198] sm:$0xff]   ;;  %v1776_v60 = vld [vmem:[%s2265_s1 + $0x150] sm:$0xff]   ;;  %v1780_v0 = vld [vmem:[%s2265_s1 + $0x148] sm:$0xff]  }
  0x16   :  { %1564 = vmatprep.subr.bf16.mxu1 %v1733_v21  ;;  %v1777_v61 = vld [vmem:[%s2265_s1 + $0x110] sm:$0xff]   ;;  %v1781_v1 = vld [vmem:[%s2265_s1 + $0x108] sm:$0xff]   ;;  %v1784_v4 = vld [vmem:[%s2265_s1 + $0x140] sm:$0xff]  }
  0x17   :  { %v1778_v62 = vld [vmem:[%s2265_s1 + $0x1d0] sm:$0xff]   ;;  %v1782_v2 = vld [vmem:[%s2265_s1 + $0x1c8] sm:$0xff]   ;;  %v1785_v5 = vld [vmem:[%s2265_s1 + $0x100] sm:$0xff]  }
  0x18   :  { %1537 = vmatpush3.bf16.msra.mxu0 %v1734_v22  ;;  %v1779_v63 = vld [vmem:[%s2265_s1 + $0x190] sm:$0xff]   ;;  %v1783_v3 = vld [vmem:[%s2265_s1 + $0x188] sm:$0xff]   ;;  %v1786_v6 = vld [vmem:[%s2265_s1 + $0x1c0] sm:$0xff]  }
  0x19   :  { %1565 = vmatpush3.bf16.msra.mxu1 %v1735_v23  ;;  %1538 = vmatprep.subr.bf16.mxu0 %v1736_v24  ;;  %v1787_v7 = vld [vmem:[%s2266_s0 + $0x10] ss:$52 sps:$4 sm:$0xff]   ;;  %v1789_v8 = vld [vmem:[%s2266_s0 + $0x14] ss:$52 sps:$4 sm:$0xff]   ;;  %v1791_v10 = vld [vmem:[%s2265_s1 + $0x278] sm:$0xff]  }
  0x1a   :  { %1566 = vmatprep.subr.bf16.mxu1 %v1737_v25  ;;  %v1790_v9 = vld [vmem:[%s2265_s1 + $0x180] sm:$0xff]   ;;  %v1794_v12 = vld [vmem:[%s2266_s0 + $0x1c] ss:$52 sps:$4 sm:$0xff]   ;;  %v1804_v21 = vld [vmem:[%s2266_s0 + $0x78] ss:$52 sps:$4 sm:$0xff]  }
  0x1b   :  { %v1795_v13 = vld [vmem:[%s2265_s1 + $0x238] sm:$0xff]   ;;  %v1798_v16 = vld [vmem:[%s2265_s1 + $0x270] sm:$0xff]   ;;  %v1805_v22 = vld [vmem:[%s2265_s1 + $0x268] sm:$0xff]  }
  0x1c   :  { %1539 = vmatpush3.bf16.msra.mxu0 %v1738_v26  ;;  %v1796_v14 = vld [vmem:[%s2265_s1 + $0x2f8] sm:$0xff]   ;;  %v1799_v17 = vld [vmem:[%s2265_s1 + $0x230] sm:$0xff]   ;;  %v1808_v24 = vld [vmem:[%s2265_s1 + $0x228] sm:$0xff]  }
  0x1d   :  { %1567 = vmatpush3.bf16.msra.mxu1 %v1739_v27  ;;  %1540 = vmatprep.subr.bf16.mxu0 %v1740_v28  ;;  %v1797_v15 = vld [vmem:[%s2265_s1 + $0x2b8] sm:$0xff]   ;;  %v1800_v18 = vld [vmem:[%s2265_s1 + $0x2f0] sm:$0xff]   ;;  %v1810_v26 = vld [vmem:[%s2265_s1 + $0x2e8] sm:$0xff]  }
  0x1e   :  { %1568 = vmatprep.subr.bf16.mxu1 %v1741_v29  ;;  %v1801_v19 = vld [vmem:[%s2266_s0 + $0x7c] ss:$52 sps:$4 sm:$0xff]   ;;  %v1806_v23 = vld [vmem:[%s2266_s0 + $0x84] ss:$52 sps:$4 sm:$0xff]   ;;  %v1809_v25 = vld [vmem:[%s2266_s0 + $0x80] ss:$52 sps:$4 sm:$0xff]  }
  0x1f   :  { %v1803_v20 = vld [vmem:[%s2265_s1 + $0x2b0] sm:$0xff]   ;;  %v1811_v27 = vld [vmem:[%s2265_s1 + $0x2a8] sm:$0xff]   ;;  %v1812_v28 = vld [vmem:[%s2265_s1 + $0x260] sm:$0xff]  }
  0x20   :  { %1541 = vmatpush3.bf16.msra.mxu0 %v1742_v30  ;;  %v1813_v29 = vld [vmem:[%s2265_s1 + $0x220] sm:$0xff]   ;;  %v1817_v33 = vld [vmem:[%s2265_s1 + $0x218] sm:$0xff]  }
  0x21   :  { %1569 = vmatpush3.bf16.msra.mxu1 %v1743_v31  ;;  %1582 = vmatprep.subr.bf16.mxu0 %v1750_v36  ;;  %v1814_v30 = vld [vmem:[%s2265_s1 + $0x2e0] sm:$0xff]   ;;  %v1819_v35 = vld [vmem:[%s2265_s1 + $0x298] sm:$0xff]   ;;  %v1820_v36 = vld [vmem:[%s2265_s1 + $0x250] sm:$0xff]  }
  0x22   :  { %1610 = vmatprep.subr.bf16.mxu1 %v1752_v38  ;;  %v1815_v31 = vld [vmem:[%s2265_s1 + $0x2a0] sm:$0xff]   ;;  %v1822_v38 = vld [vmem:[%s2265_s1 + $0x2d0] sm:$0xff]  }
  0x23   :  { %1013 = vmatmul.mubr.bf16.vlgmr.msra.gmra.mxu0 %v1744_v32  ;;  %v1816_v32 = vld [vmem:[%s2265_s1 + $0x258] sm:$0xff]  }
  0x24   :  { %1062 = vmatmul.mubr.bf16.vlgmr.msra.gmra.mxu1 %v1747_v34  ;;  %1583 = vmatpush3.bf16.msra.mxu0 %v1751_v37  ;;  %v1818_v34 = vld [vmem:[%s2265_s1 + $0x2d8] sm:$0xff]   ;;  %v1821_v37 = vld [vmem:[%s2265_s1 + $0x210] sm:$0xff]  }
  0x25   :  { %1611 = vmatpush3.bf16.msra.mxu1 %v1753_v39  ;;  %1584 = vmatprep.subr.bf16.mxu0 %v1754_v40  ;;  %v1823_v39 = vld [vmem:[%s2265_s1 + $0x290] sm:$0xff]   ;;  %v1824_v40 = vld [vmem:[%s2265_s1 + $0x248] sm:$0xff]  }
  0x26   :  { %1612 = vmatprep.subr.bf16.mxu1 %v1756_v42  ;;  %1020 = vmatprep.mubr.bf16.mxu0 %v1768_v54  ;;  %v1826_v42 = vld [vmem:[%s2265_s1 + $0x2c8] sm:$0xff]  }
  0x27   :  { %1069 = vmatprep.mubr.bf16.mxu1 %v1770_v55  ;;  %v1840_v54 = vld [vmem:[%s2266_s0 + $0x8c] ss:$52 sps:$4 sm:$0xff]   ;;  %v1842_v55 = vld [vmem:[%s2266_s0 + $0x88] ss:$52 sps:$4 sm:$0xff]  }
  0x28   :  { %1585 = vmatpush3.bf16.msra.mxu0 %v1755_v41  ;;  %v1825_v41 = vld [vmem:[%s2265_s1 + $0x208] sm:$0xff]  }
  0x29   :  { %1613 = vmatpush3.bf16.msra.mxu1 %v1757_v43  ;;  %1586 = vmatprep.subr.bf16.mxu0 %v1758_v44  ;;  %v1827_v43 = vld [vmem:[%s2265_s1 + $0x288] sm:$0xff]   ;;  %v1828_v44 = vld [vmem:[%s2265_s1 + $0x240] sm:$0xff]  }
  0x2a   :  { %1614 = vmatprep.subr.bf16.mxu1 %v1760_v46  ;;  %v1830_v46 = vld [vmem:[%s2265_s1 + $0x2c0] sm:$0xff]  }
  0x2b   :  { %1021 = vmatmul.mubr.bf16.gmra.mxu0 %v1773_v57  ;;  %v1844_v57 = vld [vmem:[%s2266_s0 + $0x94] ss:$52 sps:$4 sm:$0xff]  }
  0x2c   :  { %1587 = vmatpush3.bf16.msra.mxu0 %v1759_v45  ;;  %1070 = vmatmul.mubr.bf16.gmra.mxu1 %v1774_v58  ;;  %v1829_v45 = vld [vmem:[%s2265_s1 + $0x200] sm:$0xff]  }
  0x2d   :  { %1615 = vmatpush3.bf16.msra.mxu1 %v1761_v47  ;;  %1588 = vmatprep.subr.bf16.mxu0 %v1762_v48  ;;  %v1831_v47 = vld [vmem:[%s2266_s0 + $0x20] ss:$52 sps:$4 sm:$0xff]   ;;  %v1833_v48 = vld [vmem:[%s2266_s0 + $0x24] ss:$52 sps:$4 sm:$0xff]  }
  0x2e   :  { %1616 = vmatprep.subr.bf16.mxu1 %v1764_v50  ;;  %1110 = vmatprep.mubr.bf16.mxu0 %v1789_v8  ;;  %v1835_v50 = vld [vmem:[%s2265_s1 + $0x318] sm:$0xff]   ;;  %v1847_v58 = vld [vmem:[%s2265_s1 + $0x300] sm:$0xff]  }
  0x2f   :  { %1159 = vmatprep.mubr.bf16.mxu1 %v1794_v12 }
  0x30   :  { %1589 = vmatpush3.bf16.msra.mxu0 %v1763_v49  ;;  %v1834_v49 = vld [vmem:[%s2265_s1 + $0x280] sm:$0xff]  }
  0x31   :  { %1617 = vmatpush3.bf16.msra.mxu1 %v1765_v51  ;;  %1590 = vmatprep.subr.bf16.mxu0 %v1766_v52  ;;  %v1836_v51 = vld [vmem:[%s2266_s0 + $0x28] ss:$52 sps:$4 sm:$0xff]   ;;  %v1838_v52 = vld [vmem:[%s2266_s0 + $0x2c] ss:$52 sps:$4 sm:$0xff]  }
  0x32   :  { %1618 = vmatprep.subr.bf16.mxu1 %v1772_v56  ;;  %v1843_v56 = vld [vmem:[%s2265_s1 + $0x308] sm:$0xff]  }
  0x34   :  { %1591 = vmatpush3.bf16.msra.mxu0 %v1767_v53  ;;  %v1839_v53 = vld [vmem:[%s2265_s1 + $0x310] sm:$0xff]  }
  0x35   :  { %1619 = vmatpush3.bf16.msra.mxu1 %v1775_v59  ;;  %1592 = vmatprep.subr.bf16.mxu0 %v1776_v60  ;;  %v1848_v59 = vld [vmem:[%s2266_s0 + $0x30] ss:$52 sps:$4 sm:$0xff]  }
  0x36   :  { %1620 = vmatprep.subr.bf16.mxu1 %v1778_v62  ;;  %v1846_v60 = vld [vmem:[%s2266_s0 + $0x90] ss:$52 sps:$4 sm:$0xff]  }
  0x38   :  { %1593 = vmatpush3.bf16.msra.mxu0 %v1777_v61  ;;  %v1849_v61 = vld [vmem:[%s2266_s0 + $0x98] ss:$52 sps:$4 sm:$0xff]  }
  0x39   :  { %1621 = vmatpush3.bf16.msra.mxu1 %v1779_v63  ;;  %1594 = vmatprep.subr.bf16.mxu0 %v1780_v0 }
  0x3a   :  { %1622 = vmatprep.subr.bf16.mxu1 %v1782_v2 }
  0x3c   :  { %1595 = vmatpush3.bf16.msra.mxu0 %v1781_v1 }
  0x3d   :  { %1623 = vmatpush3.bf16.msra.mxu1 %v1783_v3  ;;  %1596 = vmatprep.subr.bf16.mxu0 %v1784_v4 }
  0x3e   :  { %1624 = vmatprep.subr.bf16.mxu1 %v1786_v6 }
  0x40   :  { %1597 = vmatpush3.bf16.msra.mxu0 %v1785_v5 }
  0x41   :  { %1625 = vmatpush3.bf16.msra.mxu1 %v1790_v9  ;;  %1638 = vmatprep.subr.bf16.mxu0 %v1791_v10 }
  0x42   :  { %1666 = vmatprep.subr.bf16.mxu1 %v1796_v14 }
  0x43   :  { %1111 = vmatmul.mubr.bf16.vlgmr.msra.gmra.mxu0 %v1787_v7 }
  0x44   :  { %1639 = vmatpush3.bf16.msra.mxu0 %v1795_v13  ;;  %1160 = vmatmul.mubr.bf16.vlgmr.msra.gmra.mxu1 %v1792_v11 }
  0x45   :  { %1667 = vmatpush3.bf16.msra.mxu1 %v1797_v15  ;;  %1640 = vmatprep.subr.bf16.mxu0 %v1798_v16 }
  0x46   :  { %1668 = vmatprep.subr.bf16.mxu1 %v1800_v18  ;;  %1118 = vmatprep.mubr.bf16.mxu0 %v1801_v19 }
  0x47   :  { %1167 = vmatprep.mubr.bf16.mxu1 %v1806_v23 }
  0x48   :  { %1641 = vmatpush3.bf16.msra.mxu0 %v1799_v17 }
  0x49   :  { %1669 = vmatpush3.bf16.msra.mxu1 %v1803_v20  ;;  %1642 = vmatprep.subr.bf16.mxu0 %v1805_v22 }
  0x4a   :  { %1670 = vmatprep.subr.bf16.mxu1 %v1810_v26 }
  0x4b   :  { %1119 = vmatmul.mubr.bf16.gmra.mxu0 %v1804_v21 }
  0x4c   :  { %1643 = vmatpush3.bf16.msra.mxu0 %v1808_v24  ;;  %1168 = vmatmul.mubr.bf16.gmra.mxu1 %v1809_v25 }
  0x4d   :  { %1671 = vmatpush3.bf16.msra.mxu1 %v1811_v27  ;;  %1644 = vmatprep.subr.bf16.mxu0 %v1812_v28 }
  0x4e   :  { %1672 = vmatprep.subr.bf16.mxu1 %v1814_v30  ;;  %1208 = vmatprep.mubr.bf16.mxu0 %v1833_v48 }
  0x4f   :  { %1257 = vmatprep.mubr.bf16.mxu1 %v1838_v52 }
  0x50   :  { %1645 = vmatpush3.bf16.msra.mxu0 %v1813_v29 }
  0x51   :  { %1673 = vmatpush3.bf16.msra.mxu1 %v1815_v31  ;;  %1646 = vmatprep.subr.bf16.mxu0 %v1816_v32 }
  0x52   :  { %1674 = vmatprep.subr.bf16.mxu1 %v1818_v34 }
  0x54   :  { %1647 = vmatpush3.bf16.msra.mxu0 %v1817_v33 }
  0x55   :  { %1675 = vmatpush3.bf16.msra.mxu1 %v1819_v35  ;;  %1648 = vmatprep.subr.bf16.mxu0 %v1820_v36 }
  0x56   :  { %1676 = vmatprep.subr.bf16.mxu1 %v1822_v38 }
  0x58   :  { %1649 = vmatpush3.bf16.msra.mxu0 %v1821_v37 }
  0x59   :  { %1677 = vmatpush3.bf16.msra.mxu1 %v1823_v39  ;;  %1650 = vmatprep.subr.bf16.mxu0 %v1824_v40 }
  0x5a   :  { %1678 = vmatprep.subr.bf16.mxu1 %v1826_v42 }
  0x5c   :  { %1651 = vmatpush3.bf16.msra.mxu0 %v1825_v41 }
  0x5d   :  { %1679 = vmatpush3.bf16.msra.mxu1 %v1827_v43  ;;  %1652 = vmatprep.subr.bf16.mxu0 %v1828_v44 }
  0x5e   :  { %1680 = vmatprep.subr.bf16.mxu1 %v1830_v46 }
  0x60   :  { %1653 = vmatpush3.bf16.msra.mxu0 %v1829_v45 }
  0x61   :  { %1681 = vmatpush3.bf16.msra.mxu1 %v1834_v49  ;;  %1700 = vmatprep.subr.bf16.mxu0 %v1835_v50 }
  0x63   :  { %1209 = vmatmul.mubr.bf16.vlgmr.msra.gmra.mxu0 %v1831_v47 }
  0x64   :  { %1701 = vmatpush3.bf16.msra.mxu0 %v1835_v50  ;;  %1258 = vmatmul.mubr.bf16.vlgmr.msra.gmra.mxu1 %v1836_v51 }
  0x65   :  { %1702 = vmatprep.subr.bf16.mxu0 %v1839_v53  ;;  %1216 = vmatprep.mubr.bf16.mxu0 %v1840_v54 }
  0x66   :  { %1265 = vmatprep.mubr.bf16.mxu1 %v1844_v57 }
  0x68   :  { %1703 = vmatpush3.bf16.msra.mxu0 %v1839_v53 }
  0x69   :  { %1704 = vmatprep.subr.bf16.mxu0 %v1843_v56 }
  0x6b   :  { %1217 = vmatmul.mubr.bf16.gmra.mxu0 %v1842_v55 }
  0x6c   :  { %1708 = vmatprep.mubr.msk.bf16.mxu0 %vm973_vm0, %v1848_v59  ;;  %1705 = vmatpush3.bf16.msra.mxu0 %v1843_v56 }
  0x6d   :  { %1706 = vmatprep.subr.bf16.mxu0 %v1847_v58  ;;  %1266 = vmatmul.mubr.bf16.gmra.mxu1 %v1846_v60 }
  0x70   :  { %1707 = vmatpush3.bf16.msra.mxu0 %v1847_v58 }
  0x73   :  { %1709 = vmatmul.mubr.msk.bf16.vlgmr.msra.gmra.mxu0 %vm973_vm0, %v1849_v61 }
  0xe3   :  { %v1542_v62 = vpop.f32.mrf.mxu0 }
  0xe4   :  { %v1570_v63 = vpop.f32.mrf.mxu1 }
  0xe5   :  { %v1543_v0 = vpop.f32.mrf.mxu0 }
  0xe6   :  { %v1571_v1 = vpop.f32.mrf.mxu1  ;;  %v1544_v34 = vadd.f32 %v1543_v0, %v1542_v62 }
  0xe7   :  { %v1545_v2 = vpop.f32.mrf.mxu0  ;;  %v1572_v35 = vadd.f32 %v1571_v1, %v1570_v63 }
  0xe8   :  { %v1573_v3 = vpop.f32.mrf.mxu1 }
  0xe9   :  { %v1546_v4 = vpop.f32.mrf.mxu0  ;;  %v1064_v48 = vadd.f32 %v1572_v35, %v1544_v34 }
  0xea   :  { %v1574_v6 = vpop.f32.mrf.mxu1  ;;  %v1547_v41 = vadd.f32 %v1546_v4, %v1545_v2 }
  0xeb   :  { %v1548_v5 = vpop.f32.mrf.mxu0  ;;  %v1575_v42 = vadd.f32 %v1574_v6, %v1573_v3 }
  0xec   :  { %v1576_v7 = vpop.f32.mrf.mxu1 }
  0xed   :  { %v1549_v8 = vpop.f32.mrf.mxu0  ;;  %v1067_v55 = vadd.f32 %v1575_v42, %v1547_v41 }
  0xee   :  { %v1577_v9 = vpop.f32.mrf.mxu1  ;;  %v1550_v32 = vadd.f32 %v1549_v8, %v1548_v5 }
  0xef   :  { %v1551_v10 = vpop.f32.mrf.mxu0  ;;  %v1578_v33 = vadd.f32 %v1577_v9, %v1576_v7 }
  0xf0   :  { %v1579_v11 = vpop.f32.mrf.mxu1 }
  0xf1   :  { %v1552_v12 = vpop.f32.mrf.mxu0  ;;  %v1072_v46 = vadd.f32 %v1578_v33, %v1550_v32 }
  0xf2   :  { %v1580_v14 = vpop.f32.mrf.mxu1  ;;  %v1553_v38 = vadd.f32 %v1552_v12, %v1551_v10 }
  0xf3   :  { %v1581_v39 = vadd.f32 %v1580_v14, %v1579_v11 }
  0xf5   :  { %v1075_v52 = vadd.f32 %v1581_v39, %v1553_v38 }
 0x103   :  { %v1598_v13 = vpop.f32.mrf.mxu0 }
 0x104   :  { %v1626_v16 = vpop.f32.mrf.mxu1 }
 0x105   :  { %v1599_v15 = vpop.f32.mrf.mxu0 }
 0x106   :  { %v1627_v18 = vpop.f32.mrf.mxu1  ;;  %v1600_v43 = vadd.f32 %v1599_v15, %v1598_v13 }
 0x107   :  { %v1601_v17 = vpop.f32.mrf.mxu0  ;;  %v1628_v57 = vadd.f32 %v1627_v18, %v1626_v16 }
 0x108   :  { %v1629_v20 = vpop.f32.mrf.mxu1  ;;  %v1113_v56 = vadd.f32 %v1600_v43, %v1064_v48 }
 0x109   :  { %v1602_v19 = vpop.f32.mrf.mxu0 }
 0x10a   :  { %v1630_v22 = vpop.f32.mrf.mxu1  ;;  %v1603_v49 = vadd.f32 %v1602_v19, %v1601_v17  ;;  %v1162_v5 = vadd.f32 %v1628_v57, %v1113_v56 }
 0x10b   :  { %v1604_v21 = vpop.f32.mrf.mxu0  ;;  %v1631_v0 = vadd.f32 %v1630_v22, %v1629_v20 }
 0x10c   :  { %v1632_v24 = vpop.f32.mrf.mxu1  ;;  %v1116_v63 = vadd.f32 %v1603_v49, %v1067_v55 }
 0x10d   :  { %v1605_v23 = vpop.f32.mrf.mxu0 }
 0x10e   :  { %v1633_v26 = vpop.f32.mrf.mxu1  ;;  %v1606_v40 = vadd.f32 %v1605_v23, %v1604_v21  ;;  %v1165_v13 = vadd.f32 %v1631_v0, %v1116_v63 }
 0x10f   :  { %v1607_v25 = vpop.f32.mrf.mxu0  ;;  %v1634_v54 = vadd.f32 %v1633_v26, %v1632_v24 }
 0x110   :  { %v1635_v28 = vpop.f32.mrf.mxu1  ;;  %v1121_v53 = vadd.f32 %v1606_v40, %v1072_v46 }
 0x111   :  { %v1608_v27 = vpop.f32.mrf.mxu0 }
 0x112   :  { %v1636_v30 = vpop.f32.mrf.mxu1  ;;  %v1609_v47 = vadd.f32 %v1608_v27, %v1607_v25  ;;  %v1170_v4 = vadd.f32 %v1634_v54, %v1121_v53 }
 0x113   :  { %v1637_v61 = vadd.f32 %v1636_v30, %v1635_v28 }
 0x114   :  { %v1124_v60 = vadd.f32 %v1609_v47, %v1075_v52 }
 0x116   :  { %v1173_v9 = vadd.f32 %v1637_v61, %v1124_v60 }
 0x123   :  { %v1654_v29 = vpop.f32.mrf.mxu0 }
 0x124   :  { %v1682_v36 = vpop.f32.mrf.mxu1 }
 0x125   :  { %v1655_v31 = vpop.f32.mrf.mxu0 }
 0x126   :  { %v1683_v44 = vpop.f32.mrf.mxu1  ;;  %v1656_v1 = vadd.f32 %v1655_v31, %v1654_v29 }
 0x127   :  { %v1657_v37 = vpop.f32.mrf.mxu0  ;;  %v1684_v15 = vadd.f32 %v1683_v44, %v1682_v36 }
 0x128   :  { %v1685_v50 = vpop.f32.mrf.mxu1  ;;  %v1211_v14 = vadd.f32 %v1656_v1, %v1162_v5 }
 0x129   :  { %v1658_v45 = vpop.f32.mrf.mxu0 }
 0x12a   :  { %v1686_v58 = vpop.f32.mrf.mxu1  ;;  %v1659_v6 = vadd.f32 %v1658_v45, %v1657_v37  ;;  %v1260_v25 = vadd.f32 %v1684_v15, %v1211_v14 }
 0x12b   :  { %v1660_v51 = vpop.f32.mrf.mxu0  ;;  %v1687_v20 = vadd.f32 %v1686_v58, %v1685_v50 }
 0x12c   :  { %v1214_v19 = vadd.f32 %v1659_v6, %v1165_v13 }
 0x12d   :  { %v1661_v59 = vpop.f32.mrf.mxu0  ;;  %v1688_v2 = vpop.f32.mrf.mxu1 }
 0x12e   :  { %v1662_v62 = vadd.f32 %v1661_v59, %v1660_v51  ;;  %v1263_v29 = vadd.f32 %v1687_v20, %v1214_v19 }
 0x12f   :  { %v1663_v3 = vpop.f32.mrf.mxu0  ;;  %v1689_v7 = vpop.f32.mrf.mxu1 }
 0x130   :  { %v1219_v10 = vadd.f32 %v1662_v62, %v1170_v4  ;;  %v1690_v11 = vadd.f32 %v1689_v7, %v1688_v2 }
 0x131   :  { %v1664_v8 = vpop.f32.mrf.mxu0  ;;  %v1691_v16 = vpop.f32.mrf.mxu1 }
 0x132   :  { %v1665_v12 = vadd.f32 %v1664_v8, %v1663_v3  ;;  %v1268_v23 = vadd.f32 %v1690_v11, %v1219_v10 }
 0x133   :  { %v1710_v18 = vpop.f32.mrf.mxu0  ;;  %v1692_v21 = vpop.f32.mrf.mxu1 }
 0x134   :  { %v1222_v17 = vadd.f32 %v1665_v12, %v1173_v9  ;;  %v1693_v22 = vadd.f32 %v1692_v21, %v1691_v16  ;;  %v1317_v30 = vadd.f32 %v1710_v18, %v1268_v23 }
 0x135   :  { %v1308_v24 = vpop.f32.mrf.mxu0 }
 0x136   :  { %v1271_v26 = vadd.f32 %v1693_v22, %v1222_v17  ;;  %v1309_v28 = vadd.f32 %v1308_v24, %v1260_v25  ;;  %v1355_v39 = vmul.f32 %v1317_v30, %v1317_v30 }
 0x137   :  { %v1711_v27 = vpop.f32.mrf.mxu0 }
 0x138   :  { %v1320_v31 = vadd.f32 %v1711_v27, %v1271_v26  ;;  %v1353_v35 = vmul.f32 %v1309_v28, %v1309_v28 }
 0x139   :  { %v1311_v32 = vpop.f32.mrf.mxu0 }
 0x13a   :  { %v1312_v33 = vadd.f32 %v1311_v32, %v1263_v29  ;;  %v1523_v34 = vpack.c.bf16 %v1320_v31, %v1317_v30  ;;  %v1356_v42 = vmul.f32 %v1320_v31, %v1320_v31 }
 0x13c   :  { %v1518_v36 = vpack.c.bf16 %v1312_v33, %v1309_v28  ;;  %v1343_v37 = vadd.f32 %v1312_v33, %v1309_v28  ;;  %v1354_v38 = vmul.f32 %v1312_v33, %v1312_v33  ;;  %1525 = vst [vmem:[%s2267_s2 + $0x8] sm:$0xff] %v1523_v34  }
 0x13e   :  { %1519 = vst [vmem:[%s2267_s2] sm:$0xff] %v1518_v36   ;;  %v1344_v40 = vadd.f32 %v1343_v37, %v1317_v30  ;;  %v1357_v41 = vadd.f32 %v1354_v38, %v1353_v35 }
 0x140   :  { %v1345_v43 = vadd.f32 %v1344_v40, %v1320_v31  ;;  %v1358_v44 = vadd.f32 %v1357_v41, %v1355_v39 }
 0x142   :  { %v1346_v45 = vrot.slane %v1345_v43, 4  ;;  %v1359_v46 = vadd.f32 %v1358_v44, %v1356_v42 }
 0x144   :  { %v1347_v47 = vadd.f32 %v1346_v45, %v1345_v43  ;;  %v1360_v48 = vrot.slane %v1359_v46, 4 }
 0x146   :  { %v1348_v49 = vrot.slane %v1347_v47, 2  ;;  %v1361_v50 = vadd.f32 %v1360_v48, %v1359_v46 }
 0x148   :  { %v1349_v51 = vadd.f32 %v1348_v49, %v1347_v47  ;;  %v1362_v52 = vrot.slane %v1361_v50, 2 }
 0x14a   :  { %v1350_v53 = vrot.slane %v1349_v51, 1  ;;  %v1363_v54 = vadd.f32 %v1362_v52, %v1361_v50 }
 0x14c   :  { %v1351_v55 = vadd.f32 %v1350_v53, %v1349_v51  ;;  %v1364_v56 = vrot.slane %v1363_v54, 1 }
 0x14e   :  { %1352 = vst [vmem:[%s2268_s3] sm:$0x1] %v1351_v55  ;;  %v1365_v57 = vadd.f32 %v1364_v56, %v1363_v54 }
 0x150   :  { %1366 = vst [vmem:[%s2269_s4] sm:$0x1] %v1365_v57 }

// kernel: discriminator_forward.9
= control target key start
LH: loop header
LB: loop body
LE: loop exit
PB: predicated region body
PF: predicated region fallthrough
CT: control target
= control target key end

     0   :  { %s2344_s1 = inlined_call_operand.vmem [shape: bf16[2048,128], index: 1, kind: input, shape index: {}]   ;;  %s2345_s0 = inlined_call_operand.vmem [shape: bf16[8,2048], index: 0, kind: input, shape index: {}]   ;;  %s2346_s2 = inlined_call_operand.vmem [shape: f32[1,128], index: 2, kind: input, shape index: {}]   ;;  %s2347_s3 = inlined_call_operand.vmem [shape: f32[8,128], index: 3, kind: output, shape index: {}]  }
   0x1   :  { %v1762_v0 = vld [vmem:[%s2344_s1 + $0x78] sm:$0xff]   ;;  %v1766_v4 = vld [vmem:[%s2344_s1 + $0x70] sm:$0xff]   ;;  %v1770_v8 = vld [vmem:[%s2344_s1 + $0x68] sm:$0xff]  }
   0x2   :  { %v1763_v1 = vld [vmem:[%s2344_s1 + $0xf8] sm:$0xff]   ;;  %1586 = vmatprep.subr.bf16.mxu0 %v1762_v0  ;;  %v1767_v5 = vld [vmem:[%s2344_s1 + $0xf0] sm:$0xff]   ;;  %v1771_v9 = vld [vmem:[%s2344_s1 + $0xe8] sm:$0xff]  }
   0x3   :  { %v1764_v2 = vld [vmem:[%s2344_s1 + $0x38] sm:$0xff]   ;;  %1608 = vmatprep.subr.bf16.mxu1 %v1763_v1  ;;  %v1768_v6 = vld [vmem:[%s2344_s1 + $0x30] sm:$0xff]   ;;  %v1772_v10 = vld [vmem:[%s2344_s1 + $0x28] sm:$0xff]  }
   0x4   :  { %v1765_v3 = vld [vmem:[%s2344_s1 + $0xb8] sm:$0xff]   ;;  %1587 = vmatpush3.bf16.msra.mxu0 %v1764_v2  ;;  %v1769_v7 = vld [vmem:[%s2344_s1 + $0xb0] sm:$0xff]   ;;  %v1773_v11 = vld [vmem:[%s2344_s1 + $0xa8] sm:$0xff]  }
   0x5   :  { %1609 = vmatpush3.bf16.msra.mxu1 %v1765_v3  ;;  %1588 = vmatprep.subr.bf16.mxu0 %v1766_v4  ;;  %v1774_v12 = vld [vmem:[%s2344_s1 + $0x60] sm:$0xff]   ;;  %v1778_v16 = vld [vmem:[%s2344_s1 + $0x58] sm:$0xff]   ;;  %v1782_v20 = vld [vmem:[%s2344_s1 + $0x50] sm:$0xff]  }
   0x6   :  { %1610 = vmatprep.subr.bf16.mxu1 %v1767_v5  ;;  %v1775_v13 = vld [vmem:[%s2344_s1 + $0xe0] sm:$0xff]   ;;  %v1779_v17 = vld [vmem:[%s2344_s1 + $0xd8] sm:$0xff]   ;;  %v1783_v21 = vld [vmem:[%s2344_s1 + $0xd0] sm:$0xff]  }
   0x7   :  { %v1776_v14 = vld [vmem:[%s2344_s1 + $0x20] sm:$0xff]   ;;  %v1780_v18 = vld [vmem:[%s2344_s1 + $0x18] sm:$0xff]   ;;  %v1784_v22 = vld [vmem:[%s2344_s1 + $0x10] sm:$0xff]  }
   0x8   :  { %1589 = vmatpush3.bf16.msra.mxu0 %v1768_v6  ;;  %v1777_v15 = vld [vmem:[%s2344_s1 + $0xa0] sm:$0xff]   ;;  %v1781_v19 = vld [vmem:[%s2344_s1 + $0x98] sm:$0xff]   ;;  %v1785_v23 = vld [vmem:[%s2344_s1 + $0x90] sm:$0xff]  }
   0x9   :  { %1611 = vmatpush3.bf16.msra.mxu1 %v1769_v7  ;;  %1590 = vmatprep.subr.bf16.mxu0 %v1770_v8  ;;  %v1786_v24 = vld [vmem:[%s2344_s1 + $0x48] sm:$0xff]   ;;  %v1790_v28 = vld [vmem:[%s2344_s1 + $0x40] sm:$0xff]   ;;  %v1798_v38 = vld [vmem:[%s2344_s1 + $0x178] sm:$0xff]  }
   0xa   :  { %1612 = vmatprep.subr.bf16.mxu1 %v1771_v9  ;;  %v1787_v25 = vld [vmem:[%s2344_s1 + $0xc8] sm:$0xff]   ;;  %v1791_v29 = vld [vmem:[%s2344_s1 + $0xc0] sm:$0xff]   ;;  %v1799_v39 = vld [vmem:[%s2344_s1 + $0x1f8] sm:$0xff]  }
   0xb   :  { %v1788_v26 = vld [vmem:[%s2344_s1 + $0x8] sm:$0xff]   ;;  %v1792_v30 = vld [vmem:[%s2344_s1] sm:$0xff]   ;;  %v1800_v40 = vld [vmem:[%s2344_s1 + $0x138] sm:$0xff]  }
   0xc   :  { %1591 = vmatpush3.bf16.msra.mxu0 %v1772_v10  ;;  %v1789_v27 = vld [vmem:[%s2344_s1 + $0x88] sm:$0xff]   ;;  %v1793_v31 = vld [vmem:[%s2344_s1 + $0x80] sm:$0xff]   ;;  %v1801_v41 = vld [vmem:[%s2344_s1 + $0x1b8] sm:$0xff]  }
   0xd   :  { %1613 = vmatpush3.bf16.msra.mxu1 %v1773_v11  ;;  %1592 = vmatprep.subr.bf16.mxu0 %v1774_v12  ;;  %v15_v32 = vld [vmem:[%s2345_s0] sm:$0xff]  ;;  %v16_v33 = vld [vmem:[%s2345_s0 + $0x8] sm:$0xff]  ;;  %v1802_v42 = vld [vmem:[%s2344_s1 + $0x170] sm:$0xff]  }
   0xe   :  { %1614 = vmatprep.subr.bf16.mxu1 %v1775_v13  ;;  %v1442_v34 = vcombine.low %v15_v32, %v15_v32  ;;  %v1443_v35 = vcombine.high %v15_v32, %v15_v32  ;;  %v1444_v36 = vcombine.low %v16_v33, %v16_v33  ;;  %v1445_v37 = vcombine.high %v16_v33, %v16_v33  ;;  %v1803_v43 = vld [vmem:[%s2344_s1 + $0x1f0] sm:$0xff]   ;;  %v1806_v46 = vld [vmem:[%s2344_s1 + $0x168] sm:$0xff]   ;;  %v1810_v50 = vld [vmem:[%s2344_s1 + $0x160] sm:$0xff]  }
   0xf   :  { %v1804_v44 = vld [vmem:[%s2344_s1 + $0x130] sm:$0xff]   ;;  %v1807_v47 = vld [vmem:[%s2344_s1 + $0x1e8] sm:$0xff]   ;;  %v1811_v51 = vld [vmem:[%s2344_s1 + $0x1e0] sm:$0xff]  }
  0x10   :  { %1593 = vmatpush3.bf16.msra.mxu0 %v1776_v14  ;;  %1142 = vmatprep.mubr.bf16.mxu0 %v1443_v35  ;;  %v1805_v45 = vld [vmem:[%s2344_s1 + $0x1b0] sm:$0xff]   ;;  %v1808_v48 = vld [vmem:[%s2344_s1 + $0x128] sm:$0xff]   ;;  %v1812_v52 = vld [vmem:[%s2344_s1 + $0x120] sm:$0xff]  }
  0x11   :  { %1615 = vmatpush3.bf16.msra.mxu1 %v1777_v15  ;;  %1594 = vmatprep.subr.bf16.mxu0 %v1778_v16  ;;  %v1809_v49 = vld [vmem:[%s2344_s1 + $0x1a8] sm:$0xff]   ;;  %v1813_v53 = vld [vmem:[%s2344_s1 + $0x1a0] sm:$0xff]   ;;  %v1814_v54 = vld [vmem:[%s2344_s1 + $0x158] sm:$0xff]  }
  0x12   :  { %1616 = vmatprep.subr.bf16.mxu1 %v1779_v17  ;;  %1182 = vmatprep.mubr.bf16.mxu1 %v1445_v37  ;;  %v1815_v55 = vld [vmem:[%s2344_s1 + $0x1d8] sm:$0xff]   ;;  %v1818_v58 = vld [vmem:[%s2344_s1 + $0x150] sm:$0xff]   ;;  %v1822_v62 = vld [vmem:[%s2344_s1 + $0x148] sm:$0xff]  }
  0x13   :  { %v1816_v56 = vld [vmem:[%s2344_s1 + $0x118] sm:$0xff]   ;;  %v1819_v59 = vld [vmem:[%s2344_s1 + $0x1d0] sm:$0xff]   ;;  %v1823_v63 = vld [vmem:[%s2344_s1 + $0x1c8] sm:$0xff]  }
  0x14   :  { %1595 = vmatpush3.bf16.msra.mxu0 %v1780_v18  ;;  %v1817_v57 = vld [vmem:[%s2344_s1 + $0x198] sm:$0xff]   ;;  %v1820_v60 = vld [vmem:[%s2344_s1 + $0x110] sm:$0xff]   ;;  %v1824_v0 = vld [vmem:[%s2344_s1 + $0x108] sm:$0xff]  }
  0x15   :  { %1617 = vmatpush3.bf16.msra.mxu1 %v1781_v19  ;;  %1596 = vmatprep.subr.bf16.mxu0 %v1782_v20  ;;  %v1821_v61 = vld [vmem:[%s2344_s1 + $0x190] sm:$0xff]   ;;  %v1825_v1 = vld [vmem:[%s2344_s1 + $0x188] sm:$0xff]   ;;  %v1826_v2 = vld [vmem:[%s2344_s1 + $0x140] sm:$0xff]  }
  0x16   :  { %1618 = vmatprep.subr.bf16.mxu1 %v1783_v21  ;;  %v1827_v3 = vld [vmem:[%s2344_s1 + $0x1c0] sm:$0xff]   ;;  %v17_v6 = vld [vmem:[%s2345_s0 + $0x10] sm:$0xff]  ;;  %v18_v9 = vld [vmem:[%s2345_s0 + $0x18] sm:$0xff] }
  0x17   :  { %v1828_v4 = vld [vmem:[%s2344_s1 + $0x100] sm:$0xff]   ;;  %v1446_v7 = vcombine.low %v17_v6, %v17_v6  ;;  %v1447_v8 = vcombine.high %v17_v6, %v17_v6  ;;  %v1448_v10 = vcombine.low %v18_v9, %v18_v9  ;;  %v1449_v11 = vcombine.high %v18_v9, %v18_v9  ;;  %v1834_v12 = vld [vmem:[%s2344_s1 + $0x278] sm:$0xff]   ;;  %v1838_v16 = vld [vmem:[%s2344_s1 + $0x270] sm:$0xff]  }
  0x18   :  { %1597 = vmatpush3.bf16.msra.mxu0 %v1784_v22  ;;  %v1829_v5 = vld [vmem:[%s2344_s1 + $0x180] sm:$0xff]   ;;  %v1835_v13 = vld [vmem:[%s2344_s1 + $0x2f8] sm:$0xff]   ;;  %v1839_v17 = vld [vmem:[%s2344_s1 + $0x2f0] sm:$0xff]  }
  0x19   :  { %1619 = vmatpush3.bf16.msra.mxu1 %v1785_v23  ;;  %1598 = vmatprep.subr.bf16.mxu0 %v1786_v24  ;;  %v1836_v14 = vld [vmem:[%s2344_s1 + $0x238] sm:$0xff]   ;;  %v1840_v18 = vld [vmem:[%s2344_s1 + $0x230] sm:$0xff]   ;;  %v1842_v20 = vld [vmem:[%s2344_s1 + $0x268] sm:$0xff]  }
  0x1a   :  { %1620 = vmatprep.subr.bf16.mxu1 %v1787_v25  ;;  %v1837_v15 = vld [vmem:[%s2344_s1 + $0x2b8] sm:$0xff]   ;;  %v1841_v19 = vld [vmem:[%s2344_s1 + $0x2b0] sm:$0xff]   ;;  %v1843_v21 = vld [vmem:[%s2344_s1 + $0x2e8] sm:$0xff]  }
  0x1b   :  { %v1844_v22 = vld [vmem:[%s2344_s1 + $0x228] sm:$0xff]   ;;  %v1846_v24 = vld [vmem:[%s2344_s1 + $0x260] sm:$0xff]   ;;  %v1854_v32 = vld [vmem:[%s2344_s1 + $0x250] sm:$0xff]  }
  0x1c   :  { %1599 = vmatpush3.bf16.msra.mxu0 %v1788_v26  ;;  %v1845_v23 = vld [vmem:[%s2344_s1 + $0x2a8] sm:$0xff]   ;;  %v1847_v25 = vld [vmem:[%s2344_s1 + $0x2e0] sm:$0xff]   ;;  %v1855_v33 = vld [vmem:[%s2344_s1 + $0x2d0] sm:$0xff]  }
  0x1d   :  { %1621 = vmatpush3.bf16.msra.mxu1 %v1789_v27  ;;  %1600 = vmatprep.subr.bf16.mxu0 %v1790_v28  ;;  %v1848_v26 = vld [vmem:[%s2344_s1 + $0x220] sm:$0xff]   ;;  %v1850_v28 = vld [vmem:[%s2344_s1 + $0x258] sm:$0xff]   ;;  %v1857_v35 = vld [vmem:[%s2344_s1 + $0x290] sm:$0xff]  }
  0x1e   :  { %1622 = vmatprep.subr.bf16.mxu1 %v1791_v29  ;;  %v1849_v27 = vld [vmem:[%s2344_s1 + $0x2a0] sm:$0xff]   ;;  %v1851_v29 = vld [vmem:[%s2344_s1 + $0x2d8] sm:$0xff]   ;;  %v1859_v37 = vld [vmem:[%s2344_s1 + $0x2c8] sm:$0xff]  }
  0x1f   :  { %v1890_v6 = vld [vmem:[%s2344_s1 + $0x350] sm:$0xff]  }
  0x20   :  { %1601 = vmatpush3.bf16.msra.mxu0 %v1792_v30  ;;  %v1852_v30 = vld [vmem:[%s2344_s1 + $0x218] sm:$0xff]   ;;  %v1893_v9 = vld [vmem:[%s2344_s1 + $0x390] sm:$0xff]  }
  0x21   :  { %1623 = vmatpush3.bf16.msra.mxu1 %v1793_v31  ;;  %1630 = vmatprep.subr.bf16.mxu0 %v1798_v38  ;;  %v1853_v31 = vld [vmem:[%s2344_s1 + $0x298] sm:$0xff]   ;;  %v1860_v38 = vld [vmem:[%s2344_s1 + $0x208] sm:$0xff]  }
  0x22   :  { %1652 = vmatprep.subr.bf16.mxu1 %v1799_v39  ;;  %v1861_v39 = vld [vmem:[%s2344_s1 + $0x288] sm:$0xff]  }
  0x23   :  { %1143 = vmatmul.mubr.bf16.vlgmr.msra.gmra.mxu0 %v1442_v34  ;;  %v1856_v34 = vld [vmem:[%s2344_s1 + $0x210] sm:$0xff]  }
  0x24   :  { %1183 = vmatmul.mubr.bf16.vlgmr.msra.gmra.mxu1 %v1444_v36  ;;  %1631 = vmatpush3.bf16.msra.mxu0 %v1800_v40  ;;  %v1858_v36 = vld [vmem:[%s2344_s1 + $0x248] sm:$0xff]   ;;  %v1862_v40 = vld [vmem:[%s2344_s1 + $0x240] sm:$0xff]  }
  0x25   :  { %1653 = vmatpush3.bf16.msra.mxu1 %v1801_v41  ;;  %1632 = vmatprep.subr.bf16.mxu0 %v1802_v42  ;;  %v1863_v41 = vld [vmem:[%s2344_s1 + $0x2c0] sm:$0xff]  }
  0x26   :  { %1654 = vmatprep.subr.bf16.mxu1 %v1803_v43  ;;  %1222 = vmatprep.mubr.bf16.mxu0 %v1447_v8  ;;  %v1864_v42 = vld [vmem:[%s2344_s1 + $0x200] sm:$0xff]   ;;  %v1892_v8 = vld [vmem:[%s2344_s1 + $0x310] sm:$0xff]  }
  0x27   :  { %1262 = vmatprep.mubr.bf16.mxu1 %v1449_v11  ;;  %v1865_v43 = vld [vmem:[%s2344_s1 + $0x280] sm:$0xff]   ;;  %v1895_v11 = vld [vmem:[%s2344_s1 + $0x3c8] sm:$0xff]  }
  0x28   :  { %1633 = vmatpush3.bf16.msra.mxu0 %v1804_v44  ;;  %v19_v44 = vld [vmem:[%s2345_s0 + $0x20] sm:$0xff] }
  0x29   :  { %1655 = vmatpush3.bf16.msra.mxu1 %v1805_v45  ;;  %1634 = vmatprep.subr.bf16.mxu0 %v1806_v46  ;;  %v20_v45 = vld [vmem:[%s2345_s0 + $0x28] sm:$0xff]  ;;  %v1450_v46 = vcombine.low %v19_v44, %v19_v44 }
  0x2a   :  { %1656 = vmatprep.subr.bf16.mxu1 %v1807_v47  ;;  %v1451_v47 = vcombine.high %v19_v44, %v19_v44 }
  0x2c   :  { %1635 = vmatpush3.bf16.msra.mxu0 %v1808_v48  ;;  %v1452_v48 = vcombine.low %v20_v45, %v20_v45 }
  0x2d   :  { %1657 = vmatpush3.bf16.msra.mxu1 %v1809_v49  ;;  %1636 = vmatprep.subr.bf16.mxu0 %v1810_v50  ;;  %v1453_v49 = vcombine.high %v20_v45, %v20_v45  ;;  %v1870_v50 = vld [vmem:[%s2344_s1 + $0x378] sm:$0xff]  }
  0x2e   :  { %1658 = vmatprep.subr.bf16.mxu1 %v1811_v51  ;;  %v1871_v51 = vld [vmem:[%s2344_s1 + $0x3f8] sm:$0xff]  }
  0x30   :  { %1637 = vmatpush3.bf16.msra.mxu0 %v1812_v52  ;;  %v1872_v52 = vld [vmem:[%s2344_s1 + $0x338] sm:$0xff]  }
  0x31   :  { %1659 = vmatpush3.bf16.msra.mxu1 %v1813_v53  ;;  %1638 = vmatprep.subr.bf16.mxu0 %v1814_v54  ;;  %v1873_v53 = vld [vmem:[%s2344_s1 + $0x3b8] sm:$0xff]   ;;  %v1874_v54 = vld [vmem:[%s2344_s1 + $0x370] sm:$0xff]  }
  0x32   :  { %1660 = vmatprep.subr.bf16.mxu1 %v1815_v55  ;;  %v1875_v55 = vld [vmem:[%s2344_s1 + $0x3f0] sm:$0xff]  }
  0x34   :  { %1639 = vmatpush3.bf16.msra.mxu0 %v1816_v56  ;;  %v1876_v56 = vld [vmem:[%s2344_s1 + $0x330] sm:$0xff]  }
  0x35   :  { %1661 = vmatpush3.bf16.msra.mxu1 %v1817_v57  ;;  %1640 = vmatprep.subr.bf16.mxu0 %v1818_v58  ;;  %v1877_v57 = vld [vmem:[%s2344_s1 + $0x3b0] sm:$0xff]   ;;  %v1878_v58 = vld [vmem:[%s2344_s1 + $0x368] sm:$0xff]  }
  0x36   :  { %1662 = vmatprep.subr.bf16.mxu1 %v1819_v59  ;;  %v1879_v59 = vld [vmem:[%s2344_s1 + $0x3e8] sm:$0xff]  }
  0x38   :  { %1641 = vmatpush3.bf16.msra.mxu0 %v1820_v60  ;;  %v1880_v60 = vld [vmem:[%s2344_s1 + $0x328] sm:$0xff]  }
  0x39   :  { %1663 = vmatpush3.bf16.msra.mxu1 %v1821_v61  ;;  %1642 = vmatprep.subr.bf16.mxu0 %v1822_v62  ;;  %v1881_v61 = vld [vmem:[%s2344_s1 + $0x3a8] sm:$0xff]   ;;  %v1882_v62 = vld [vmem:[%s2344_s1 + $0x360] sm:$0xff]  }
  0x3a   :  { %1664 = vmatprep.subr.bf16.mxu1 %v1823_v63  ;;  %v1883_v63 = vld [vmem:[%s2344_s1 + $0x3e0] sm:$0xff]  }
  0x3c   :  { %1643 = vmatpush3.bf16.msra.mxu0 %v1824_v0  ;;  %v1884_v0 = vld [vmem:[%s2344_s1 + $0x320] sm:$0xff]  }
  0x3d   :  { %1665 = vmatpush3.bf16.msra.mxu1 %v1825_v1  ;;  %1644 = vmatprep.subr.bf16.mxu0 %v1826_v2  ;;  %v1885_v1 = vld [vmem:[%s2344_s1 + $0x3a0] sm:$0xff]   ;;  %v1886_v2 = vld [vmem:[%s2344_s1 + $0x358] sm:$0xff]  }
  0x3e   :  { %1666 = vmatprep.subr.bf16.mxu1 %v1827_v3  ;;  %v1887_v3 = vld [vmem:[%s2344_s1 + $0x3d8] sm:$0xff]  }
  0x40   :  { %1645 = vmatpush3.bf16.msra.mxu0 %v1828_v4  ;;  %v1888_v4 = vld [vmem:[%s2344_s1 + $0x318] sm:$0xff]  }
  0x41   :  { %1667 = vmatpush3.bf16.msra.mxu1 %v1829_v5  ;;  %1674 = vmatprep.subr.bf16.mxu0 %v1834_v12  ;;  %v1889_v5 = vld [vmem:[%s2344_s1 + $0x398] sm:$0xff]   ;;  %v1896_v12 = vld [vmem:[%s2344_s1 + $0x308] sm:$0xff]  }
  0x42   :  { %1696 = vmatprep.subr.bf16.mxu1 %v1835_v13  ;;  %v1897_v13 = vld [vmem:[%s2344_s1 + $0x388] sm:$0xff]  }
  0x43   :  { %1223 = vmatmul.mubr.bf16.vlgmr.msra.gmra.mxu0 %v1446_v7  ;;  %v1891_v7 = vld [vmem:[%s2344_s1 + $0x3d0] sm:$0xff]  }
  0x44   :  { %1263 = vmatmul.mubr.bf16.vlgmr.msra.gmra.mxu1 %v1448_v10  ;;  %1675 = vmatpush3.bf16.msra.mxu0 %v1836_v14  ;;  %v1894_v10 = vld [vmem:[%s2344_s1 + $0x348] sm:$0xff]   ;;  %v1898_v14 = vld [vmem:[%s2344_s1 + $0x340] sm:$0xff]  }
  0x45   :  { %1697 = vmatpush3.bf16.msra.mxu1 %v1837_v15  ;;  %1676 = vmatprep.subr.bf16.mxu0 %v1838_v16  ;;  %v1899_v15 = vld [vmem:[%s2344_s1 + $0x3c0] sm:$0xff]  }
  0x46   :  { %1698 = vmatprep.subr.bf16.mxu1 %v1839_v17  ;;  %1302 = vmatprep.mubr.bf16.mxu0 %v1451_v47  ;;  %v1900_v16 = vld [vmem:[%s2344_s1 + $0x300] sm:$0xff]  }
  0x47   :  { %1342 = vmatprep.mubr.bf16.mxu1 %v1453_v49  ;;  %v1901_v17 = vld [vmem:[%s2344_s1 + $0x380] sm:$0xff]  }
  0x48   :  { %1677 = vmatpush3.bf16.msra.mxu0 %v1840_v18  ;;  %v21_v18 = vld [vmem:[%s2345_s0 + $0x30] sm:$0xff] }
  0x49   :  { %1699 = vmatpush3.bf16.msra.mxu1 %v1841_v19  ;;  %1678 = vmatprep.subr.bf16.mxu0 %v1842_v20  ;;  %v22_v19 = vld [vmem:[%s2345_s0 + $0x38] sm:$0xff]  ;;  %v1454_v20 = vcombine.low %v21_v18, %v21_v18 }
  0x4a   :  { %1700 = vmatprep.subr.bf16.mxu1 %v1843_v21  ;;  %v1455_v21 = vcombine.high %v21_v18, %v21_v18 }
  0x4c   :  { %1679 = vmatpush3.bf16.msra.mxu0 %v1844_v22  ;;  %v1456_v22 = vcombine.low %v22_v19, %v22_v19 }
  0x4d   :  { %1701 = vmatpush3.bf16.msra.mxu1 %v1845_v23  ;;  %1680 = vmatprep.subr.bf16.mxu0 %v1846_v24  ;;  %v1457_v23 = vcombine.high %v22_v19, %v22_v19 }
  0x4e   :  { %1702 = vmatprep.subr.bf16.mxu1 %v1847_v25 }
  0x50   :  { %1681 = vmatpush3.bf16.msra.mxu0 %v1848_v26  ;;  %v1441_v26 = vld [vmem:[%s2346_s2] ss:$0 sm:$0xff] }
  0x51   :  { %1703 = vmatpush3.bf16.msra.mxu1 %v1849_v27  ;;  %1682 = vmatprep.subr.bf16.mxu0 %v1850_v28 }
  0x52   :  { %1704 = vmatprep.subr.bf16.mxu1 %v1851_v29 }
  0x54   :  { %1683 = vmatpush3.bf16.msra.mxu0 %v1852_v30 }
  0x55   :  { %1705 = vmatpush3.bf16.msra.mxu1 %v1853_v31  ;;  %1684 = vmatprep.subr.bf16.mxu0 %v1854_v32 }
  0x56   :  { %1706 = vmatprep.subr.bf16.mxu1 %v1855_v33 }
  0x58   :  { %1685 = vmatpush3.bf16.msra.mxu0 %v1856_v34 }
  0x59   :  { %1707 = vmatpush3.bf16.msra.mxu1 %v1857_v35  ;;  %1686 = vmatprep.subr.bf16.mxu0 %v1858_v36 }
  0x5a   :  { %1708 = vmatprep.subr.bf16.mxu1 %v1859_v37 }
  0x5c   :  { %1687 = vmatpush3.bf16.msra.mxu0 %v1860_v38 }
  0x5d   :  { %1709 = vmatpush3.bf16.msra.mxu1 %v1861_v39  ;;  %1688 = vmatprep.subr.bf16.mxu0 %v1862_v40 }
  0x5e   :  { %1710 = vmatprep.subr.bf16.mxu1 %v1863_v41 }
  0x60   :  { %1689 = vmatpush3.bf16.msra.mxu0 %v1864_v42 }
  0x61   :  { %1711 = vmatpush3.bf16.msra.mxu1 %v1865_v43  ;;  %1718 = vmatprep.subr.bf16.mxu0 %v1870_v50 }
  0x62   :  { %1740 = vmatprep.subr.bf16.mxu1 %v1871_v51 }
  0x63   :  { %1303 = vmatmul.mubr.bf16.vlgmr.msra.gmra.mxu0 %v1450_v46 }
  0x64   :  { %1343 = vmatmul.mubr.bf16.vlgmr.msra.gmra.mxu1 %v1452_v48  ;;  %1719 = vmatpush3.bf16.msra.mxu0 %v1872_v52 }
  0x65   :  { %1741 = vmatpush3.bf16.msra.mxu1 %v1873_v53  ;;  %1720 = vmatprep.subr.bf16.mxu0 %v1874_v54 }
  0x66   :  { %1742 = vmatprep.subr.bf16.mxu1 %v1875_v55  ;;  %1382 = vmatprep.mubr.bf16.mxu0 %v1455_v21 }
  0x67   :  { %1422 = vmatprep.mubr.bf16.mxu1 %v1457_v23 }
  0x68   :  { %1721 = vmatpush3.bf16.msra.mxu0 %v1876_v56 }
  0x69   :  { %1743 = vmatpush3.bf16.msra.mxu1 %v1877_v57  ;;  %1722 = vmatprep.subr.bf16.mxu0 %v1878_v58 }
  0x6a   :  { %1744 = vmatprep.subr.bf16.mxu1 %v1879_v59 }
  0x6c   :  { %1723 = vmatpush3.bf16.msra.mxu0 %v1880_v60 }
  0x6d   :  { %1745 = vmatpush3.bf16.msra.mxu1 %v1881_v61  ;;  %1724 = vmatprep.subr.bf16.mxu0 %v1882_v62 }
  0x6e   :  { %1746 = vmatprep.subr.bf16.mxu1 %v1883_v63 }
  0x70   :  { %1725 = vmatpush3.bf16.msra.mxu0 %v1884_v0 }
  0x71   :  { %1747 = vmatpush3.bf16.msra.mxu1 %v1885_v1  ;;  %1726 = vmatprep.subr.bf16.mxu0 %v1886_v2 }
  0x72   :  { %1748 = vmatprep.subr.bf16.mxu1 %v1887_v3 }
  0x74   :  { %1727 = vmatpush3.bf16.msra.mxu0 %v1888_v4 }
  0x75   :  { %1749 = vmatpush3.bf16.msra.mxu1 %v1889_v5  ;;  %1728 = vmatprep.subr.bf16.mxu0 %v1890_v6 }
  0x76   :  { %1750 = vmatprep.subr.bf16.mxu1 %v1891_v7 }
  0x78   :  { %1729 = vmatpush3.bf16.msra.mxu0 %v1892_v8 }
  0x79   :  { %1751 = vmatpush3.bf16.msra.mxu1 %v1893_v9  ;;  %1730 = vmatprep.subr.bf16.mxu0 %v1894_v10 }
  0x7a   :  { %1752 = vmatprep.subr.bf16.mxu1 %v1895_v11 }
  0x7c   :  { %1731 = vmatpush3.bf16.msra.mxu0 %v1896_v12 }
  0x7d   :  { %1753 = vmatpush3.bf16.msra.mxu1 %v1897_v13  ;;  %1732 = vmatprep.subr.bf16.mxu0 %v1898_v14 }
  0x7e   :  { %1754 = vmatprep.subr.bf16.mxu1 %v1899_v15 }
  0x80   :  { %1733 = vmatpush3.bf16.msra.mxu0 %v1900_v16 }
  0x81   :  { %1755 = vmatpush3.bf16.msra.mxu1 %v1901_v17 }
  0x83   :  { %1383 = vmatmul.mubr.bf16.vlgmr.msra.gmra.mxu0 %v1454_v20 }
  0x84   :  { %1423 = vmatmul.mubr.bf16.vlgmr.msra.gmra.mxu1 %v1456_v22 }
  0xe3   :  { %v1602_v24 = vpop.f32.mrf.mxu0 }
  0xe4   :  { %v1624_v25 = vpop.f32.mrf.mxu1 }
  0xe5   :  { %v1603_v27 = vpop.f32.mrf.mxu0 }
  0xe6   :  { %v1625_v28 = vpop.f32.mrf.mxu1  ;;  %v1604_v29 = vadd.f32 %v1603_v27, %v1602_v24 }
  0xe7   :  { %v1626_v30 = vadd.f32 %v1625_v28, %v1624_v25  ;;  %v1605_v31 = vpop.f32.mrf.mxu0 }
  0xe8   :  { %v1627_v32 = vpop.f32.mrf.mxu1  ;;  %v1145_v33 = vadd.f32 %v1604_v29, %v1441_v26 }
  0xe9   :  { %v1606_v34 = vpop.f32.mrf.mxu0 }
  0xea   :  { %v1628_v35 = vpop.f32.mrf.mxu1  ;;  %v1185_v36 = vadd.f32 %v1626_v30, %v1145_v33 }
 0x103   :  { %v1646_v37 = vpop.f32.mrf.mxu0 }
 0x104   :  { %v1668_v38 = vpop.f32.mrf.mxu1 }
 0x105   :  { %v1647_v39 = vpop.f32.mrf.mxu0 }
 0x106   :  { %v1669_v40 = vpop.f32.mrf.mxu1  ;;  %v1648_v53 = vadd.f32 %v1647_v39, %v1646_v37 }
 0x107   :  { %v1649_v41 = vpop.f32.mrf.mxu0  ;;  %v1670_v55 = vadd.f32 %v1669_v40, %v1668_v38 }
 0x108   :  { %v1671_v42 = vpop.f32.mrf.mxu1  ;;  %v1225_v54 = vadd.f32 %v1648_v53, %v1185_v36 }
 0x109   :  { %v1650_v43 = vpop.f32.mrf.mxu0 }
 0x10a   :  { %v1672_v44 = vpop.f32.mrf.mxu1  ;;  %v1265_v57 = vadd.f32 %v1670_v55, %v1225_v54 }
 0x123   :  { %v1690_v45 = vpop.f32.mrf.mxu0 }
 0x124   :  { %v1712_v46 = vpop.f32.mrf.mxu1 }
 0x125   :  { %v1691_v47 = vpop.f32.mrf.mxu0 }
 0x126   :  { %v1713_v48 = vpop.f32.mrf.mxu1  ;;  %v1692_v56 = vadd.f32 %v1691_v47, %v1690_v45 }
 0x127   :  { %v1693_v49 = vpop.f32.mrf.mxu0  ;;  %v1714_v59 = vadd.f32 %v1713_v48, %v1712_v46 }
 0x128   :  { %v1715_v50 = vpop.f32.mrf.mxu1  ;;  %v1305_v58 = vadd.f32 %v1692_v56, %v1265_v57 }
 0x129   :  { %v1694_v51 = vpop.f32.mrf.mxu0 }
 0x12a   :  { %v1716_v52 = vpop.f32.mrf.mxu1  ;;  %v1345_v63 = vadd.f32 %v1714_v59, %v1305_v58 }
 0x143   :  { %v1734_v60 = vpop.f32.mrf.mxu0 }
 0x144   :  { %v1756_v61 = vpop.f32.mrf.mxu1 }
 0x145   :  { %v1735_v62 = vpop.f32.mrf.mxu0 }
 0x146   :  { %v1736_v0 = vadd.f32 %v1735_v62, %v1734_v60  ;;  %v1757_v1 = vpop.f32.mrf.mxu1 }
 0x147   :  { %v1737_v2 = vpop.f32.mrf.mxu0  ;;  %v1758_v4 = vadd.f32 %v1757_v1, %v1756_v61 }
 0x148   :  { %v1385_v3 = vadd.f32 %v1736_v0, %v1345_v63  ;;  %v1759_v5 = vpop.f32.mrf.mxu1 }
 0x149   :  { %v1738_v6 = vpop.f32.mrf.mxu0 }
 0x14a   :  { %v1425_v7 = vadd.f32 %v1758_v4, %v1385_v3  ;;  %v1760_v8 = vpop.f32.mrf.mxu1 }
 0x14c   :  { %v1430_v9 = vsub.f32 0.0, %v1425_v7 }
 0x14e   :  { %v1431_v10 = vmul.f32 1.442695, %v1430_v9 }
 0x150   :  { %1906 = vpow2.f32 %v1431_v10 }
 0x15d   :  { %v1907_v11 = vpop.eup %1906 }
 0x15e   :  { %v1433_v12 = vadd.f32 1.0, %v1907_v11 }
 0x160   :  { %1908 = vrcp.f32 %v1433_v12 }
 0x16d   :  { %v1909_v13 = vpop.eup %1908 }
 0x16e   :  { %1436 = vst [vmem:[%s2347_s3] sm:$0xff] %v1909_v13 }

</bundles_post_ra>
